<compile_context>
chip_gen: v7x
topology: tpu7x:2x2x1
jax: 0.10.0
libtpu: 0.0.40
codegen_flags: <defaults>
</compile_context>

<pallas_src>
import functools

import jax
import jax.numpy as jnp
from jax import lax
from jax.experimental import pallas as pl
from jax.experimental.pallas import tpu as pltpu

# ---------------------------------------------------------------------------
# Model hyper-parameters (fixed by the PyTorch module spec)
# ---------------------------------------------------------------------------
INPUT_DIM = 8
L_IN = 7 * 24                        # 168
HIDDEN = [INPUT_DIM, 32, 64, 64]
K = 5
STRIDES = (2, 2, 2)
PADDINGS = (0, 0, 0)
OUT_PADS = (1, 1, 0)
DILATIONS = (1, 2, 4)
EMBED = 64
NEG_SLOPE = 0.01                     # PyTorch LeakyReLU default


def _enc_l_out(l, p, k, s, d):
    return (l + 2 * p - d * (k - 1) - 1) // s + 1


ENC_L = [L_IN]
for _i in range(3):
    ENC_L.append(_enc_l_out(ENC_L[-1], PADDINGS[_i], K, STRIDES[_i], DILATIONS[_i]))
# ENC_L == [168, 82, 37, 11]
L_LAT = ENC_L[-1]                    # 11
FC_IN = L_LAT * HIDDEN[-1]           # 704

# decoder layers in forward order (PyTorch builds them with reversed hyper-params)
DEC_CIN = (HIDDEN[3], HIDDEN[2], HIDDEN[1])      # 64, 64, 32
DEC_COUT = (HIDDEN[2], HIDDEN[1], 1)             # 64, 32, 1
DEC_STRIDES = STRIDES[::-1]
DEC_PADS = PADDINGS[::-1]
DEC_OPADS = OUT_PADS[::-1]                       # (0, 1, 1)
DEC_DILS = DILATIONS[::-1]                       # (4, 2, 1)

# guard against negative implicit padding (review correctness concern)
for _i in range(3):
    assert DEC_DILS[_i] * (K - 1) - DEC_PADS[_i] >= 0, "unsupported ConvTranspose1d padding"


# ---------------------------------------------------------------------------
# In-kernel helpers (operate on jnp values with static shapes)
# ---------------------------------------------------------------------------
def _leaky(y):
    # single VALU op instead of cmp+mul+select
    return jnp.maximum(y, NEG_SLOPE * y)


def _decimate(y, stride):
    """Keep columns 0, s, 2s, ... of y (C, L) via a 0/1 selection matmul (exact, fp32)."""
    if stride == 1:
        return y
    l_in = y.shape[1]
    l_out = (l_in - 1) // stride + 1
    r = lax.broadcasted_iota(jnp.int32, (l_in, l_out), 0)
    c = lax.broadcasted_iota(jnp.int32, (l_in, l_out), 1)
    sel = (r == c * stride).astype(y.dtype)
    return jnp.dot(y, sel, preferred_element_type=jnp.float32)


def _zero_stuff_pad(x, stride, pad_l, pad_r):
    """(C, L) -> (C, (L-1)*stride + 1 + pad_l + pad_r): zero-stuff + pad, as a 0/1 matmul."""
    l_in = x.shape[1]
    l_out = (l_in - 1) * stride + 1 + pad_l + pad_r
    r = lax.broadcasted_iota(jnp.int32, (l_in, l_out), 0)
    c = lax.broadcasted_iota(jnp.int32, (l_in, l_out), 1)
    sel = (c == r * stride + pad_l).astype(x.dtype)
    return jnp.dot(x, sel, preferred_element_type=jnp.float32)


def _conv_taps(x, w_ref, dilation):
    """Stride-1 dilated 'valid' conv: x (C_in, L) fp32, w_ref (K, C_out, C_in) bf16.

    Returns fp32 (C_out, L - dilation*(K-1)) accumulated over K per-tap MXU matmuls.
    """
    kk, c_out, c_in = w_ref.shape
    n_out = x.shape[1] - dilation * (kk - 1)
    x_bf = x.astype(jnp.bfloat16)
    acc = jnp.zeros((c_out, n_out), jnp.float32)
    for k in range(kk):
        xk = lax.slice(x_bf, (0, k * dilation), (c_in, k * dilation + n_out))
        acc = acc + jnp.dot(w_ref[k], xk, preferred_element_type=jnp.float32)
    return acc


# ---------------------------------------------------------------------------
# The fused kernel (one grid step == one batch sample)
# ---------------------------------------------------------------------------
def _vae_kernel(inp_ref, eps_ref,
                ew0, eb0, ew1, eb1, ew2, eb2,
                w12_ref, b12_ref, w3_ref, b3_ref,
                dw0, db0, dw1, db1, dw2, db2,
                out_ref, mu_ref, lv_ref):
    enc_w = (ew0, ew1, ew2)
    enc_b = (eb0, eb1, eb2)
    dec_w = (dw0, dw1, dw2)
    dec_b = (db0, db1, db2)

    # ------------------ encoder: (Conv1d + LeakyReLU) x 3 ------------------
    x = inp_ref[0]                                       # (8, 168) fp32, (C, L) layout
    for i in range(3):
        acc = _conv_taps(x, enc_w[i], DILATIONS[i])      # (C_out, L_dense)
        acc = _decimate(acc, STRIDES[i])                 # (C_out, L_out)
        x = _leaky(acc + enc_b[i][...])
    # x: (64, 11)

    # ------------- bottleneck: fc1 & fc2 (fused), reparam, fc3 -------------
    # flatten order (c-major, torch .view) is absorbed into the packed weights.
    h = x.astype(jnp.bfloat16)                           # (64, 11)
    me = b12_ref[...]                                    # (128, 1) fp32 (bias, starts acc)
    for l in range(L_LAT):
        col = lax.slice(h, (0, l), (HIDDEN[-1], l + 1))  # (64, 1)
        me = me + jnp.dot(w12_ref[l], col, preferred_element_type=jnp.float32)
    mu = me[:EMBED, :]                                   # (64, 1)
    logvar = me[EMBED:, :]                               # (64, 1)
    mu_ref[0] = mu
    lv_ref[0] = logvar

    # TODO(synk): torch.randn_like inside forward replaced by externally supplied eps.
    eps = eps_ref[0]                                     # (64, 1)
    z = mu + eps * jnp.exp(0.5 * logvar)                 # (64, 1) fp32
    z_bf = z.astype(jnp.bfloat16)

    # fc3 -> decoder input in (C=64, L=11) layout; assemble columns with one-hot masks
    lane_row = lax.broadcasted_iota(jnp.int32, (1, L_LAT), 1)     # (1, 11)
    d0 = jnp.zeros((HIDDEN[-1], L_LAT), jnp.float32)
    for l in range(L_LAT):
        col = jnp.dot(w3_ref[l], z_bf, preferred_element_type=jnp.float32) + b3_ref[l]
        d0 = d0 + col * (lane_row == l).astype(jnp.float32)

    # --------------- decoder: (ConvTranspose1d + LeakyReLU) x 3 ---------------
    x = d0
    for i in range(3):
        d = DEC_DILS[i]
        pad_l = d * (K - 1) - DEC_PADS[i]
        pad_r = d * (K - 1) - DEC_PADS[i] + DEC_OPADS[i]
        xp = _zero_stuff_pad(x, DEC_STRIDES[i], pad_l, pad_r)     # (C_in, L_pad)
        acc = _conv_taps(xp, dec_w[i], d)                         # (C_out, L_out)
        x = _leaky(acc + dec_b[i][...])
    # x: (1, 168)  -- lane-dense final store
    out_ref[0] = x


# ---------------------------------------------------------------------------
# Parameters, pre-packed into matmul-ready layouts
# ---------------------------------------------------------------------------
def make_params(key):
    ks = jax.random.split(key, 9)

    def nrm(k, shape, std):
        return std * jax.random.normal(k, shape, dtype=jnp.float32)

    params = {}

    # encoder Conv1d: kaiming_normal(fan_out, relu) -> std = sqrt(2/(C_out*K)); bias 0
    enc = []
    for i in range(3):
        c_in, c_out = HIDDEN[i], HIDDEN[i + 1]
        w = nrm(ks[i], (c_out, c_in, K), (2.0 / (c_out * K)) ** 0.5)   # torch (C_out,C_in,K)
        wp = jnp.transpose(w, (2, 0, 1)).astype(jnp.bfloat16)          # (K, C_out, C_in)
        enc.append({"w": wp, "b": jnp.zeros((c_out, 1), jnp.float32)})
    params["enc"] = enc

    # fc1/fc2 (Linear: normal(0, 0.01), bias 0), fused; packing absorbs the c-major flatten:
    # w12[l, e, c] = fc.weight[e, c*L_LAT + l]   (fc1 -> rows 0..63, fc2 -> rows 64..127)
    def pack_fc_in(w):  # (EMBED, FC_IN) -> (L_LAT, EMBED, C)
        return jnp.transpose(w.reshape(EMBED, HIDDEN[-1], L_LAT), (2, 0, 1))

    w1 = nrm(ks[3], (EMBED, FC_IN), 0.01)
    w2 = nrm(ks[4], (EMBED, FC_IN), 0.01)
    params["w12"] = jnp.concatenate([pack_fc_in(w1), pack_fc_in(w2)], axis=1).astype(jnp.bfloat16)
    params["b12"] = jnp.zeros((2 * EMBED, 1), jnp.float32)

    # fc3: w3[l, c, e] = fc3.weight[c*L_LAT + l, e]; bias packed per latent position (zeros)
    w3 = nrm(ks[5], (FC_IN, EMBED), 0.01)
    params["w3"] = jnp.transpose(w3.reshape(HIDDEN[-1], L_LAT, EMBED), (1, 0, 2)).astype(jnp.bfloat16)
    params["b3"] = jnp.zeros((L_LAT, HIDDEN[-1], 1), jnp.float32)

    # decoder ConvTranspose1d: torch weight (C_in, C_out, K); packed as the equivalent
    # stride-1 conv kernel over the zero-stuffed input: wp[k, c_out, c_in] = w[c_in, c_out, K-1-k]
    # TODO(synk): PyTorch's default ConvTranspose1d kaiming_uniform init is approximated with a
    #             scaled normal (the reference initialize() does not override ConvTranspose1d).
    dec = []
    for i in range(3):
        c_in, c_out = DEC_CIN[i], DEC_COUT[i]
        w = nrm(ks[6 + i], (c_in, c_out, K), (1.0 / (c_in * K)) ** 0.5)
        wp = jnp.transpose(w[:, :, ::-1], (2, 1, 0)).astype(jnp.bfloat16)   # (K, C_out, C_in)
        dec.append({"w": wp, "b": jnp.zeros((c_out, 1), jnp.float32)})
    params["dec"] = dec
    return params


# ---------------------------------------------------------------------------
# Forward pass wrapper (single pallas_call)
# ---------------------------------------------------------------------------
def _const_spec(arr):
    nd = arr.ndim
    return pl.BlockSpec(arr.shape, lambda b, _nd=nd: (0,) * _nd)


def vae_forward(params, inp, eps):
    """inp: (B, 8, 168) fp32 (NCL); eps: (B, 64) fp32.  Returns (out (B,1,168), mu, logvar)."""
    B = inp.shape[0]
    eps_col = eps.reshape(B, EMBED, 1)

    in_specs = [
        pl.BlockSpec((1, INPUT_DIM, L_IN), lambda b: (b, 0, 0)),
        pl.BlockSpec((1, EMBED, 1), lambda b: (b, 0, 0)),
    ]
    flat_w = []

    def add_const(arr):
        flat_w.append(arr)
        in_specs.append(_const_spec(arr))

    for lyr in params["enc"]:
        add_const(lyr["w"]); add_const(lyr["b"])
    add_const(params["w12"]); add_const(params["b12"])
    add_const(params["w3"]); add_const(params["b3"])
    for lyr in params["dec"]:
        add_const(lyr["w"]); add_const(lyr["b"])

    out_shape = (
        jax.ShapeDtypeStruct((B, 1, L_IN), jnp.float32),
        jax.ShapeDtypeStruct((B, EMBED, 1), jnp.float32),
        jax.ShapeDtypeStruct((B, EMBED, 1), jnp.float32),
    )
    out_specs = (
        pl.BlockSpec((1, 1, L_IN), lambda b: (b, 0, 0)),
        pl.BlockSpec((1, EMBED, 1), lambda b: (b, 0, 0)),
        pl.BlockSpec((1, EMBED, 1), lambda b: (b, 0, 0)),
    )

    out, mu, logvar = pl.pallas_call(
        _vae_kernel,
        grid=(B,),
        in_specs=in_specs,
        out_specs=out_specs,
        out_shape=out_shape,
        compiler_params=pltpu.CompilerParams(
            dimension_semantics=("parallel",),
            vmem_limit_bytes=32 * 1024 * 1024,
        ),
    )(inp, eps_col, *flat_w)

    return out, mu.reshape(B, EMBED), logvar.reshape(B, EMBED)


# ---------------------------------------------------------------------------
if __name__ == "__main__":
    key = jax.random.PRNGKey(0)
    kp, kx, ke = jax.random.split(key, 3)

    params = make_params(kp)

    B = 2
    inp = jax.random.normal(kx, (B, INPUT_DIM, L_IN), dtype=jnp.float32)   # (2, 8, 168)
    eps = jax.random.normal(ke, (B, EMBED), dtype=jnp.float32)             # (2, 64)

    fwd = jax.jit(functools.partial(vae_forward, params))
    out, mu, logvar = fwd(inp, eps)
    jax.block_until_ready((out, mu, logvar))

    assert out.shape == (B, 1, L_IN), out.shape
    assert mu.shape == (B, EMBED) and logvar.shape == (B, EMBED)
    assert bool(jnp.all(jnp.isfinite(out)))
    assert bool(jnp.all(jnp.isfinite(mu))) and bool(jnp.all(jnp.isfinite(logvar)))

    print("KERNEL_OK")
</pallas_src>

<mosaic_0001>
module attributes {stable_mosaic.version = 11 : i64} {
  func.func @_vae_kernel(%arg0: i32, %arg1: memref<1x8x168xf32, #tpu.memory_space<vmem>>, %arg2: memref<1x64x1xf32, #tpu.memory_space<vmem>>, %arg3: memref<5x32x8xbf16, #tpu.memory_space<vmem>>, %arg4: memref<32x1xf32, #tpu.memory_space<vmem>>, %arg5: memref<5x64x32xbf16, #tpu.memory_space<vmem>>, %arg6: memref<64x1xf32, #tpu.memory_space<vmem>>, %arg7: memref<5x64x64xbf16, #tpu.memory_space<vmem>>, %arg8: memref<64x1xf32, #tpu.memory_space<vmem>>, %arg9: memref<11x128x64xbf16, #tpu.memory_space<vmem>>, %arg10: memref<128x1xf32, #tpu.memory_space<vmem>>, %arg11: memref<11x64x64xbf16, #tpu.memory_space<vmem>>, %arg12: memref<11x64x1xf32, #tpu.memory_space<vmem>>, %arg13: memref<5x64x64xbf16, #tpu.memory_space<vmem>>, %arg14: memref<64x1xf32, #tpu.memory_space<vmem>>, %arg15: memref<5x32x64xbf16, #tpu.memory_space<vmem>>, %arg16: memref<32x1xf32, #tpu.memory_space<vmem>>, %arg17: memref<5x1x32xbf16, #tpu.memory_space<vmem>>, %arg18: memref<1x1xf32, #tpu.memory_space<vmem>>, %arg19: memref<1x1x168xf32, #tpu.memory_space<vmem>>, %arg20: memref<1x64x1xf32, #tpu.memory_space<vmem>>, %arg21: memref<1x64x1xf32, #tpu.memory_space<vmem>>) attributes {dimension_semantics = [#tpu.dimension_semantics<parallel>], iteration_bounds = array<i64: 2>, scalar_prefetch = 0 : i64, scratch_operands = 0 : i64, tpu.core_type = #tpu.core_type<tc>, window_params = [{transform_indices = @transform_0, window_bounds = array<i64: 1, 8, 168>}, {transform_indices = @transform_1, window_bounds = array<i64: 1, 64, 1>}, {pipeline_mode = #tpu.pipeline_mode<synchronous>, transform_indices = @transform_2, window_bounds = array<i64: 5, 32, 8>}, {pipeline_mode = #tpu.pipeline_mode<synchronous>, transform_indices = @transform_3, window_bounds = array<i64: 32, 1>}, {pipeline_mode = #tpu.pipeline_mode<synchronous>, transform_indices = @transform_4, window_bounds = array<i64: 5, 64, 32>}, {pipeline_mode = #tpu.pipeline_mode<synchronous>, transform_indices = @transform_5, window_bounds = array<i64: 64, 1>}, {pipeline_mode = #tpu.pipeline_mode<synchronous>, transform_indices = @transform_6, window_bounds = array<i64: 5, 64, 64>}, {pipeline_mode = #tpu.pipeline_mode<synchronous>, transform_indices = @transform_7, window_bounds = array<i64: 64, 1>}, {pipeline_mode = #tpu.pipeline_mode<synchronous>, transform_indices = @transform_8, window_bounds = array<i64: 11, 128, 64>}, {pipeline_mode = #tpu.pipeline_mode<synchronous>, transform_indices = @transform_9, window_bounds = array<i64: 128, 1>}, {pipeline_mode = #tpu.pipeline_mode<synchronous>, transform_indices = @transform_10, window_bounds = array<i64: 11, 64, 64>}, {pipeline_mode = #tpu.pipeline_mode<synchronous>, transform_indices = @transform_11, window_bounds = array<i64: 11, 64, 1>}, {pipeline_mode = #tpu.pipeline_mode<synchronous>, transform_indices = @transform_12, window_bounds = array<i64: 5, 64, 64>}, {pipeline_mode = #tpu.pipeline_mode<synchronous>, transform_indices = @transform_13, window_bounds = array<i64: 64, 1>}, {pipeline_mode = #tpu.pipeline_mode<synchronous>, transform_indices = @transform_14, window_bounds = array<i64: 5, 32, 64>}, {pipeline_mode = #tpu.pipeline_mode<synchronous>, transform_indices = @transform_15, window_bounds = array<i64: 32, 1>}, {pipeline_mode = #tpu.pipeline_mode<synchronous>, transform_indices = @transform_16, window_bounds = array<i64: 5, 1, 32>}, {pipeline_mode = #tpu.pipeline_mode<synchronous>, transform_indices = @transform_17, window_bounds = array<i64: 1, 1>}, {transform_indices = @transform_18, window_bounds = array<i64: 1, 1, 168>}, {transform_indices = @transform_19, window_bounds = array<i64: 1, 64, 1>}, {transform_indices = @transform_20, window_bounds = array<i64: 1, 64, 1>}]} {
    %c0 = arith.constant 0 : index
    %c0_0 = arith.constant 0 : index
    %c0_1 = arith.constant 0 : index
    %0 = vector.load %arg1[%c0, %c0_0, %c0_1] : memref<1x8x168xf32, #tpu.memory_space<vmem>>, vector<1x8x168xf32>
    %1 = vector.shape_cast %0 : vector<1x8x168xf32> to vector<8x168xf32>
    %2 = arith.truncf %1 : vector<8x168xf32> to vector<8x168xbf16>
    %cst = arith.constant 0.000000e+00 : f32
    %3 = vector.broadcast %cst : f32 to vector<32x164xf32>
    %4 = vector.extract_strided_slice %2 {offsets = [0, 0], sizes = [8, 164], strides = [1, 1]} : vector<8x168xbf16> to vector<8x164xbf16>
    %c0_2 = arith.constant 0 : index
    %c0_3 = arith.constant 0 : index
    %c0_4 = arith.constant 0 : index
    %5 = vector.load %arg3[%c0_2, %c0_3, %c0_4] : memref<5x32x8xbf16, #tpu.memory_space<vmem>>, vector<1x32x8xbf16>
    %6 = vector.shape_cast %5 : vector<1x32x8xbf16> to vector<32x8xbf16>
    %cst_5 = arith.constant dense<0.000000e+00> : vector<32x164xf32>
    %7 = tpu.matmul %6, %4, %cst_5 {dimension_numbers = #tpu.dot_dimension_numbers<[1], [0], [0], [1], [0, 0, 1, 1], [], []>} : vector<32x8xbf16>, vector<8x164xbf16>, vector<32x164xf32> -> vector<32x164xf32>
    %8 = arith.addf %3, %7 : vector<32x164xf32>
    %9 = vector.extract_strided_slice %2 {offsets = [0, 1], sizes = [8, 164], strides = [1, 1]} : vector<8x168xbf16> to vector<8x164xbf16>
    %c1 = arith.constant 1 : index
    %c0_6 = arith.constant 0 : index
    %c0_7 = arith.constant 0 : index
    %10 = vector.load %arg3[%c1, %c0_6, %c0_7] : memref<5x32x8xbf16, #tpu.memory_space<vmem>>, vector<1x32x8xbf16>
    %11 = vector.shape_cast %10 : vector<1x32x8xbf16> to vector<32x8xbf16>
    %cst_8 = arith.constant dense<0.000000e+00> : vector<32x164xf32>
    %12 = tpu.matmul %11, %9, %cst_8 {dimension_numbers = #tpu.dot_dimension_numbers<[1], [0], [0], [1], [0, 0, 1, 1], [], []>} : vector<32x8xbf16>, vector<8x164xbf16>, vector<32x164xf32> -> vector<32x164xf32>
    %13 = arith.addf %8, %12 : vector<32x164xf32>
    %14 = vector.extract_strided_slice %2 {offsets = [0, 2], sizes = [8, 164], strides = [1, 1]} : vector<8x168xbf16> to vector<8x164xbf16>
    %c2 = arith.constant 2 : index
    %c0_9 = arith.constant 0 : index
    %c0_10 = arith.constant 0 : index
    %15 = vector.load %arg3[%c2, %c0_9, %c0_10] : memref<5x32x8xbf16, #tpu.memory_space<vmem>>, vector<1x32x8xbf16>
    %16 = vector.shape_cast %15 : vector<1x32x8xbf16> to vector<32x8xbf16>
    %cst_11 = arith.constant dense<0.000000e+00> : vector<32x164xf32>
    %17 = tpu.matmul %16, %14, %cst_11 {dimension_numbers = #tpu.dot_dimension_numbers<[1], [0], [0], [1], [0, 0, 1, 1], [], []>} : vector<32x8xbf16>, vector<8x164xbf16>, vector<32x164xf32> -> vector<32x164xf32>
    %18 = arith.addf %13, %17 : vector<32x164xf32>
    %19 = vector.extract_strided_slice %2 {offsets = [0, 3], sizes = [8, 164], strides = [1, 1]} : vector<8x168xbf16> to vector<8x164xbf16>
    %c3 = arith.constant 3 : index
    %c0_12 = arith.constant 0 : index
    %c0_13 = arith.constant 0 : index
    %20 = vector.load %arg3[%c3, %c0_12, %c0_13] : memref<5x32x8xbf16, #tpu.memory_space<vmem>>, vector<1x32x8xbf16>
    %21 = vector.shape_cast %20 : vector<1x32x8xbf16> to vector<32x8xbf16>
    %cst_14 = arith.constant dense<0.000000e+00> : vector<32x164xf32>
    %22 = tpu.matmul %21, %19, %cst_14 {dimension_numbers = #tpu.dot_dimension_numbers<[1], [0], [0], [1], [0, 0, 1, 1], [], []>} : vector<32x8xbf16>, vector<8x164xbf16>, vector<32x164xf32> -> vector<32x164xf32>
    %23 = arith.addf %18, %22 : vector<32x164xf32>
    %24 = vector.extract_strided_slice %2 {offsets = [0, 4], sizes = [8, 164], strides = [1, 1]} : vector<8x168xbf16> to vector<8x164xbf16>
    %c4 = arith.constant 4 : index
    %c0_15 = arith.constant 0 : index
    %c0_16 = arith.constant 0 : index
    %25 = vector.load %arg3[%c4, %c0_15, %c0_16] : memref<5x32x8xbf16, #tpu.memory_space<vmem>>, vector<1x32x8xbf16>
    %26 = vector.shape_cast %25 : vector<1x32x8xbf16> to vector<32x8xbf16>
    %cst_17 = arith.constant dense<0.000000e+00> : vector<32x164xf32>
    %27 = tpu.matmul %26, %24, %cst_17 {dimension_numbers = #tpu.dot_dimension_numbers<[1], [0], [0], [1], [0, 0, 1, 1], [], []>} : vector<32x8xbf16>, vector<8x164xbf16>, vector<32x164xf32> -> vector<32x164xf32>
    %28 = arith.addf %23, %27 : vector<32x164xf32>
    %29 = tpu.iota {dimensions = array<i32: 0>} : vector<164x82xi32>
    %30 = tpu.iota {dimensions = array<i32: 1>} : vector<164x82xi32>
    %c2_i32 = arith.constant 2 : i32
    %31 = vector.broadcast %c2_i32 : i32 to vector<164x82xi32>
    %32 = arith.muli %30, %31 : vector<164x82xi32>
    %33 = arith.cmpi eq, %29, %32 : vector<164x82xi32>
    %34 = arith.extui %33 : vector<164x82xi1> to vector<164x82xi32>
    %35 = arith.sitofp %34 : vector<164x82xi32> to vector<164x82xf32>
    %cst_18 = arith.constant dense<0.000000e+00> : vector<32x82xf32>
    %36 = tpu.matmul %28, %35, %cst_18 {dimension_numbers = #tpu.dot_dimension_numbers<[1], [0], [0], [1], [0, 0, 1, 1], [], []>} : vector<32x164xf32>, vector<164x82xf32>, vector<32x82xf32> -> vector<32x82xf32>
    %c0_19 = arith.constant 0 : index
    %c0_20 = arith.constant 0 : index
    %37 = vector.load %arg4[%c0_19, %c0_20] : memref<32x1xf32, #tpu.memory_space<vmem>>, vector<32x1xf32>
    %38 = vector.broadcast %37 : vector<32x1xf32> to vector<32x82xf32>
    %39 = arith.addf %36, %38 : vector<32x82xf32>
    %cst_21 = arith.constant 0.00999999977 : f32
    %40 = vector.broadcast %cst_21 : f32 to vector<32x82xf32>
    %41 = arith.mulf %40, %39 : vector<32x82xf32>
    %42 = arith.maximumf %39, %41 : vector<32x82xf32>
    %43 = arith.truncf %42 : vector<32x82xf32> to vector<32x82xbf16>
    %cst_22 = arith.constant 0.000000e+00 : f32
    %44 = vector.broadcast %cst_22 : f32 to vector<64x74xf32>
    %45 = vector.extract_strided_slice %43 {offsets = [0, 0], sizes = [32, 74], strides = [1, 1]} : vector<32x82xbf16> to vector<32x74xbf16>
    %c0_23 = arith.constant 0 : index
    %c0_24 = arith.constant 0 : index
    %c0_25 = arith.constant 0 : index
    %46 = vector.load %arg5[%c0_23, %c0_24, %c0_25] : memref<5x64x32xbf16, #tpu.memory_space<vmem>>, vector<1x64x32xbf16>
    %47 = vector.shape_cast %46 : vector<1x64x32xbf16> to vector<64x32xbf16>
    %cst_26 = arith.constant dense<0.000000e+00> : vector<64x74xf32>
    %48 = tpu.matmul %47, %45, %cst_26 {dimension_numbers = #tpu.dot_dimension_numbers<[1], [0], [0], [1], [0, 0, 1, 1], [], []>} : vector<64x32xbf16>, vector<32x74xbf16>, vector<64x74xf32> -> vector<64x74xf32>
    %49 = arith.addf %44, %48 : vector<64x74xf32>
    %50 = vector.extract_strided_slice %43 {offsets = [0, 2], sizes = [32, 74], strides = [1, 1]} : vector<32x82xbf16> to vector<32x74xbf16>
    %c1_27 = arith.constant 1 : index
    %c0_28 = arith.constant 0 : index
    %c0_29 = arith.constant 0 : index
    %51 = vector.load %arg5[%c1_27, %c0_28, %c0_29] : memref<5x64x32xbf16, #tpu.memory_space<vmem>>, vector<1x64x32xbf16>
    %52 = vector.shape_cast %51 : vector<1x64x32xbf16> to vector<64x32xbf16>
    %cst_30 = arith.constant dense<0.000000e+00> : vector<64x74xf32>
    %53 = tpu.matmul %52, %50, %cst_30 {dimension_numbers = #tpu.dot_dimension_numbers<[1], [0], [0], [1], [0, 0, 1, 1], [], []>} : vector<64x32xbf16>, vector<32x74xbf16>, vector<64x74xf32> -> vector<64x74xf32>
    %54 = arith.addf %49, %53 : vector<64x74xf32>
    %55 = vector.extract_strided_slice %43 {offsets = [0, 4], sizes = [32, 74], strides = [1, 1]} : vector<32x82xbf16> to vector<32x74xbf16>
    %c2_31 = arith.constant 2 : index
    %c0_32 = arith.constant 0 : index
    %c0_33 = arith.constant 0 : index
    %56 = vector.load %arg5[%c2_31, %c0_32, %c0_33] : memref<5x64x32xbf16, #tpu.memory_space<vmem>>, vector<1x64x32xbf16>
    %57 = vector.shape_cast %56 : vector<1x64x32xbf16> to vector<64x32xbf16>
    %cst_34 = arith.constant dense<0.000000e+00> : vector<64x74xf32>
    %58 = tpu.matmul %57, %55, %cst_34 {dimension_numbers = #tpu.dot_dimension_numbers<[1], [0], [0], [1], [0, 0, 1, 1], [], []>} : vector<64x32xbf16>, vector<32x74xbf16>, vector<64x74xf32> -> vector<64x74xf32>
    %59 = arith.addf %54, %58 : vector<64x74xf32>
    %60 = vector.extract_strided_slice %43 {offsets = [0, 6], sizes = [32, 74], strides = [1, 1]} : vector<32x82xbf16> to vector<32x74xbf16>
    %c3_35 = arith.constant 3 : index
    %c0_36 = arith.constant 0 : index
    %c0_37 = arith.constant 0 : index
    %61 = vector.load %arg5[%c3_35, %c0_36, %c0_37] : memref<5x64x32xbf16, #tpu.memory_space<vmem>>, vector<1x64x32xbf16>
    %62 = vector.shape_cast %61 : vector<1x64x32xbf16> to vector<64x32xbf16>
    %cst_38 = arith.constant dense<0.000000e+00> : vector<64x74xf32>
    %63 = tpu.matmul %62, %60, %cst_38 {dimension_numbers = #tpu.dot_dimension_numbers<[1], [0], [0], [1], [0, 0, 1, 1], [], []>} : vector<64x32xbf16>, vector<32x74xbf16>, vector<64x74xf32> -> vector<64x74xf32>
    %64 = arith.addf %59, %63 : vector<64x74xf32>
    %65 = vector.extract_strided_slice %43 {offsets = [0, 8], sizes = [32, 74], strides = [1, 1]} : vector<32x82xbf16> to vector<32x74xbf16>
    %c4_39 = arith.constant 4 : index
    %c0_40 = arith.constant 0 : index
    %c0_41 = arith.constant 0 : index
    %66 = vector.load %arg5[%c4_39, %c0_40, %c0_41] : memref<5x64x32xbf16, #tpu.memory_space<vmem>>, vector<1x64x32xbf16>
    %67 = vector.shape_cast %66 : vector<1x64x32xbf16> to vector<64x32xbf16>
    %cst_42 = arith.constant dense<0.000000e+00> : vector<64x74xf32>
    %68 = tpu.matmul %67, %65, %cst_42 {dimension_numbers = #tpu.dot_dimension_numbers<[1], [0], [0], [1], [0, 0, 1, 1], [], []>} : vector<64x32xbf16>, vector<32x74xbf16>, vector<64x74xf32> -> vector<64x74xf32>
    %69 = arith.addf %64, %68 : vector<64x74xf32>
    %70 = tpu.iota {dimensions = array<i32: 0>} : vector<74x37xi32>
    %71 = tpu.iota {dimensions = array<i32: 1>} : vector<74x37xi32>
    %c2_i32_43 = arith.constant 2 : i32
    %72 = vector.broadcast %c2_i32_43 : i32 to vector<74x37xi32>
    %73 = arith.muli %71, %72 : vector<74x37xi32>
    %74 = arith.cmpi eq, %70, %73 : vector<74x37xi32>
    %75 = arith.extui %74 : vector<74x37xi1> to vector<74x37xi32>
    %76 = arith.sitofp %75 : vector<74x37xi32> to vector<74x37xf32>
    %cst_44 = arith.constant dense<0.000000e+00> : vector<64x37xf32>
    %77 = tpu.matmul %69, %76, %cst_44 {dimension_numbers = #tpu.dot_dimension_numbers<[1], [0], [0], [1], [0, 0, 1, 1], [], []>} : vector<64x74xf32>, vector<74x37xf32>, vector<64x37xf32> -> vector<64x37xf32>
    %c0_45 = arith.constant 0 : index
    %c0_46 = arith.constant 0 : index
    %78 = vector.load %arg6[%c0_45, %c0_46] : memref<64x1xf32, #tpu.memory_space<vmem>>, vector<64x1xf32>
    %79 = vector.broadcast %78 : vector<64x1xf32> to vector<64x37xf32>
    %80 = arith.addf %77, %79 : vector<64x37xf32>
    %cst_47 = arith.constant 0.00999999977 : f32
    %81 = vector.broadcast %cst_47 : f32 to vector<64x37xf32>
    %82 = arith.mulf %81, %80 : vector<64x37xf32>
    %83 = arith.maximumf %80, %82 : vector<64x37xf32>
    %84 = arith.truncf %83 : vector<64x37xf32> to vector<64x37xbf16>
    %cst_48 = arith.constant 0.000000e+00 : f32
    %85 = vector.broadcast %cst_48 : f32 to vector<64x21xf32>
    %86 = vector.extract_strided_slice %84 {offsets = [0, 0], sizes = [64, 21], strides = [1, 1]} : vector<64x37xbf16> to vector<64x21xbf16>
    %c0_49 = arith.constant 0 : index
    %c0_50 = arith.constant 0 : index
    %c0_51 = arith.constant 0 : index
    %87 = vector.load %arg7[%c0_49, %c0_50, %c0_51] : memref<5x64x64xbf16, #tpu.memory_space<vmem>>, vector<1x64x64xbf16>
    %88 = vector.shape_cast %87 : vector<1x64x64xbf16> to vector<64x64xbf16>
    %cst_52 = arith.constant dense<0.000000e+00> : vector<64x21xf32>
    %89 = tpu.matmul %88, %86, %cst_52 {dimension_numbers = #tpu.dot_dimension_numbers<[1], [0], [0], [1], [0, 0, 1, 1], [], []>} : vector<64x64xbf16>, vector<64x21xbf16>, vector<64x21xf32> -> vector<64x21xf32>
    %90 = arith.addf %85, %89 : vector<64x21xf32>
    %91 = vector.extract_strided_slice %84 {offsets = [0, 4], sizes = [64, 21], strides = [1, 1]} : vector<64x37xbf16> to vector<64x21xbf16>
    %c1_53 = arith.constant 1 : index
    %c0_54 = arith.constant 0 : index
    %c0_55 = arith.constant 0 : index
    %92 = vector.load %arg7[%c1_53, %c0_54, %c0_55] : memref<5x64x64xbf16, #tpu.memory_space<vmem>>, vector<1x64x64xbf16>
    %93 = vector.shape_cast %92 : vector<1x64x64xbf16> to vector<64x64xbf16>
    %cst_56 = arith.constant dense<0.000000e+00> : vector<64x21xf32>
    %94 = tpu.matmul %93, %91, %cst_56 {dimension_numbers = #tpu.dot_dimension_numbers<[1], [0], [0], [1], [0, 0, 1, 1], [], []>} : vector<64x64xbf16>, vector<64x21xbf16>, vector<64x21xf32> -> vector<64x21xf32>
    %95 = arith.addf %90, %94 : vector<64x21xf32>
    %96 = vector.extract_strided_slice %84 {offsets = [0, 8], sizes = [64, 21], strides = [1, 1]} : vector<64x37xbf16> to vector<64x21xbf16>
    %c2_57 = arith.constant 2 : index
    %c0_58 = arith.constant 0 : index
    %c0_59 = arith.constant 0 : index
    %97 = vector.load %arg7[%c2_57, %c0_58, %c0_59] : memref<5x64x64xbf16, #tpu.memory_space<vmem>>, vector<1x64x64xbf16>
    %98 = vector.shape_cast %97 : vector<1x64x64xbf16> to vector<64x64xbf16>
    %cst_60 = arith.constant dense<0.000000e+00> : vector<64x21xf32>
    %99 = tpu.matmul %98, %96, %cst_60 {dimension_numbers = #tpu.dot_dimension_numbers<[1], [0], [0], [1], [0, 0, 1, 1], [], []>} : vector<64x64xbf16>, vector<64x21xbf16>, vector<64x21xf32> -> vector<64x21xf32>
    %100 = arith.addf %95, %99 : vector<64x21xf32>
    %101 = vector.extract_strided_slice %84 {offsets = [0, 12], sizes = [64, 21], strides = [1, 1]} : vector<64x37xbf16> to vector<64x21xbf16>
    %c3_61 = arith.constant 3 : index
    %c0_62 = arith.constant 0 : index
    %c0_63 = arith.constant 0 : index
    %102 = vector.load %arg7[%c3_61, %c0_62, %c0_63] : memref<5x64x64xbf16, #tpu.memory_space<vmem>>, vector<1x64x64xbf16>
    %103 = vector.shape_cast %102 : vector<1x64x64xbf16> to vector<64x64xbf16>
    %cst_64 = arith.constant dense<0.000000e+00> : vector<64x21xf32>
    %104 = tpu.matmul %103, %101, %cst_64 {dimension_numbers = #tpu.dot_dimension_numbers<[1], [0], [0], [1], [0, 0, 1, 1], [], []>} : vector<64x64xbf16>, vector<64x21xbf16>, vector<64x21xf32> -> vector<64x21xf32>
    %105 = arith.addf %100, %104 : vector<64x21xf32>
    %106 = vector.extract_strided_slice %84 {offsets = [0, 16], sizes = [64, 21], strides = [1, 1]} : vector<64x37xbf16> to vector<64x21xbf16>
    %c4_65 = arith.constant 4 : index
    %c0_66 = arith.constant 0 : index
    %c0_67 = arith.constant 0 : index
    %107 = vector.load %arg7[%c4_65, %c0_66, %c0_67] : memref<5x64x64xbf16, #tpu.memory_space<vmem>>, vector<1x64x64xbf16>
    %108 = vector.shape_cast %107 : vector<1x64x64xbf16> to vector<64x64xbf16>
    %cst_68 = arith.constant dense<0.000000e+00> : vector<64x21xf32>
    %109 = tpu.matmul %108, %106, %cst_68 {dimension_numbers = #tpu.dot_dimension_numbers<[1], [0], [0], [1], [0, 0, 1, 1], [], []>} : vector<64x64xbf16>, vector<64x21xbf16>, vector<64x21xf32> -> vector<64x21xf32>
    %110 = arith.addf %105, %109 : vector<64x21xf32>
    %111 = tpu.iota {dimensions = array<i32: 0>} : vector<21x11xi32>
    %112 = tpu.iota {dimensions = array<i32: 1>} : vector<21x11xi32>
    %c2_i32_69 = arith.constant 2 : i32
    %113 = vector.broadcast %c2_i32_69 : i32 to vector<21x11xi32>
    %114 = arith.muli %112, %113 : vector<21x11xi32>
    %115 = arith.cmpi eq, %111, %114 : vector<21x11xi32>
    %116 = arith.extui %115 : vector<21x11xi1> to vector<21x11xi32>
    %117 = arith.sitofp %116 : vector<21x11xi32> to vector<21x11xf32>
    %cst_70 = arith.constant dense<0.000000e+00> : vector<64x11xf32>
    %118 = tpu.matmul %110, %117, %cst_70 {dimension_numbers = #tpu.dot_dimension_numbers<[1], [0], [0], [1], [0, 0, 1, 1], [], []>} : vector<64x21xf32>, vector<21x11xf32>, vector<64x11xf32> -> vector<64x11xf32>
    %c0_71 = arith.constant 0 : index
    %c0_72 = arith.constant 0 : index
    %119 = vector.load %arg8[%c0_71, %c0_72] : memref<64x1xf32, #tpu.memory_space<vmem>>, vector<64x1xf32>
    %120 = vector.broadcast %119 : vector<64x1xf32> to vector<64x11xf32>
    %121 = arith.addf %118, %120 : vector<64x11xf32>
    %cst_73 = arith.constant 0.00999999977 : f32
    %122 = vector.broadcast %cst_73 : f32 to vector<64x11xf32>
    %123 = arith.mulf %122, %121 : vector<64x11xf32>
    %124 = arith.maximumf %121, %123 : vector<64x11xf32>
    %125 = arith.truncf %124 : vector<64x11xf32> to vector<64x11xbf16>
    %c0_74 = arith.constant 0 : index
    %c0_75 = arith.constant 0 : index
    %126 = vector.load %arg10[%c0_74, %c0_75] : memref<128x1xf32, #tpu.memory_space<vmem>>, vector<128x1xf32>
    %127 = vector.extract_strided_slice %125 {offsets = [0, 0], sizes = [64, 1], strides = [1, 1]} : vector<64x11xbf16> to vector<64x1xbf16>
    %c0_76 = arith.constant 0 : index
    %c0_77 = arith.constant 0 : index
    %c0_78 = arith.constant 0 : index
    %128 = vector.load %arg9[%c0_76, %c0_77, %c0_78] : memref<11x128x64xbf16, #tpu.memory_space<vmem>>, vector<1x128x64xbf16>
    %129 = vector.shape_cast %128 : vector<1x128x64xbf16> to vector<128x64xbf16>
    %cst_79 = arith.constant dense<0.000000e+00> : vector<128x1xf32>
    %130 = tpu.matmul %129, %127, %cst_79 {dimension_numbers = #tpu.dot_dimension_numbers<[1], [0], [0], [1], [0, 0, 1, 1], [], []>} : vector<128x64xbf16>, vector<64x1xbf16>, vector<128x1xf32> -> vector<128x1xf32>
    %131 = arith.addf %126, %130 : vector<128x1xf32>
    %132 = vector.extract_strided_slice %125 {offsets = [0, 1], sizes = [64, 1], strides = [1, 1]} : vector<64x11xbf16> to vector<64x1xbf16>
    %c1_80 = arith.constant 1 : index
    %c0_81 = arith.constant 0 : index
    %c0_82 = arith.constant 0 : index
    %133 = vector.load %arg9[%c1_80, %c0_81, %c0_82] : memref<11x128x64xbf16, #tpu.memory_space<vmem>>, vector<1x128x64xbf16>
    %134 = vector.shape_cast %133 : vector<1x128x64xbf16> to vector<128x64xbf16>
    %cst_83 = arith.constant dense<0.000000e+00> : vector<128x1xf32>
    %135 = tpu.matmul %134, %132, %cst_83 {dimension_numbers = #tpu.dot_dimension_numbers<[1], [0], [0], [1], [0, 0, 1, 1], [], []>} : vector<128x64xbf16>, vector<64x1xbf16>, vector<128x1xf32> -> vector<128x1xf32>
    %136 = arith.addf %131, %135 : vector<128x1xf32>
    %137 = vector.extract_strided_slice %125 {offsets = [0, 2], sizes = [64, 1], strides = [1, 1]} : vector<64x11xbf16> to vector<64x1xbf16>
    %c2_84 = arith.constant 2 : index
    %c0_85 = arith.constant 0 : index
    %c0_86 = arith.constant 0 : index
    %138 = vector.load %arg9[%c2_84, %c0_85, %c0_86] : memref<11x128x64xbf16, #tpu.memory_space<vmem>>, vector<1x128x64xbf16>
    %139 = vector.shape_cast %138 : vector<1x128x64xbf16> to vector<128x64xbf16>
    %cst_87 = arith.constant dense<0.000000e+00> : vector<128x1xf32>
    %140 = tpu.matmul %139, %137, %cst_87 {dimension_numbers = #tpu.dot_dimension_numbers<[1], [0], [0], [1], [0, 0, 1, 1], [], []>} : vector<128x64xbf16>, vector<64x1xbf16>, vector<128x1xf32> -> vector<128x1xf32>
    %141 = arith.addf %136, %140 : vector<128x1xf32>
    %142 = vector.extract_strided_slice %125 {offsets = [0, 3], sizes = [64, 1], strides = [1, 1]} : vector<64x11xbf16> to vector<64x1xbf16>
    %c3_88 = arith.constant 3 : index
    %c0_89 = arith.constant 0 : index
    %c0_90 = arith.constant 0 : index
    %143 = vector.load %arg9[%c3_88, %c0_89, %c0_90] : memref<11x128x64xbf16, #tpu.memory_space<vmem>>, vector<1x128x64xbf16>
    %144 = vector.shape_cast %143 : vector<1x128x64xbf16> to vector<128x64xbf16>
    %cst_91 = arith.constant dense<0.000000e+00> : vector<128x1xf32>
    %145 = tpu.matmul %144, %142, %cst_91 {dimension_numbers = #tpu.dot_dimension_numbers<[1], [0], [0], [1], [0, 0, 1, 1], [], []>} : vector<128x64xbf16>, vector<64x1xbf16>, vector<128x1xf32> -> vector<128x1xf32>
    %146 = arith.addf %141, %145 : vector<128x1xf32>
    %147 = vector.extract_strided_slice %125 {offsets = [0, 4], sizes = [64, 1], strides = [1, 1]} : vector<64x11xbf16> to vector<64x1xbf16>
    %c4_92 = arith.constant 4 : index
    %c0_93 = arith.constant 0 : index
    %c0_94 = arith.constant 0 : index
    %148 = vector.load %arg9[%c4_92, %c0_93, %c0_94] : memref<11x128x64xbf16, #tpu.memory_space<vmem>>, vector<1x128x64xbf16>
    %149 = vector.shape_cast %148 : vector<1x128x64xbf16> to vector<128x64xbf16>
    %cst_95 = arith.constant dense<0.000000e+00> : vector<128x1xf32>
    %150 = tpu.matmul %149, %147, %cst_95 {dimension_numbers = #tpu.dot_dimension_numbers<[1], [0], [0], [1], [0, 0, 1, 1], [], []>} : vector<128x64xbf16>, vector<64x1xbf16>, vector<128x1xf32> -> vector<128x1xf32>
    %151 = arith.addf %146, %150 : vector<128x1xf32>
    %152 = vector.extract_strided_slice %125 {offsets = [0, 5], sizes = [64, 1], strides = [1, 1]} : vector<64x11xbf16> to vector<64x1xbf16>
    %c5 = arith.constant 5 : index
    %c0_96 = arith.constant 0 : index
    %c0_97 = arith.constant 0 : index
    %153 = vector.load %arg9[%c5, %c0_96, %c0_97] : memref<11x128x64xbf16, #tpu.memory_space<vmem>>, vector<1x128x64xbf16>
    %154 = vector.shape_cast %153 : vector<1x128x64xbf16> to vector<128x64xbf16>
    %cst_98 = arith.constant dense<0.000000e+00> : vector<128x1xf32>
    %155 = tpu.matmul %154, %152, %cst_98 {dimension_numbers = #tpu.dot_dimension_numbers<[1], [0], [0], [1], [0, 0, 1, 1], [], []>} : vector<128x64xbf16>, vector<64x1xbf16>, vector<128x1xf32> -> vector<128x1xf32>
    %156 = arith.addf %151, %155 : vector<128x1xf32>
    %157 = vector.extract_strided_slice %125 {offsets = [0, 6], sizes = [64, 1], strides = [1, 1]} : vector<64x11xbf16> to vector<64x1xbf16>
    %c6 = arith.constant 6 : index
    %c0_99 = arith.constant 0 : index
    %c0_100 = arith.constant 0 : index
    %158 = vector.load %arg9[%c6, %c0_99, %c0_100] : memref<11x128x64xbf16, #tpu.memory_space<vmem>>, vector<1x128x64xbf16>
    %159 = vector.shape_cast %158 : vector<1x128x64xbf16> to vector<128x64xbf16>
    %cst_101 = arith.constant dense<0.000000e+00> : vector<128x1xf32>
    %160 = tpu.matmul %159, %157, %cst_101 {dimension_numbers = #tpu.dot_dimension_numbers<[1], [0], [0], [1], [0, 0, 1, 1], [], []>} : vector<128x64xbf16>, vector<64x1xbf16>, vector<128x1xf32> -> vector<128x1xf32>
    %161 = arith.addf %156, %160 : vector<128x1xf32>
    %162 = vector.extract_strided_slice %125 {offsets = [0, 7], sizes = [64, 1], strides = [1, 1]} : vector<64x11xbf16> to vector<64x1xbf16>
    %c7 = arith.constant 7 : index
    %c0_102 = arith.constant 0 : index
    %c0_103 = arith.constant 0 : index
    %163 = vector.load %arg9[%c7, %c0_102, %c0_103] : memref<11x128x64xbf16, #tpu.memory_space<vmem>>, vector<1x128x64xbf16>
    %164 = vector.shape_cast %163 : vector<1x128x64xbf16> to vector<128x64xbf16>
    %cst_104 = arith.constant dense<0.000000e+00> : vector<128x1xf32>
    %165 = tpu.matmul %164, %162, %cst_104 {dimension_numbers = #tpu.dot_dimension_numbers<[1], [0], [0], [1], [0, 0, 1, 1], [], []>} : vector<128x64xbf16>, vector<64x1xbf16>, vector<128x1xf32> -> vector<128x1xf32>
    %166 = arith.addf %161, %165 : vector<128x1xf32>
    %167 = vector.extract_strided_slice %125 {offsets = [0, 8], sizes = [64, 1], strides = [1, 1]} : vector<64x11xbf16> to vector<64x1xbf16>
    %c8 = arith.constant 8 : index
    %c0_105 = arith.constant 0 : index
    %c0_106 = arith.constant 0 : index
    %168 = vector.load %arg9[%c8, %c0_105, %c0_106] : memref<11x128x64xbf16, #tpu.memory_space<vmem>>, vector<1x128x64xbf16>
    %169 = vector.shape_cast %168 : vector<1x128x64xbf16> to vector<128x64xbf16>
    %cst_107 = arith.constant dense<0.000000e+00> : vector<128x1xf32>
    %170 = tpu.matmul %169, %167, %cst_107 {dimension_numbers = #tpu.dot_dimension_numbers<[1], [0], [0], [1], [0, 0, 1, 1], [], []>} : vector<128x64xbf16>, vector<64x1xbf16>, vector<128x1xf32> -> vector<128x1xf32>
    %171 = arith.addf %166, %170 : vector<128x1xf32>
    %172 = vector.extract_strided_slice %125 {offsets = [0, 9], sizes = [64, 1], strides = [1, 1]} : vector<64x11xbf16> to vector<64x1xbf16>
    %c9 = arith.constant 9 : index
    %c0_108 = arith.constant 0 : index
    %c0_109 = arith.constant 0 : index
    %173 = vector.load %arg9[%c9, %c0_108, %c0_109] : memref<11x128x64xbf16, #tpu.memory_space<vmem>>, vector<1x128x64xbf16>
    %174 = vector.shape_cast %173 : vector<1x128x64xbf16> to vector<128x64xbf16>
    %cst_110 = arith.constant dense<0.000000e+00> : vector<128x1xf32>
    %175 = tpu.matmul %174, %172, %cst_110 {dimension_numbers = #tpu.dot_dimension_numbers<[1], [0], [0], [1], [0, 0, 1, 1], [], []>} : vector<128x64xbf16>, vector<64x1xbf16>, vector<128x1xf32> -> vector<128x1xf32>
    %176 = arith.addf %171, %175 : vector<128x1xf32>
    %177 = vector.extract_strided_slice %125 {offsets = [0, 10], sizes = [64, 1], strides = [1, 1]} : vector<64x11xbf16> to vector<64x1xbf16>
    %c10 = arith.constant 10 : index
    %c0_111 = arith.constant 0 : index
    %c0_112 = arith.constant 0 : index
    %178 = vector.load %arg9[%c10, %c0_111, %c0_112] : memref<11x128x64xbf16, #tpu.memory_space<vmem>>, vector<1x128x64xbf16>
    %179 = vector.shape_cast %178 : vector<1x128x64xbf16> to vector<128x64xbf16>
    %cst_113 = arith.constant dense<0.000000e+00> : vector<128x1xf32>
    %180 = tpu.matmul %179, %177, %cst_113 {dimension_numbers = #tpu.dot_dimension_numbers<[1], [0], [0], [1], [0, 0, 1, 1], [], []>} : vector<128x64xbf16>, vector<64x1xbf16>, vector<128x1xf32> -> vector<128x1xf32>
    %181 = arith.addf %176, %180 : vector<128x1xf32>
    %182 = vector.extract_strided_slice %181 {offsets = [0, 0], sizes = [64, 1], strides = [1, 1]} : vector<128x1xf32> to vector<64x1xf32>
    %183 = vector.extract_strided_slice %181 {offsets = [64, 0], sizes = [64, 1], strides = [1, 1]} : vector<128x1xf32> to vector<64x1xf32>
    %c0_114 = arith.constant 0 : index
    %c0_115 = arith.constant 0 : index
    %c0_116 = arith.constant 0 : index
    %184 = vector.load %arg20[%c0_114, %c0_115, %c0_116] : memref<1x64x1xf32, #tpu.memory_space<vmem>>, vector<1x64x1xf32>
    %185 = vector.shape_cast %184 : vector<1x64x1xf32> to vector<64x1xf32>
    %186 = vector.shape_cast %182 : vector<64x1xf32> to vector<1x64x1xf32>
    tpu.vector_store %arg20[%c0_114, %c0_115, %c0_116], %186 {strides = array<i32>} : memref<1x64x1xf32, #tpu.memory_space<vmem>>, vector<1x64x1xf32>,
    %c0_117 = arith.constant 0 : index
    %c0_118 = arith.constant 0 : index
    %c0_119 = arith.constant 0 : index
    %187 = vector.load %arg21[%c0_117, %c0_118, %c0_119] : memref<1x64x1xf32, #tpu.memory_space<vmem>>, vector<1x64x1xf32>
    %188 = vector.shape_cast %187 : vector<1x64x1xf32> to vector<64x1xf32>
    %189 = vector.shape_cast %183 : vector<64x1xf32> to vector<1x64x1xf32>
    tpu.vector_store %arg21[%c0_117, %c0_118, %c0_119], %189 {strides = array<i32>} : memref<1x64x1xf32, #tpu.memory_space<vmem>>, vector<1x64x1xf32>,
    %c0_120 = arith.constant 0 : index
    %c0_121 = arith.constant 0 : index
    %c0_122 = arith.constant 0 : index
    %190 = vector.load %arg2[%c0_120, %c0_121, %c0_122] : memref<1x64x1xf32, #tpu.memory_space<vmem>>, vector<1x64x1xf32>
    %191 = vector.shape_cast %190 : vector<1x64x1xf32> to vector<64x1xf32>
    %cst_123 = arith.constant 5.000000e-01 : f32
    %192 = vector.broadcast %cst_123 : f32 to vector<64x1xf32>
    %193 = arith.mulf %192, %183 : vector<64x1xf32>
    %194 = math.exp %193 : vector<64x1xf32>
    %195 = arith.mulf %191, %194 : vector<64x1xf32>
    %196 = arith.addf %182, %195 : vector<64x1xf32>
    %197 = arith.truncf %196 : vector<64x1xf32> to vector<64x1xbf16>
    %198 = tpu.iota {dimensions = array<i32: 1>} : vector<1x11xi32>
    %cst_124 = arith.constant 0.000000e+00 : f32
    %199 = vector.broadcast %cst_124 : f32 to vector<64x11xf32>
    %c0_125 = arith.constant 0 : index
    %c0_126 = arith.constant 0 : index
    %c0_127 = arith.constant 0 : index
    %200 = vector.load %arg11[%c0_125, %c0_126, %c0_127] : memref<11x64x64xbf16, #tpu.memory_space<vmem>>, vector<1x64x64xbf16>
    %201 = vector.shape_cast %200 : vector<1x64x64xbf16> to vector<64x64xbf16>
    %cst_128 = arith.constant dense<0.000000e+00> : vector<64x1xf32>
    %202 = tpu.matmul %201, %197, %cst_128 {dimension_numbers = #tpu.dot_dimension_numbers<[1], [0], [0], [1], [0, 0, 1, 1], [], []>} : vector<64x64xbf16>, vector<64x1xbf16>, vector<64x1xf32> -> vector<64x1xf32>
    %c0_129 = arith.constant 0 : index
    %c0_130 = arith.constant 0 : index
    %c0_131 = arith.constant 0 : index
    %203 = vector.load %arg12[%c0_129, %c0_130, %c0_131] : memref<11x64x1xf32, #tpu.memory_space<vmem>>, vector<1x64x1xf32>
    %204 = vector.shape_cast %203 : vector<1x64x1xf32> to vector<64x1xf32>
    %205 = arith.addf %202, %204 : vector<64x1xf32>
    %c0_i32 = arith.constant 0 : i32
    %206 = vector.broadcast %c0_i32 : i32 to vector<1x11xi32>
    %207 = arith.cmpi eq, %198, %206 : vector<1x11xi32>
    %208 = arith.extui %207 : vector<1x11xi1> to vector<1x11xi32>
    %209 = arith.sitofp %208 : vector<1x11xi32> to vector<1x11xf32>
    %210 = vector.broadcast %205 : vector<64x1xf32> to vector<64x11xf32>
    %211 = vector.broadcast %209 : vector<1x11xf32> to vector<64x11xf32>
    %212 = arith.mulf %210, %211 : vector<64x11xf32>
    %213 = arith.addf %199, %212 : vector<64x11xf32>
    %c1_132 = arith.constant 1 : index
    %c0_133 = arith.constant 0 : index
    %c0_134 = arith.constant 0 : index
    %214 = vector.load %arg11[%c1_132, %c0_133, %c0_134] : memref<11x64x64xbf16, #tpu.memory_space<vmem>>, vector<1x64x64xbf16>
    %215 = vector.shape_cast %214 : vector<1x64x64xbf16> to vector<64x64xbf16>
    %cst_135 = arith.constant dense<0.000000e+00> : vector<64x1xf32>
    %216 = tpu.matmul %215, %197, %cst_135 {dimension_numbers = #tpu.dot_dimension_numbers<[1], [0], [0], [1], [0, 0, 1, 1], [], []>} : vector<64x64xbf16>, vector<64x1xbf16>, vector<64x1xf32> -> vector<64x1xf32>
    %c1_136 = arith.constant 1 : index
    %c0_137 = arith.constant 0 : index
    %c0_138 = arith.constant 0 : index
    %217 = vector.load %arg12[%c1_136, %c0_137, %c0_138] : memref<11x64x1xf32, #tpu.memory_space<vmem>>, vector<1x64x1xf32>
    %218 = vector.shape_cast %217 : vector<1x64x1xf32> to vector<64x1xf32>
    %219 = arith.addf %216, %218 : vector<64x1xf32>
    %c1_i32 = arith.constant 1 : i32
    %220 = vector.broadcast %c1_i32 : i32 to vector<1x11xi32>
    %221 = arith.cmpi eq, %198, %220 : vector<1x11xi32>
    %222 = arith.extui %221 : vector<1x11xi1> to vector<1x11xi32>
    %223 = arith.sitofp %222 : vector<1x11xi32> to vector<1x11xf32>
    %224 = vector.broadcast %219 : vector<64x1xf32> to vector<64x11xf32>
    %225 = vector.broadcast %223 : vector<1x11xf32> to vector<64x11xf32>
    %226 = arith.mulf %224, %225 : vector<64x11xf32>
    %227 = arith.addf %213, %226 : vector<64x11xf32>
    %c2_139 = arith.constant 2 : index
    %c0_140 = arith.constant 0 : index
    %c0_141 = arith.constant 0 : index
    %228 = vector.load %arg11[%c2_139, %c0_140, %c0_141] : memref<11x64x64xbf16, #tpu.memory_space<vmem>>, vector<1x64x64xbf16>
    %229 = vector.shape_cast %228 : vector<1x64x64xbf16> to vector<64x64xbf16>
    %cst_142 = arith.constant dense<0.000000e+00> : vector<64x1xf32>
    %230 = tpu.matmul %229, %197, %cst_142 {dimension_numbers = #tpu.dot_dimension_numbers<[1], [0], [0], [1], [0, 0, 1, 1], [], []>} : vector<64x64xbf16>, vector<64x1xbf16>, vector<64x1xf32> -> vector<64x1xf32>
    %c2_143 = arith.constant 2 : index
    %c0_144 = arith.constant 0 : index
    %c0_145 = arith.constant 0 : index
    %231 = vector.load %arg12[%c2_143, %c0_144, %c0_145] : memref<11x64x1xf32, #tpu.memory_space<vmem>>, vector<1x64x1xf32>
    %232 = vector.shape_cast %231 : vector<1x64x1xf32> to vector<64x1xf32>
    %233 = arith.addf %230, %232 : vector<64x1xf32>
    %c2_i32_146 = arith.constant 2 : i32
    %234 = vector.broadcast %c2_i32_146 : i32 to vector<1x11xi32>
    %235 = arith.cmpi eq, %198, %234 : vector<1x11xi32>
    %236 = arith.extui %235 : vector<1x11xi1> to vector<1x11xi32>
    %237 = arith.sitofp %236 : vector<1x11xi32> to vector<1x11xf32>
    %238 = vector.broadcast %233 : vector<64x1xf32> to vector<64x11xf32>
    %239 = vector.broadcast %237 : vector<1x11xf32> to vector<64x11xf32>
    %240 = arith.mulf %238, %239 : vector<64x11xf32>
    %241 = arith.addf %227, %240 : vector<64x11xf32>
    %c3_147 = arith.constant 3 : index
    %c0_148 = arith.constant 0 : index
    %c0_149 = arith.constant 0 : index
    %242 = vector.load %arg11[%c3_147, %c0_148, %c0_149] : memref<11x64x64xbf16, #tpu.memory_space<vmem>>, vector<1x64x64xbf16>
    %243 = vector.shape_cast %242 : vector<1x64x64xbf16> to vector<64x64xbf16>
    %cst_150 = arith.constant dense<0.000000e+00> : vector<64x1xf32>
    %244 = tpu.matmul %243, %197, %cst_150 {dimension_numbers = #tpu.dot_dimension_numbers<[1], [0], [0], [1], [0, 0, 1, 1], [], []>} : vector<64x64xbf16>, vector<64x1xbf16>, vector<64x1xf32> -> vector<64x1xf32>
    %c3_151 = arith.constant 3 : index
    %c0_152 = arith.constant 0 : index
    %c0_153 = arith.constant 0 : index
    %245 = vector.load %arg12[%c3_151, %c0_152, %c0_153] : memref<11x64x1xf32, #tpu.memory_space<vmem>>, vector<1x64x1xf32>
    %246 = vector.shape_cast %245 : vector<1x64x1xf32> to vector<64x1xf32>
    %247 = arith.addf %244, %246 : vector<64x1xf32>
    %c3_i32 = arith.constant 3 : i32
    %248 = vector.broadcast %c3_i32 : i32 to vector<1x11xi32>
    %249 = arith.cmpi eq, %198, %248 : vector<1x11xi32>
    %250 = arith.extui %249 : vector<1x11xi1> to vector<1x11xi32>
    %251 = arith.sitofp %250 : vector<1x11xi32> to vector<1x11xf32>
    %252 = vector.broadcast %247 : vector<64x1xf32> to vector<64x11xf32>
    %253 = vector.broadcast %251 : vector<1x11xf32> to vector<64x11xf32>
    %254 = arith.mulf %252, %253 : vector<64x11xf32>
    %255 = arith.addf %241, %254 : vector<64x11xf32>
    %c4_154 = arith.constant 4 : index
    %c0_155 = arith.constant 0 : index
    %c0_156 = arith.constant 0 : index
    %256 = vector.load %arg11[%c4_154, %c0_155, %c0_156] : memref<11x64x64xbf16, #tpu.memory_space<vmem>>, vector<1x64x64xbf16>
    %257 = vector.shape_cast %256 : vector<1x64x64xbf16> to vector<64x64xbf16>
    %cst_157 = arith.constant dense<0.000000e+00> : vector<64x1xf32>
    %258 = tpu.matmul %257, %197, %cst_157 {dimension_numbers = #tpu.dot_dimension_numbers<[1], [0], [0], [1], [0, 0, 1, 1], [], []>} : vector<64x64xbf16>, vector<64x1xbf16>, vector<64x1xf32> -> vector<64x1xf32>
    %c4_158 = arith.constant 4 : index
    %c0_159 = arith.constant 0 : index
    %c0_160 = arith.constant 0 : index
    %259 = vector.load %arg12[%c4_158, %c0_159, %c0_160] : memref<11x64x1xf32, #tpu.memory_space<vmem>>, vector<1x64x1xf32>
    %260 = vector.shape_cast %259 : vector<1x64x1xf32> to vector<64x1xf32>
    %261 = arith.addf %258, %260 : vector<64x1xf32>
    %c4_i32 = arith.constant 4 : i32
    %262 = vector.broadcast %c4_i32 : i32 to vector<1x11xi32>
    %263 = arith.cmpi eq, %198, %262 : vector<1x11xi32>
    %264 = arith.extui %263 : vector<1x11xi1> to vector<1x11xi32>
    %265 = arith.sitofp %264 : vector<1x11xi32> to vector<1x11xf32>
    %266 = vector.broadcast %261 : vector<64x1xf32> to vector<64x11xf32>
    %267 = vector.broadcast %265 : vector<1x11xf32> to vector<64x11xf32>
    %268 = arith.mulf %266, %267 : vector<64x11xf32>
    %269 = arith.addf %255, %268 : vector<64x11xf32>
    %c5_161 = arith.constant 5 : index
    %c0_162 = arith.constant 0 : index
    %c0_163 = arith.constant 0 : index
    %270 = vector.load %arg11[%c5_161, %c0_162, %c0_163] : memref<11x64x64xbf16, #tpu.memory_space<vmem>>, vector<1x64x64xbf16>
    %271 = vector.shape_cast %270 : vector<1x64x64xbf16> to vector<64x64xbf16>
    %cst_164 = arith.constant dense<0.000000e+00> : vector<64x1xf32>
    %272 = tpu.matmul %271, %197, %cst_164 {dimension_numbers = #tpu.dot_dimension_numbers<[1], [0], [0], [1], [0, 0, 1, 1], [], []>} : vector<64x64xbf16>, vector<64x1xbf16>, vector<64x1xf32> -> vector<64x1xf32>
    %c5_165 = arith.constant 5 : index
    %c0_166 = arith.constant 0 : index
    %c0_167 = arith.constant 0 : index
    %273 = vector.load %arg12[%c5_165, %c0_166, %c0_167] : memref<11x64x1xf32, #tpu.memory_space<vmem>>, vector<1x64x1xf32>
    %274 = vector.shape_cast %273 : vector<1x64x1xf32> to vector<64x1xf32>
    %275 = arith.addf %272, %274 : vector<64x1xf32>
    %c5_i32 = arith.constant 5 : i32
    %276 = vector.broadcast %c5_i32 : i32 to vector<1x11xi32>
    %277 = arith.cmpi eq, %198, %276 : vector<1x11xi32>
    %278 = arith.extui %277 : vector<1x11xi1> to vector<1x11xi32>
    %279 = arith.sitofp %278 : vector<1x11xi32> to vector<1x11xf32>
    %280 = vector.broadcast %275 : vector<64x1xf32> to vector<64x11xf32>
    %281 = vector.broadcast %279 : vector<1x11xf32> to vector<64x11xf32>
    %282 = arith.mulf %280, %281 : vector<64x11xf32>
    %283 = arith.addf %269, %282 : vector<64x11xf32>
    %c6_168 = arith.constant 6 : index
    %c0_169 = arith.constant 0 : index
    %c0_170 = arith.constant 0 : index
    %284 = vector.load %arg11[%c6_168, %c0_169, %c0_170] : memref<11x64x64xbf16, #tpu.memory_space<vmem>>, vector<1x64x64xbf16>
    %285 = vector.shape_cast %284 : vector<1x64x64xbf16> to vector<64x64xbf16>
    %cst_171 = arith.constant dense<0.000000e+00> : vector<64x1xf32>
    %286 = tpu.matmul %285, %197, %cst_171 {dimension_numbers = #tpu.dot_dimension_numbers<[1], [0], [0], [1], [0, 0, 1, 1], [], []>} : vector<64x64xbf16>, vector<64x1xbf16>, vector<64x1xf32> -> vector<64x1xf32>
    %c6_172 = arith.constant 6 : index
    %c0_173 = arith.constant 0 : index
    %c0_174 = arith.constant 0 : index
    %287 = vector.load %arg12[%c6_172, %c0_173, %c0_174] : memref<11x64x1xf32, #tpu.memory_space<vmem>>, vector<1x64x1xf32>
    %288 = vector.shape_cast %287 : vector<1x64x1xf32> to vector<64x1xf32>
    %289 = arith.addf %286, %288 : vector<64x1xf32>
    %c6_i32 = arith.constant 6 : i32
    %290 = vector.broadcast %c6_i32 : i32 to vector<1x11xi32>
    %291 = arith.cmpi eq, %198, %290 : vector<1x11xi32>
    %292 = arith.extui %291 : vector<1x11xi1> to vector<1x11xi32>
    %293 = arith.sitofp %292 : vector<1x11xi32> to vector<1x11xf32>
    %294 = vector.broadcast %289 : vector<64x1xf32> to vector<64x11xf32>
    %295 = vector.broadcast %293 : vector<1x11xf32> to vector<64x11xf32>
    %296 = arith.mulf %294, %295 : vector<64x11xf32>
    %297 = arith.addf %283, %296 : vector<64x11xf32>
    %c7_175 = arith.constant 7 : index
    %c0_176 = arith.constant 0 : index
    %c0_177 = arith.constant 0 : index
    %298 = vector.load %arg11[%c7_175, %c0_176, %c0_177] : memref<11x64x64xbf16, #tpu.memory_space<vmem>>, vector<1x64x64xbf16>
    %299 = vector.shape_cast %298 : vector<1x64x64xbf16> to vector<64x64xbf16>
    %cst_178 = arith.constant dense<0.000000e+00> : vector<64x1xf32>
    %300 = tpu.matmul %299, %197, %cst_178 {dimension_numbers = #tpu.dot_dimension_numbers<[1], [0], [0], [1], [0, 0, 1, 1], [], []>} : vector<64x64xbf16>, vector<64x1xbf16>, vector<64x1xf32> -> vector<64x1xf32>
    %c7_179 = arith.constant 7 : index
    %c0_180 = arith.constant 0 : index
    %c0_181 = arith.constant 0 : index
    %301 = vector.load %arg12[%c7_179, %c0_180, %c0_181] : memref<11x64x1xf32, #tpu.memory_space<vmem>>, vector<1x64x1xf32>
    %302 = vector.shape_cast %301 : vector<1x64x1xf32> to vector<64x1xf32>
    %303 = arith.addf %300, %302 : vector<64x1xf32>
    %c7_i32 = arith.constant 7 : i32
    %304 = vector.broadcast %c7_i32 : i32 to vector<1x11xi32>
    %305 = arith.cmpi eq, %198, %304 : vector<1x11xi32>
    %306 = arith.extui %305 : vector<1x11xi1> to vector<1x11xi32>
    %307 = arith.sitofp %306 : vector<1x11xi32> to vector<1x11xf32>
    %308 = vector.broadcast %303 : vector<64x1xf32> to vector<64x11xf32>
    %309 = vector.broadcast %307 : vector<1x11xf32> to vector<64x11xf32>
    %310 = arith.mulf %308, %309 : vector<64x11xf32>
    %311 = arith.addf %297, %310 : vector<64x11xf32>
    %c8_182 = arith.constant 8 : index
    %c0_183 = arith.constant 0 : index
    %c0_184 = arith.constant 0 : index
    %312 = vector.load %arg11[%c8_182, %c0_183, %c0_184] : memref<11x64x64xbf16, #tpu.memory_space<vmem>>, vector<1x64x64xbf16>
    %313 = vector.shape_cast %312 : vector<1x64x64xbf16> to vector<64x64xbf16>
    %cst_185 = arith.constant dense<0.000000e+00> : vector<64x1xf32>
    %314 = tpu.matmul %313, %197, %cst_185 {dimension_numbers = #tpu.dot_dimension_numbers<[1], [0], [0], [1], [0, 0, 1, 1], [], []>} : vector<64x64xbf16>, vector<64x1xbf16>, vector<64x1xf32> -> vector<64x1xf32>
    %c8_186 = arith.constant 8 : index
    %c0_187 = arith.constant 0 : index
    %c0_188 = arith.constant 0 : index
    %315 = vector.load %arg12[%c8_186, %c0_187, %c0_188] : memref<11x64x1xf32, #tpu.memory_space<vmem>>, vector<1x64x1xf32>
    %316 = vector.shape_cast %315 : vector<1x64x1xf32> to vector<64x1xf32>
    %317 = arith.addf %314, %316 : vector<64x1xf32>
    %c8_i32 = arith.constant 8 : i32
    %318 = vector.broadcast %c8_i32 : i32 to vector<1x11xi32>
    %319 = arith.cmpi eq, %198, %318 : vector<1x11xi32>
    %320 = arith.extui %319 : vector<1x11xi1> to vector<1x11xi32>
    %321 = arith.sitofp %320 : vector<1x11xi32> to vector<1x11xf32>
    %322 = vector.broadcast %317 : vector<64x1xf32> to vector<64x11xf32>
    %323 = vector.broadcast %321 : vector<1x11xf32> to vector<64x11xf32>
    %324 = arith.mulf %322, %323 : vector<64x11xf32>
    %325 = arith.addf %311, %324 : vector<64x11xf32>
    %c9_189 = arith.constant 9 : index
    %c0_190 = arith.constant 0 : index
    %c0_191 = arith.constant 0 : index
    %326 = vector.load %arg11[%c9_189, %c0_190, %c0_191] : memref<11x64x64xbf16, #tpu.memory_space<vmem>>, vector<1x64x64xbf16>
    %327 = vector.shape_cast %326 : vector<1x64x64xbf16> to vector<64x64xbf16>
    %cst_192 = arith.constant dense<0.000000e+00> : vector<64x1xf32>
    %328 = tpu.matmul %327, %197, %cst_192 {dimension_numbers = #tpu.dot_dimension_numbers<[1], [0], [0], [1], [0, 0, 1, 1], [], []>} : vector<64x64xbf16>, vector<64x1xbf16>, vector<64x1xf32> -> vector<64x1xf32>
    %c9_193 = arith.constant 9 : index
    %c0_194 = arith.constant 0 : index
    %c0_195 = arith.constant 0 : index
    %329 = vector.load %arg12[%c9_193, %c0_194, %c0_195] : memref<11x64x1xf32, #tpu.memory_space<vmem>>, vector<1x64x1xf32>
    %330 = vector.shape_cast %329 : vector<1x64x1xf32> to vector<64x1xf32>
    %331 = arith.addf %328, %330 : vector<64x1xf32>
    %c9_i32 = arith.constant 9 : i32
    %332 = vector.broadcast %c9_i32 : i32 to vector<1x11xi32>
    %333 = arith.cmpi eq, %198, %332 : vector<1x11xi32>
    %334 = arith.extui %333 : vector<1x11xi1> to vector<1x11xi32>
    %335 = arith.sitofp %334 : vector<1x11xi32> to vector<1x11xf32>
    %336 = vector.broadcast %331 : vector<64x1xf32> to vector<64x11xf32>
    %337 = vector.broadcast %335 : vector<1x11xf32> to vector<64x11xf32>
    %338 = arith.mulf %336, %337 : vector<64x11xf32>
    %339 = arith.addf %325, %338 : vector<64x11xf32>
    %c10_196 = arith.constant 10 : index
    %c0_197 = arith.constant 0 : index
    %c0_198 = arith.constant 0 : index
    %340 = vector.load %arg11[%c10_196, %c0_197, %c0_198] : memref<11x64x64xbf16, #tpu.memory_space<vmem>>, vector<1x64x64xbf16>
    %341 = vector.shape_cast %340 : vector<1x64x64xbf16> to vector<64x64xbf16>
    %cst_199 = arith.constant dense<0.000000e+00> : vector<64x1xf32>
    %342 = tpu.matmul %341, %197, %cst_199 {dimension_numbers = #tpu.dot_dimension_numbers<[1], [0], [0], [1], [0, 0, 1, 1], [], []>} : vector<64x64xbf16>, vector<64x1xbf16>, vector<64x1xf32> -> vector<64x1xf32>
    %c10_200 = arith.constant 10 : index
    %c0_201 = arith.constant 0 : index
    %c0_202 = arith.constant 0 : index
    %343 = vector.load %arg12[%c10_200, %c0_201, %c0_202] : memref<11x64x1xf32, #tpu.memory_space<vmem>>, vector<1x64x1xf32>
    %344 = vector.shape_cast %343 : vector<1x64x1xf32> to vector<64x1xf32>
    %345 = arith.addf %342, %344 : vector<64x1xf32>
    %c10_i32 = arith.constant 10 : i32
    %346 = vector.broadcast %c10_i32 : i32 to vector<1x11xi32>
    %347 = arith.cmpi eq, %198, %346 : vector<1x11xi32>
    %348 = arith.extui %347 : vector<1x11xi1> to vector<1x11xi32>
    %349 = arith.sitofp %348 : vector<1x11xi32> to vector<1x11xf32>
    %350 = vector.broadcast %345 : vector<64x1xf32> to vector<64x11xf32>
    %351 = vector.broadcast %349 : vector<1x11xf32> to vector<64x11xf32>
    %352 = arith.mulf %350, %351 : vector<64x11xf32>
    %353 = arith.addf %339, %352 : vector<64x11xf32>
    %354 = tpu.iota {dimensions = array<i32: 0>} : vector<11x53xi32>
    %355 = tpu.iota {dimensions = array<i32: 1>} : vector<11x53xi32>
    %c2_i32_203 = arith.constant 2 : i32
    %356 = vector.broadcast %c2_i32_203 : i32 to vector<11x53xi32>
    %357 = arith.muli %354, %356 : vector<11x53xi32>
    %c16_i32 = arith.constant 16 : i32
    %358 = vector.broadcast %c16_i32 : i32 to vector<11x53xi32>
    %359 = arith.addi %357, %358 : vector<11x53xi32>
    %360 = arith.cmpi eq, %355, %359 : vector<11x53xi32>
    %361 = arith.extui %360 : vector<11x53xi1> to vector<11x53xi32>
    %362 = arith.sitofp %361 : vector<11x53xi32> to vector<11x53xf32>
    %cst_204 = arith.constant dense<0.000000e+00> : vector<64x53xf32>
    %363 = tpu.matmul %353, %362, %cst_204 {dimension_numbers = #tpu.dot_dimension_numbers<[1], [0], [0], [1], [0, 0, 1, 1], [], []>} : vector<64x11xf32>, vector<11x53xf32>, vector<64x53xf32> -> vector<64x53xf32>
    %364 = arith.truncf %363 : vector<64x53xf32> to vector<64x53xbf16>
    %cst_205 = arith.constant 0.000000e+00 : f32
    %365 = vector.broadcast %cst_205 : f32 to vector<64x37xf32>
    %366 = vector.extract_strided_slice %364 {offsets = [0, 0], sizes = [64, 37], strides = [1, 1]} : vector<64x53xbf16> to vector<64x37xbf16>
    %c0_206 = arith.constant 0 : index
    %c0_207 = arith.constant 0 : index
    %c0_208 = arith.constant 0 : index
    %367 = vector.load %arg13[%c0_206, %c0_207, %c0_208] : memref<5x64x64xbf16, #tpu.memory_space<vmem>>, vector<1x64x64xbf16>
    %368 = vector.shape_cast %367 : vector<1x64x64xbf16> to vector<64x64xbf16>
    %cst_209 = arith.constant dense<0.000000e+00> : vector<64x37xf32>
    %369 = tpu.matmul %368, %366, %cst_209 {dimension_numbers = #tpu.dot_dimension_numbers<[1], [0], [0], [1], [0, 0, 1, 1], [], []>} : vector<64x64xbf16>, vector<64x37xbf16>, vector<64x37xf32> -> vector<64x37xf32>
    %370 = arith.addf %365, %369 : vector<64x37xf32>
    %371 = vector.extract_strided_slice %364 {offsets = [0, 4], sizes = [64, 37], strides = [1, 1]} : vector<64x53xbf16> to vector<64x37xbf16>
    %c1_210 = arith.constant 1 : index
    %c0_211 = arith.constant 0 : index
    %c0_212 = arith.constant 0 : index
    %372 = vector.load %arg13[%c1_210, %c0_211, %c0_212] : memref<5x64x64xbf16, #tpu.memory_space<vmem>>, vector<1x64x64xbf16>
    %373 = vector.shape_cast %372 : vector<1x64x64xbf16> to vector<64x64xbf16>
    %cst_213 = arith.constant dense<0.000000e+00> : vector<64x37xf32>
    %374 = tpu.matmul %373, %371, %cst_213 {dimension_numbers = #tpu.dot_dimension_numbers<[1], [0], [0], [1], [0, 0, 1, 1], [], []>} : vector<64x64xbf16>, vector<64x37xbf16>, vector<64x37xf32> -> vector<64x37xf32>
    %375 = arith.addf %370, %374 : vector<64x37xf32>
    %376 = vector.extract_strided_slice %364 {offsets = [0, 8], sizes = [64, 37], strides = [1, 1]} : vector<64x53xbf16> to vector<64x37xbf16>
    %c2_214 = arith.constant 2 : index
    %c0_215 = arith.constant 0 : index
    %c0_216 = arith.constant 0 : index
    %377 = vector.load %arg13[%c2_214, %c0_215, %c0_216] : memref<5x64x64xbf16, #tpu.memory_space<vmem>>, vector<1x64x64xbf16>
    %378 = vector.shape_cast %377 : vector<1x64x64xbf16> to vector<64x64xbf16>
    %cst_217 = arith.constant dense<0.000000e+00> : vector<64x37xf32>
    %379 = tpu.matmul %378, %376, %cst_217 {dimension_numbers = #tpu.dot_dimension_numbers<[1], [0], [0], [1], [0, 0, 1, 1], [], []>} : vector<64x64xbf16>, vector<64x37xbf16>, vector<64x37xf32> -> vector<64x37xf32>
    %380 = arith.addf %375, %379 : vector<64x37xf32>
    %381 = vector.extract_strided_slice %364 {offsets = [0, 12], sizes = [64, 37], strides = [1, 1]} : vector<64x53xbf16> to vector<64x37xbf16>
    %c3_218 = arith.constant 3 : index
    %c0_219 = arith.constant 0 : index
    %c0_220 = arith.constant 0 : index
    %382 = vector.load %arg13[%c3_218, %c0_219, %c0_220] : memref<5x64x64xbf16, #tpu.memory_space<vmem>>, vector<1x64x64xbf16>
    %383 = vector.shape_cast %382 : vector<1x64x64xbf16> to vector<64x64xbf16>
    %cst_221 = arith.constant dense<0.000000e+00> : vector<64x37xf32>
    %384 = tpu.matmul %383, %381, %cst_221 {dimension_numbers = #tpu.dot_dimension_numbers<[1], [0], [0], [1], [0, 0, 1, 1], [], []>} : vector<64x64xbf16>, vector<64x37xbf16>, vector<64x37xf32> -> vector<64x37xf32>
    %385 = arith.addf %380, %384 : vector<64x37xf32>
    %386 = vector.extract_strided_slice %364 {offsets = [0, 16], sizes = [64, 37], strides = [1, 1]} : vector<64x53xbf16> to vector<64x37xbf16>
    %c4_222 = arith.constant 4 : index
    %c0_223 = arith.constant 0 : index
    %c0_224 = arith.constant 0 : index
    %387 = vector.load %arg13[%c4_222, %c0_223, %c0_224] : memref<5x64x64xbf16, #tpu.memory_space<vmem>>, vector<1x64x64xbf16>
    %388 = vector.shape_cast %387 : vector<1x64x64xbf16> to vector<64x64xbf16>
    %cst_225 = arith.constant dense<0.000000e+00> : vector<64x37xf32>
    %389 = tpu.matmul %388, %386, %cst_225 {dimension_numbers = #tpu.dot_dimension_numbers<[1], [0], [0], [1], [0, 0, 1, 1], [], []>} : vector<64x64xbf16>, vector<64x37xbf16>, vector<64x37xf32> -> vector<64x37xf32>
    %390 = arith.addf %385, %389 : vector<64x37xf32>
    %c0_226 = arith.constant 0 : index
    %c0_227 = arith.constant 0 : index
    %391 = vector.load %arg14[%c0_226, %c0_227] : memref<64x1xf32, #tpu.memory_space<vmem>>, vector<64x1xf32>
    %392 = vector.broadcast %391 : vector<64x1xf32> to vector<64x37xf32>
    %393 = arith.addf %390, %392 : vector<64x37xf32>
    %cst_228 = arith.constant 0.00999999977 : f32
    %394 = vector.broadcast %cst_228 : f32 to vector<64x37xf32>
    %395 = arith.mulf %394, %393 : vector<64x37xf32>
    %396 = arith.maximumf %393, %395 : vector<64x37xf32>
    %397 = tpu.iota {dimensions = array<i32: 0>} : vector<37x90xi32>
    %398 = tpu.iota {dimensions = array<i32: 1>} : vector<37x90xi32>
    %c2_i32_229 = arith.constant 2 : i32
    %399 = vector.broadcast %c2_i32_229 : i32 to vector<37x90xi32>
    %400 = arith.muli %397, %399 : vector<37x90xi32>
    %c8_i32_230 = arith.constant 8 : i32
    %401 = vector.broadcast %c8_i32_230 : i32 to vector<37x90xi32>
    %402 = arith.addi %400, %401 : vector<37x90xi32>
    %403 = arith.cmpi eq, %398, %402 : vector<37x90xi32>
    %404 = arith.extui %403 : vector<37x90xi1> to vector<37x90xi32>
    %405 = arith.sitofp %404 : vector<37x90xi32> to vector<37x90xf32>
    %cst_231 = arith.constant dense<0.000000e+00> : vector<64x90xf32>
    %406 = tpu.matmul %396, %405, %cst_231 {dimension_numbers = #tpu.dot_dimension_numbers<[1], [0], [0], [1], [0, 0, 1, 1], [], []>} : vector<64x37xf32>, vector<37x90xf32>, vector<64x90xf32> -> vector<64x90xf32>
    %407 = arith.truncf %406 : vector<64x90xf32> to vector<64x90xbf16>
    %cst_232 = arith.constant 0.000000e+00 : f32
    %408 = vector.broadcast %cst_232 : f32 to vector<32x82xf32>
    %409 = vector.extract_strided_slice %407 {offsets = [0, 0], sizes = [64, 82], strides = [1, 1]} : vector<64x90xbf16> to vector<64x82xbf16>
    %c0_233 = arith.constant 0 : index
    %c0_234 = arith.constant 0 : index
    %c0_235 = arith.constant 0 : index
    %410 = vector.load %arg15[%c0_233, %c0_234, %c0_235] : memref<5x32x64xbf16, #tpu.memory_space<vmem>>, vector<1x32x64xbf16>
    %411 = vector.shape_cast %410 : vector<1x32x64xbf16> to vector<32x64xbf16>
    %cst_236 = arith.constant dense<0.000000e+00> : vector<32x82xf32>
    %412 = tpu.matmul %411, %409, %cst_236 {dimension_numbers = #tpu.dot_dimension_numbers<[1], [0], [0], [1], [0, 0, 1, 1], [], []>} : vector<32x64xbf16>, vector<64x82xbf16>, vector<32x82xf32> -> vector<32x82xf32>
    %413 = arith.addf %408, %412 : vector<32x82xf32>
    %414 = vector.extract_strided_slice %407 {offsets = [0, 2], sizes = [64, 82], strides = [1, 1]} : vector<64x90xbf16> to vector<64x82xbf16>
    %c1_237 = arith.constant 1 : index
    %c0_238 = arith.constant 0 : index
    %c0_239 = arith.constant 0 : index
    %415 = vector.load %arg15[%c1_237, %c0_238, %c0_239] : memref<5x32x64xbf16, #tpu.memory_space<vmem>>, vector<1x32x64xbf16>
    %416 = vector.shape_cast %415 : vector<1x32x64xbf16> to vector<32x64xbf16>
    %cst_240 = arith.constant dense<0.000000e+00> : vector<32x82xf32>
    %417 = tpu.matmul %416, %414, %cst_240 {dimension_numbers = #tpu.dot_dimension_numbers<[1], [0], [0], [1], [0, 0, 1, 1], [], []>} : vector<32x64xbf16>, vector<64x82xbf16>, vector<32x82xf32> -> vector<32x82xf32>
    %418 = arith.addf %413, %417 : vector<32x82xf32>
    %419 = vector.extract_strided_slice %407 {offsets = [0, 4], sizes = [64, 82], strides = [1, 1]} : vector<64x90xbf16> to vector<64x82xbf16>
    %c2_241 = arith.constant 2 : index
    %c0_242 = arith.constant 0 : index
    %c0_243 = arith.constant 0 : index
    %420 = vector.load %arg15[%c2_241, %c0_242, %c0_243] : memref<5x32x64xbf16, #tpu.memory_space<vmem>>, vector<1x32x64xbf16>
    %421 = vector.shape_cast %420 : vector<1x32x64xbf16> to vector<32x64xbf16>
    %cst_244 = arith.constant dense<0.000000e+00> : vector<32x82xf32>
    %422 = tpu.matmul %421, %419, %cst_244 {dimension_numbers = #tpu.dot_dimension_numbers<[1], [0], [0], [1], [0, 0, 1, 1], [], []>} : vector<32x64xbf16>, vector<64x82xbf16>, vector<32x82xf32> -> vector<32x82xf32>
    %423 = arith.addf %418, %422 : vector<32x82xf32>
    %424 = vector.extract_strided_slice %407 {offsets = [0, 6], sizes = [64, 82], strides = [1, 1]} : vector<64x90xbf16> to vector<64x82xbf16>
    %c3_245 = arith.constant 3 : index
    %c0_246 = arith.constant 0 : index
    %c0_247 = arith.constant 0 : index
    %425 = vector.load %arg15[%c3_245, %c0_246, %c0_247] : memref<5x32x64xbf16, #tpu.memory_space<vmem>>, vector<1x32x64xbf16>
    %426 = vector.shape_cast %425 : vector<1x32x64xbf16> to vector<32x64xbf16>
    %cst_248 = arith.constant dense<0.000000e+00> : vector<32x82xf32>
    %427 = tpu.matmul %426, %424, %cst_248 {dimension_numbers = #tpu.dot_dimension_numbers<[1], [0], [0], [1], [0, 0, 1, 1], [], []>} : vector<32x64xbf16>, vector<64x82xbf16>, vector<32x82xf32> -> vector<32x82xf32>
    %428 = arith.addf %423, %427 : vector<32x82xf32>
    %429 = vector.extract_strided_slice %407 {offsets = [0, 8], sizes = [64, 82], strides = [1, 1]} : vector<64x90xbf16> to vector<64x82xbf16>
    %c4_249 = arith.constant 4 : index
    %c0_250 = arith.constant 0 : index
    %c0_251 = arith.constant 0 : index
    %430 = vector.load %arg15[%c4_249, %c0_250, %c0_251] : memref<5x32x64xbf16, #tpu.memory_space<vmem>>, vector<1x32x64xbf16>
    %431 = vector.shape_cast %430 : vector<1x32x64xbf16> to vector<32x64xbf16>
    %cst_252 = arith.constant dense<0.000000e+00> : vector<32x82xf32>
    %432 = tpu.matmul %431, %429, %cst_252 {dimension_numbers = #tpu.dot_dimension_numbers<[1], [0], [0], [1], [0, 0, 1, 1], [], []>} : vector<32x64xbf16>, vector<64x82xbf16>, vector<32x82xf32> -> vector<32x82xf32>
    %433 = arith.addf %428, %432 : vector<32x82xf32>
    %c0_253 = arith.constant 0 : index
    %c0_254 = arith.constant 0 : index
    %434 = vector.load %arg16[%c0_253, %c0_254] : memref<32x1xf32, #tpu.memory_space<vmem>>, vector<32x1xf32>
    %435 = vector.broadcast %434 : vector<32x1xf32> to vector<32x82xf32>
    %436 = arith.addf %433, %435 : vector<32x82xf32>
    %cst_255 = arith.constant 0.00999999977 : f32
    %437 = vector.broadcast %cst_255 : f32 to vector<32x82xf32>
    %438 = arith.mulf %437, %436 : vector<32x82xf32>
    %439 = arith.maximumf %436, %438 : vector<32x82xf32>
    %440 = tpu.iota {dimensions = array<i32: 0>} : vector<82x172xi32>
    %441 = tpu.iota {dimensions = array<i32: 1>} : vector<82x172xi32>
    %c2_i32_256 = arith.constant 2 : i32
    %442 = vector.broadcast %c2_i32_256 : i32 to vector<82x172xi32>
    %443 = arith.muli %440, %442 : vector<82x172xi32>
    %c4_i32_257 = arith.constant 4 : i32
    %444 = vector.broadcast %c4_i32_257 : i32 to vector<82x172xi32>
    %445 = arith.addi %443, %444 : vector<82x172xi32>
    %446 = arith.cmpi eq, %441, %445 : vector<82x172xi32>
    %447 = arith.extui %446 : vector<82x172xi1> to vector<82x172xi32>
    %448 = arith.sitofp %447 : vector<82x172xi32> to vector<82x172xf32>
    %cst_258 = arith.constant dense<0.000000e+00> : vector<32x172xf32>
    %449 = tpu.matmul %439, %448, %cst_258 {dimension_numbers = #tpu.dot_dimension_numbers<[1], [0], [0], [1], [0, 0, 1, 1], [], []>} : vector<32x82xf32>, vector<82x172xf32>, vector<32x172xf32> -> vector<32x172xf32>
    %450 = arith.truncf %449 : vector<32x172xf32> to vector<32x172xbf16>
    %cst_259 = arith.constant 0.000000e+00 : f32
    %451 = vector.broadcast %cst_259 : f32 to vector<1x168xf32>
    %452 = vector.extract_strided_slice %450 {offsets = [0, 0], sizes = [32, 168], strides = [1, 1]} : vector<32x172xbf16> to vector<32x168xbf16>
    %c0_260 = arith.constant 0 : index
    %c0_261 = arith.constant 0 : index
    %c0_262 = arith.constant 0 : index
    %453 = vector.load %arg17[%c0_260, %c0_261, %c0_262] : memref<5x1x32xbf16, #tpu.memory_space<vmem>>, vector<1x1x32xbf16>
    %454 = vector.shape_cast %453 : vector<1x1x32xbf16> to vector<1x32xbf16>
    %cst_263 = arith.constant dense<0.000000e+00> : vector<1x168xf32>
    %455 = tpu.matmul %454, %452, %cst_263 {dimension_numbers = #tpu.dot_dimension_numbers<[1], [0], [0], [1], [0, 0, 1, 1], [], []>} : vector<1x32xbf16>, vector<32x168xbf16>, vector<1x168xf32> -> vector<1x168xf32>
    %456 = arith.addf %451, %455 : vector<1x168xf32>
    %457 = vector.extract_strided_slice %450 {offsets = [0, 1], sizes = [32, 168], strides = [1, 1]} : vector<32x172xbf16> to vector<32x168xbf16>
    %c1_264 = arith.constant 1 : index
    %c0_265 = arith.constant 0 : index
    %c0_266 = arith.constant 0 : index
    %458 = vector.load %arg17[%c1_264, %c0_265, %c0_266] : memref<5x1x32xbf16, #tpu.memory_space<vmem>>, vector<1x1x32xbf16>
    %459 = vector.shape_cast %458 : vector<1x1x32xbf16> to vector<1x32xbf16>
    %cst_267 = arith.constant dense<0.000000e+00> : vector<1x168xf32>
    %460 = tpu.matmul %459, %457, %cst_267 {dimension_numbers = #tpu.dot_dimension_numbers<[1], [0], [0], [1], [0, 0, 1, 1], [], []>} : vector<1x32xbf16>, vector<32x168xbf16>, vector<1x168xf32> -> vector<1x168xf32>
    %461 = arith.addf %456, %460 : vector<1x168xf32>
    %462 = vector.extract_strided_slice %450 {offsets = [0, 2], sizes = [32, 168], strides = [1, 1]} : vector<32x172xbf16> to vector<32x168xbf16>
    %c2_268 = arith.constant 2 : index
    %c0_269 = arith.constant 0 : index
    %c0_270 = arith.constant 0 : index
    %463 = vector.load %arg17[%c2_268, %c0_269, %c0_270] : memref<5x1x32xbf16, #tpu.memory_space<vmem>>, vector<1x1x32xbf16>
    %464 = vector.shape_cast %463 : vector<1x1x32xbf16> to vector<1x32xbf16>
    %cst_271 = arith.constant dense<0.000000e+00> : vector<1x168xf32>
    %465 = tpu.matmul %464, %462, %cst_271 {dimension_numbers = #tpu.dot_dimension_numbers<[1], [0], [0], [1], [0, 0, 1, 1], [], []>} : vector<1x32xbf16>, vector<32x168xbf16>, vector<1x168xf32> -> vector<1x168xf32>
    %466 = arith.addf %461, %465 : vector<1x168xf32>
    %467 = vector.extract_strided_slice %450 {offsets = [0, 3], sizes = [32, 168], strides = [1, 1]} : vector<32x172xbf16> to vector<32x168xbf16>
    %c3_272 = arith.constant 3 : index
    %c0_273 = arith.constant 0 : index
    %c0_274 = arith.constant 0 : index
    %468 = vector.load %arg17[%c3_272, %c0_273, %c0_274] : memref<5x1x32xbf16, #tpu.memory_space<vmem>>, vector<1x1x32xbf16>
    %469 = vector.shape_cast %468 : vector<1x1x32xbf16> to vector<1x32xbf16>
    %cst_275 = arith.constant dense<0.000000e+00> : vector<1x168xf32>
    %470 = tpu.matmul %469, %467, %cst_275 {dimension_numbers = #tpu.dot_dimension_numbers<[1], [0], [0], [1], [0, 0, 1, 1], [], []>} : vector<1x32xbf16>, vector<32x168xbf16>, vector<1x168xf32> -> vector<1x168xf32>
    %471 = arith.addf %466, %470 : vector<1x168xf32>
    %472 = vector.extract_strided_slice %450 {offsets = [0, 4], sizes = [32, 168], strides = [1, 1]} : vector<32x172xbf16> to vector<32x168xbf16>
    %c4_276 = arith.constant 4 : index
    %c0_277 = arith.constant 0 : index
    %c0_278 = arith.constant 0 : index
    %473 = vector.load %arg17[%c4_276, %c0_277, %c0_278] : memref<5x1x32xbf16, #tpu.memory_space<vmem>>, vector<1x1x32xbf16>
    %474 = vector.shape_cast %473 : vector<1x1x32xbf16> to vector<1x32xbf16>
    %cst_279 = arith.constant dense<0.000000e+00> : vector<1x168xf32>
    %475 = tpu.matmul %474, %472, %cst_279 {dimension_numbers = #tpu.dot_dimension_numbers<[1], [0], [0], [1], [0, 0, 1, 1], [], []>} : vector<1x32xbf16>, vector<32x168xbf16>, vector<1x168xf32> -> vector<1x168xf32>
    %476 = arith.addf %471, %475 : vector<1x168xf32>
    %c0_280 = arith.constant 0 : index
    %c0_281 = arith.constant 0 : index
    %477 = vector.load %arg18[%c0_280, %c0_281] : memref<1x1xf32, #tpu.memory_space<vmem>>, vector<1x1xf32>
    %478 = vector.broadcast %477 : vector<1x1xf32> to vector<1x168xf32>
    %479 = arith.addf %476, %478 : vector<1x168xf32>
    %cst_282 = arith.constant 0.00999999977 : f32
    %480 = vector.broadcast %cst_282 : f32 to vector<1x168xf32>
    %481 = arith.mulf %480, %479 : vector<1x168xf32>
    %482 = arith.maximumf %479, %481 : vector<1x168xf32>
    %c0_283 = arith.constant 0 : index
    %c0_284 = arith.constant 0 : index
    %c0_285 = arith.constant 0 : index
    %483 = vector.load %arg19[%c0_283, %c0_284, %c0_285] : memref<1x1x168xf32, #tpu.memory_space<vmem>>, vector<1x1x168xf32>
    %484 = vector.shape_cast %483 : vector<1x1x168xf32> to vector<1x168xf32>
    %485 = vector.shape_cast %482 : vector<1x168xf32> to vector<1x1x168xf32>
    tpu.vector_store %arg19[%c0_283, %c0_284, %c0_285], %485 {strides = array<i32>} : memref<1x1x168xf32, #tpu.memory_space<vmem>>, vector<1x1x168xf32>,
    return
  }
  func.func @transform_0(%arg0: i32) -> (i32, i32, i32) {
    %c0_i32 = arith.constant 0 : i32
    %c0_i32_0 = arith.constant 0 : i32
    %c0_i32_1 = arith.constant 0 : i32
    return %arg0, %c0_i32, %c0_i32_0 : i32, i32, i32
  }
  func.func @transform_1(%arg0: i32) -> (i32, i32, i32) {
    %c0_i32 = arith.constant 0 : i32
    %c0_i32_0 = arith.constant 0 : i32
    %c0_i32_1 = arith.constant 0 : i32
    return %arg0, %c0_i32, %c0_i32_0 : i32, i32, i32
  }
  func.func @transform_2(%arg0: i32) -> (i32, i32, i32) {
    %c0_i32 = arith.constant 0 : i32
    %c0_i32_0 = arith.constant 0 : i32
    %c0_i32_1 = arith.constant 0 : i32
    %c0_i32_2 = arith.constant 0 : i32
    return %c0_i32, %c0_i32_0, %c0_i32_1 : i32, i32, i32
  }
  func.func @transform_3(%arg0: i32) -> (i32, i32) {
    %c0_i32 = arith.constant 0 : i32
    %c0_i32_0 = arith.constant 0 : i32
    %c0_i32_1 = arith.constant 0 : i32
    return %c0_i32, %c0_i32_0 : i32, i32
  }
  func.func @transform_4(%arg0: i32) -> (i32, i32, i32) {
    %c0_i32 = arith.constant 0 : i32
    %c0_i32_0 = arith.constant 0 : i32
    %c0_i32_1 = arith.constant 0 : i32
    %c0_i32_2 = arith.constant 0 : i32
    return %c0_i32, %c0_i32_0, %c0_i32_1 : i32, i32, i32
  }
  func.func @transform_5(%arg0: i32) -> (i32, i32) {
    %c0_i32 = arith.constant 0 : i32
    %c0_i32_0 = arith.constant 0 : i32
    %c0_i32_1 = arith.constant 0 : i32
    return %c0_i32, %c0_i32_0 : i32, i32
  }
  func.func @transform_6(%arg0: i32) -> (i32, i32, i32) {
    %c0_i32 = arith.constant 0 : i32
    %c0_i32_0 = arith.constant 0 : i32
    %c0_i32_1 = arith.constant 0 : i32
    %c0_i32_2 = arith.constant 0 : i32
    return %c0_i32, %c0_i32_0, %c0_i32_1 : i32, i32, i32
  }
  func.func @transform_7(%arg0: i32) -> (i32, i32) {
    %c0_i32 = arith.constant 0 : i32
    %c0_i32_0 = arith.constant 0 : i32
    %c0_i32_1 = arith.constant 0 : i32
    return %c0_i32, %c0_i32_0 : i32, i32
  }
  func.func @transform_8(%arg0: i32) -> (i32, i32, i32) {
    %c0_i32 = arith.constant 0 : i32
    %c0_i32_0 = arith.constant 0 : i32
    %c0_i32_1 = arith.constant 0 : i32
    %c0_i32_2 = arith.constant 0 : i32
    return %c0_i32, %c0_i32_0, %c0_i32_1 : i32, i32, i32
  }
  func.func @transform_9(%arg0: i32) -> (i32, i32) {
    %c0_i32 = arith.constant 0 : i32
    %c0_i32_0 = arith.constant 0 : i32
    %c0_i32_1 = arith.constant 0 : i32
    return %c0_i32, %c0_i32_0 : i32, i32
  }
  func.func @transform_10(%arg0: i32) -> (i32, i32, i32) {
    %c0_i32 = arith.constant 0 : i32
    %c0_i32_0 = arith.constant 0 : i32
    %c0_i32_1 = arith.constant 0 : i32
    %c0_i32_2 = arith.constant 0 : i32
    return %c0_i32, %c0_i32_0, %c0_i32_1 : i32, i32, i32
  }
  func.func @transform_11(%arg0: i32) -> (i32, i32, i32) {
    %c0_i32 = arith.constant 0 : i32
    %c0_i32_0 = arith.constant 0 : i32
    %c0_i32_1 = arith.constant 0 : i32
    %c0_i32_2 = arith.constant 0 : i32
    return %c0_i32, %c0_i32_0, %c0_i32_1 : i32, i32, i32
  }
  func.func @transform_12(%arg0: i32) -> (i32, i32, i32) {
    %c0_i32 = arith.constant 0 : i32
    %c0_i32_0 = arith.constant 0 : i32
    %c0_i32_1 = arith.constant 0 : i32
    %c0_i32_2 = arith.constant 0 : i32
    return %c0_i32, %c0_i32_0, %c0_i32_1 : i32, i32, i32
  }
  func.func @transform_13(%arg0: i32) -> (i32, i32) {
    %c0_i32 = arith.constant 0 : i32
    %c0_i32_0 = arith.constant 0 : i32
    %c0_i32_1 = arith.constant 0 : i32
    return %c0_i32, %c0_i32_0 : i32, i32
  }
  func.func @transform_14(%arg0: i32) -> (i32, i32, i32) {
    %c0_i32 = arith.constant 0 : i32
    %c0_i32_0 = arith.constant 0 : i32
    %c0_i32_1 = arith.constant 0 : i32
    %c0_i32_2 = arith.constant 0 : i32
    return %c0_i32, %c0_i32_0, %c0_i32_1 : i32, i32, i32
  }
  func.func @transform_15(%arg0: i32) -> (i32, i32) {
    %c0_i32 = arith.constant 0 : i32
    %c0_i32_0 = arith.constant 0 : i32
    %c0_i32_1 = arith.constant 0 : i32
    return %c0_i32, %c0_i32_0 : i32, i32
  }
  func.func @transform_16(%arg0: i32) -> (i32, i32, i32) {
    %c0_i32 = arith.constant 0 : i32
    %c0_i32_0 = arith.constant 0 : i32
    %c0_i32_1 = arith.constant 0 : i32
    %c0_i32_2 = arith.constant 0 : i32
    return %c0_i32, %c0_i32_0, %c0_i32_1 : i32, i32, i32
  }
  func.func @transform_17(%arg0: i32) -> (i32, i32) {
    %c0_i32 = arith.constant 0 : i32
    %c0_i32_0 = arith.constant 0 : i32
    %c0_i32_1 = arith.constant 0 : i32
    return %c0_i32, %c0_i32_0 : i32, i32
  }
  func.func @transform_18(%arg0: i32) -> (i32, i32, i32) {
    %c0_i32 = arith.constant 0 : i32
    %c0_i32_0 = arith.constant 0 : i32
    %c0_i32_1 = arith.constant 0 : i32
    return %arg0, %c0_i32, %c0_i32_0 : i32, i32, i32
  }
  func.func @transform_19(%arg0: i32) -> (i32, i32, i32) {
    %c0_i32 = arith.constant 0 : i32
    %c0_i32_0 = arith.constant 0 : i32
    %c0_i32_1 = arith.constant 0 : i32
    return %arg0, %c0_i32, %c0_i32_0 : i32, i32, i32
  }
  func.func @transform_20(%arg0: i32) -> (i32, i32, i32) {
    %c0_i32 = arith.constant 0 : i32
    %c0_i32_0 = arith.constant 0 : i32
    %c0_i32_1 = arith.constant 0 : i32
    return %arg0, %c0_i32, %c0_i32_0 : i32, i32, i32
  }
}

</mosaic_0001>

<bundles_post_ra>
// kernel: vae_forward.1
= control target key start
LH: loop header
LB: loop body
LE: loop exit
PB: predicated region body
PF: predicated region fallthrough
CT: control target
= control target key end

     0   :  { %s15238_s0 = inlined_call_operand.hbm [shape: f32[2,8,168], index: 0, kind: input, shape index: {}]   ;;  %s15239_s1 = inlined_call_operand.vmem [shape: f32[2,64,1], index: 1, kind: input, shape index: {}]   ;;  %s15240_s2 = inlined_call_operand.hbm [shape: bf16[5,32,8], index: 2, kind: input, shape index: {}]   ;;  %s15241_s3 = inlined_call_operand.vmem [shape: f32[32,1], index: 3, kind: input, shape index: {}, may-alias: {3,15}]   ;;  %s15242_s4 = inlined_call_operand.hbm [shape: bf16[5,64,32], index: 4, kind: input, shape index: {}]   ;;  %s15243_s5 = inlined_call_operand.vmem [shape: f32[64,1], index: 5, kind: input, shape index: {}, may-alias: {5,7,13}]   ;;  %s15244_s6 = inlined_call_operand.hbm [shape: bf16[5,64,64], index: 6, kind: input, shape index: {}]   ;;  %s15245_s7 = inlined_call_operand.vmem [shape: f32[64,1], index: 7, kind: input, shape index: {}, may-alias: {5,7,13}]   ;;  %s15246_s8 = inlined_call_operand.vmem [shape: bf16[11,128,64], index: 8, kind: input, shape index: {}]   ;;  %s15247_s9 = inlined_call_operand.vmem [shape: f32[128,1], index: 9, kind: input, shape index: {}]   ;;  %s15248_s10 = inlined_call_operand.vmem [shape: bf16[11,64,64], index: 10, kind: input, shape index: {}]   ;;  %s15249_s11 = inlined_call_operand.vmem [shape: f32[11,64,1], index: 11, kind: input, shape index: {}]   ;;  %s15250_s12 = inlined_call_operand.hbm [shape: bf16[5,64,64], index: 12, kind: input, shape index: {}]   ;;  %s15251_s13 = inlined_call_operand.vmem [shape: f32[64,1], index: 13, kind: input, shape index: {}, may-alias: {5,7,13}]   ;;  %s15252_s14 = inlined_call_operand.vmem [shape: bf16[5,32,64], index: 14, kind: input, shape index: {}]   ;;  %s15253_s15 = inlined_call_operand.vmem [shape: f32[32,1], index: 15, kind: input, shape index: {}, may-alias: {3,15}]   ;;  %s15254_s16 = inlined_call_operand.hbm [shape: bf16[5,1,32], index: 16, kind: input, shape index: {}]   ;;  %s15255_s17 = inlined_call_operand.<no memory space> [shape: f32[1,1], index: 17, kind: input, shape index: {}]   ;;  %s15256_s18 = inlined_call_operand.hbm [shape: f32[2,1,168], index: 18, kind: output, shape index: {0}]   ;;  %s15257_s19 = inlined_call_operand.vmem [shape: f32[2,64,1], index: 19, kind: output, shape index: {1}]   ;;  %s15258_s20 = inlined_call_operand.vmem [shape: f32[2,64,1], index: 20, kind: output, shape index: {2}]  }
   0x1   :  { %15325 = sst [smem:[#allocation61_spill]] %s15238_s0  ;;  %v26_v0 = vstv %s15255_s17 }
   0x2   :  { %15326 = sst [smem:[#allocation62_spill]] %s15239_s1  ;;  %27 = vst [vmem:[#allocation2] sm:$0x1] %v26_v0 }
   0x3   :  { %15327 = sst [smem:[#allocation63_spill]] %s15240_s2 }
   0x4   :  { %15328 = sst [smem:[#allocation64_spill]] %s15241_s3 }
   0x5   :  { %15329 = sst [smem:[#allocation65_spill]] %s15242_s4 }
   0x6   :  { %15330 = sst [smem:[#allocation66_spill]] %s15243_s5 }
   0x7   :  { %15331 = sst [smem:[#allocation67_spill]] %s15244_s6 }
   0x8   :  { %15332 = sst [smem:[#allocation68_spill]] %s15245_s7 }
   0x9   :  { %15333 = sst [smem:[#allocation69_spill]] %s15246_s8 }
   0xa   :  { %15334 = sst [smem:[#allocation70_spill]] %s15249_s11 }
   0xb   :  { %15335 = sst [smem:[#allocation71_spill]] %s15250_s12 }
   0xc   :  { %15336 = sst [smem:[#allocation72_spill]] %s15251_s13 }
   0xd   :  { %15337 = sst [smem:[#allocation73_spill]] %s15252_s14 }
   0xe   :  { %15338 = sst [smem:[#allocation74_spill]] %s15253_s15 }
   0xf   :  { %15339 = sst [smem:[#allocation75_spill]] %s15254_s16 }
  0x10   :  { %15340 = sst [smem:[#allocation76_spill]] %s15256_s18 }
  0x11   :  { %15341 = sst [smem:[#allocation77_spill]] %s15257_s19 }
  0x12   :  { %15342 = sst [smem:[#allocation78_spill]] %s15258_s20 }
  0x13   :  { %28 = vsyncpa [#allocation4], 0 }
  0x14   :  { %30 = vsyncpa [#allocation4 + $0x1], 0 }
  0x15   :  { %31 = vsyncpa [#allocation7], 0 }
  0x16   :  { %32 = vsyncpa [#allocation10], 0 }
  0x17   :  { %33 = vsyncpa [#allocation13], 0 }
  0x18   :  { %34 = vsyncpa [#allocation5], 0 }
  0x19   :  { %36 = vsyncpa [#allocation5 + $0x1], 0  ;;  %s12799_s23 = smov 0   ;;  %s12801_s24 = smov 0  }
  0x1a   :  { %s12803_s2 = smov 0   ;;  %s12805_s25 = smov 0  }
  0x1b LB: > { %s12662_s17 = smov [#allocation6]   ;;  %s12820_s26 = sadd.s32 4294967295, %s12660_s25   ;;  %s12660_s25 = sphi %s12805_s25, %s15500_s25   ;;  %s12656_s2 = sphi %s12803_s2, %s15499_s2   ;;  %s12652_s24 = sphi %s12801_s24, %s15498_s24   ;;  %s12648_s23 = sphi %s12799_s23, %s15497_s23  }
  0x1c   : > { %s525_s3 = sshll.u32 %s12662_s17, 4  ;;  %p9465_p0 = scmp.ge.s32.totalorder %s12660_s25, 1  ;;  %s12825_s3 = int_to_ptr.vmem [resolvable:$true] %s525_s3 }
  0x1d   : > { %p15269_p1 = scmp.eq.s32.totalorder %s12820_s26, 0  ;;  %p513_p2 = scmp.lt.s32.totalorder %s12660_s25, 3 }
  0x1e   : > { %s12663_s28 = smov [#allocation9]   ;;  %s12664_s30 = smov [#allocation8]  }
  0x1f   : > { %p12827_p3 = pnand %p9465_p0, %p513_p2  ;;  %s557_s4 = sshll.u32 %s12663_s28, 4  ;;  %s12840_s4 = int_to_ptr.vmem [resolvable:$true] %s557_s4 }
  0x20   : > { %s541_s0 = sshll.u32 %s12664_s30, 4  ;;  %s15345_s22 = sld [smem:[#allocation63_spill]]  ;;  %s12842_s0 = int_to_ptr.vmem [resolvable:$true] %s541_s0 }
  0x21   : > { %s15343_s27 = scalar_select %p12827_p3, 1, 0 }
  0x22   : > { %p12087_p5 = pneg %p12827_p3 }
  0x24   : > { %p12836_p6 = pnand %p12087_p5, %p15269_p1 }
  0x26   : > { %s12412_s17 = scalar_lea.hbm %s15345_s22, 1280  ;;  %p12852_p8 = pneg %p12836_p6 }
  0x27   : > { %p12413_p7 = scmp.ne.s32.totalorder %s15345_s22, %s12412_s17  ;;  %p12419_p11 = scmp.lt.u32.totalorder %s12412_s17, %s15345_s22 }
  0x29   : > { %p12415_p9 = pnand %p12852_p8, %p12413_p7 }
  0x2b   : > { %p12416_p10 = pneg %p12415_p9 }
  0x2d   : > { %p12421_p12 = pnand %p12419_p11, %p12416_p10 }
  0x2f   : > { %12424 = shalt.err (!%p12421_p12)
}
  0x30   : > { %s12425_s15 = scalar_lea.vmem %s12825_s3, 1280  ;;  %p12433_p5 = scmp.lt.s32.totalorder %s12825_s3, %s12825_s3 }
  0x31   : > { %p12426_p13 = scmp.ne.s32.totalorder %s12825_s3, %s12425_s15  ;;  %p12434_p4 = scmp.lt.s32.totalorder %s12425_s15, %s12425_s15 }
  0x33   : > { %p12428_p0 = pnand %p12426_p13, %p12852_p8  ;;  %p12435_p7 = por %p12434_p4, %p12433_p5 }
  0x35   : > { %p12429_p2 = pneg %p12428_p0 }
  0x37   : > { %p12436_p9 = pnand %p12435_p7, %p12429_p2 }
  0x39   : > { %12439 = shalt.err (!%p12436_p9)
}
  0x3a   : > { %s12665_s18 = smov 64   ;;  %s12666_s14 = smov 4  }
  0x3b   : > { %12090 = dma.hbm_to_vmem [thread:$0]  (!%p12836_p6), %s15345_s22, 1280, %s12825_s3, [#allocation7], %s12665_s18, %s12665_s18, %s12666_s14  }
  0x3c   : > { %s15347_s6 = sld [smem:[#allocation67_spill]] }
  0x42   : > { %s12440_s15 = scalar_lea.hbm %s15347_s6, 2560 }
  0x43   : > { %p12441_p4 = scmp.ne.s32.totalorder %s15347_s6, %s12440_s15  ;;  %p12447_p12 = scmp.lt.u32.totalorder %s12440_s15, %s15347_s6 }
  0x45   : > { %p12443_p10 = pnand %p12441_p4, %p12852_p8 }
  0x47   : > { %p12444_p11 = pneg %p12443_p10 }
  0x49   : > { %p12449_p13 = pnand %p12447_p12, %p12444_p11 }
  0x4b   : > { %12452 = shalt.err (!%p12449_p13)
}
  0x4c   : > { %s12453_s3 = scalar_lea.vmem %s12840_s4, 2560  ;;  %p12461_p7 = scmp.lt.s32.totalorder %s12840_s4, %s12840_s4 }
  0x4d   : > { %p12454_p0 = scmp.ne.s32.totalorder %s12840_s4, %s12453_s3  ;;  %p12462_p9 = scmp.lt.s32.totalorder %s12453_s3, %s12453_s3 }
  0x4f   : > { %p12456_p2 = pnand %p12454_p0, %p12852_p8  ;;  %p12463_p4 = por %p12462_p9, %p12461_p7 }
  0x51   : > { %p12457_p5 = pneg %p12456_p2 }
  0x53   : > { %p12464_p10 = pnand %p12463_p4, %p12457_p5 }
  0x55   : > { %12467 = shalt.err (!%p12464_p10)
}
  0x56   : > { %12096 = dma.hbm_to_vmem [thread:$0]  (!%p12836_p6), %s15347_s6, 2560, %s12840_s4, [#allocation10], %s12665_s18, %s12665_s18, %s12666_s14  }
  0x57   : > { %s15348_s21 = sld [smem:[#allocation65_spill]] }
  0x5d   : > { %s12468_s1 = scalar_lea.hbm %s15348_s21, 2560 }
  0x5e   : > { %p12469_p11 = scmp.ne.s32.totalorder %s15348_s21, %s12468_s1  ;;  %p12475_p0 = scmp.lt.u32.totalorder %s12468_s1, %s15348_s21 }
  0x60   : > { %p12471_p12 = pnand %p12469_p11, %p12852_p8 }
  0x62   : > { %p12472_p13 = pneg %p12471_p12 }
  0x64   : > { %p12477_p2 = pnand %p12475_p0, %p12472_p13 }
  0x66   : > { %12480 = shalt.err (!%p12477_p2)
}
  0x67   : > { %s12481_s4 = scalar_lea.vmem %s12842_s0, 2560  ;;  %p12489_p4 = scmp.lt.s32.totalorder %s12842_s0, %s12842_s0 }
  0x68   : > { %p12482_p5 = scmp.ne.s32.totalorder %s12842_s0, %s12481_s4  ;;  %p12490_p10 = scmp.lt.s32.totalorder %s12481_s4, %s12481_s4 }
  0x6a   : > { %p12484_p7 = pnand %p12482_p5, %p12852_p8  ;;  %p12491_p11 = por %p12490_p10, %p12489_p4 }
  0x6c   : > { %p12485_p9 = pneg %p12484_p7 }
  0x6e   : > { %p12492_p12 = pnand %p12491_p11, %p12485_p9 }
  0x70   : > { %12495 = shalt.err (!%p12492_p12)
}
  0x71   : > { %12093 = dma.hbm_to_vmem [thread:$0]  (!%p12836_p6), %s15348_s21, 2560, %s12842_s0, [#allocation7], %s12665_s18, %s12665_s18, %s12666_s14  }
  0x72   : > { %s12667_s19 = smov [#allocation11]   ;;  %s12668_s1 = smov [#allocation12]  }
  0x73   : > { %s585_s20 = sshll.u32 %s12667_s19, 4  ;;  %s607_s17 = sshll.u32 %s12668_s1, 4  ;;  %s586_s20 = int_to_ptr.vmem [resolvable:$true] %s585_s20  ;;  %s608_s17 = int_to_ptr.vmem [resolvable:$true] %s607_s17 }
  0x74   : > { %s15349_s12 = sld [smem:[#allocation71_spill]] }
  0x7a   : > { %s12496_s3 = scalar_lea.hbm %s15349_s12, 2560 }
  0x7b   : > { %p12497_p13 = scmp.ne.s32.totalorder %s15349_s12, %s12496_s3  ;;  %p12503_p5 = scmp.lt.u32.totalorder %s12496_s3, %s15349_s12 }
  0x7d   : > { %p12499_p0 = pnand %p12497_p13, %p12852_p8 }
  0x7f   : > { %p12500_p2 = pneg %p12499_p0 }
  0x81   : > { %p12505_p7 = pnand %p12503_p5, %p12500_p2 }
  0x83   : > { %12508 = shalt.err (!%p12505_p7)
}
  0x84   : > { %s12509_s0 = scalar_lea.vmem %s586_s20, 2560  ;;  %p12517_p11 = scmp.lt.s32.totalorder %s586_s20, %s586_s20 }
  0x85   : > { %p12510_p9 = scmp.ne.s32.totalorder %s586_s20, %s12509_s0  ;;  %p12518_p12 = scmp.lt.s32.totalorder %s12509_s0, %s12509_s0 }
  0x87   : > { %p12512_p4 = pnand %p12510_p9, %p12852_p8  ;;  %p12519_p1 = por %p12518_p12, %p12517_p11 }
  0x89   : > { %p12513_p10 = pneg %p12512_p4 }
  0x8b   : > { %p12520_p3 = pnand %p12519_p1, %p12513_p10 }
  0x8d   : > { %12523 = shalt.err (!%p12520_p3)
}
  0x8e   : > { %12099 = dma.hbm_to_vmem [thread:$0]  (!%p12836_p6), %s15349_s12, 2560, %s586_s20, [#allocation10], %s12665_s18, %s12665_s18, %s12666_s14  }
  0x8f   : > { %s15350_s16 = sld [smem:[#allocation75_spill]] }
  0x95   : > { %s12524_s1 = scalar_lea.hbm %s15350_s16, 80 }
  0x96   : > { %p12525_p1 = scmp.ne.s32.totalorder %s15350_s16, %s12524_s1  ;;  %p12531_p0 = scmp.lt.u32.totalorder %s12524_s1, %s15350_s16 }
  0x98   : > { %p12527_p3 = pnand %p12525_p1, %p12852_p8 }
  0x9a   : > { %p12528_p13 = pneg %p12527_p3 }
  0x9c   : > { %p12533_p2 = pnand %p12531_p0, %p12528_p13 }
  0x9e   : > { %12536 = shalt.err (!%p12533_p2)
}
  0x9f   : > { %s12537_s11 = scalar_lea.vmem %s608_s17, 80  ;;  %s12544_s18 = scalar_lea.vmem %s608_s17, 96 }
  0xa0   : > { %p12538_p5 = scmp.ne.s32.totalorder %s608_s17, %s12537_s11  ;;  %p12545_p4 = scmp.lt.s32.totalorder %s608_s17, %s608_s17 }
  0xa1   : > { %p12546_p10 = scmp.lt.s32.totalorder %s12544_s18, %s12537_s11 }
  0xa2   : > { %p12540_p7 = pnand %p12538_p5, %p12852_p8 }
  0xa3   : > { %p12547_p11 = por %p12546_p10, %p12545_p4 }
  0xa4   : > { %p12541_p9 = pneg %p12540_p7 }
  0xa6   : > { %p12548_p12 = pnand %p12547_p11, %p12541_p9 }
  0xa8   : > { %12551 = shalt.err (!%p12548_p12)
}
  0xa9   : > { %s12669_s14 = smov 16   ;;  %s12670_s28 = smov 1  }
  0xaa   : > { %12102 = dma.hbm_to_vmem [thread:$0]  (!%p12836_p6), %s15350_s16, 80, %s608_s17, [#allocation13], %s12669_s14, %s12669_s14, %s12670_s28  }
  0xab   : > { %s9464_s6 = sadd.s32 4294967294, %s12660_s25   ;;  %s12969_s22 = sadd.s32 1, %s12660_s25  }
  0xac   : > { %s49_s13 = sadd.s32 1, %s12656_s2  ;;  %s46_s19 = ssub.s32 %s12660_s25, %s12969_s22 }
  0xad   : > { %p56_p8 = scmp.ne.s32.totalorder %s12656_s2, %s12652_s24  ;;  %p47_p1 = scmp.eq.s32.totalorder %s46_s19, 0 }
  0xae   : > { %p57_p3 = scmp.eq.s32.totalorder %s12660_s25, 0  ;;  %p62_p13 = scmp.ne.s32.totalorder %s12652_s24, %s12648_s23 }
  0xaf   : > { %p448_p0 = scmp.eq.s32.totalorder %s12820_s26, 1  ;;  %p15351_p5 = scmp.eq.s32.totalorder %s12820_s26, 0 }
  0xb0   : > { %s12981_s1 = scalar_select %p47_p1, %s12656_s2, %s49_s13  }
  0xb1   : > { %p58_p2 = por %p57_p3, %p56_p8  ;;  %p12985_p7 = por %p15351_p5, %p62_p13 }
  0xb2   : > { %p12989_p6 = por %p448_p0, %p56_p8  ;;  %p454_p9 = scmp.eq.s32.totalorder %s9464_s6, 1 }
  0xb3   : > { %p12116_p4 = scmp.lt.s32.totalorder %s12660_s25, 2  ;;  %s624_s30 = sand.u32 1, %s12656_s2  }
  0xb4   : > { %s15353_s17 = scalar_select %p12989_p6, 1, 0 }
  0xb5   : > { %p12995_p10 = por %p454_p9, %p62_p13  ;;  %s9472_s3 = sshll.u32 %s624_s30, 4 }
  0xb6   : > { %s10428_s4 = sshll.u32 %s12660_s25, 8  ;;  %s15355_s14 = sld [smem:[#allocation61_spill]] }
  0xb7   : > { %s15354_s15 = scalar_select %p12995_p10, 1, 0 }
  0xb8   : > { %s628_s20 = scalar_lea.vmem [#allocation3], %s9472_s3  ;;  %p13005_p11 = pnand %p12116_p4, %p58_p2 }
  0xb9   : > { %s636_s0 = sshll.u32 %s628_s20, 4  ;;  %s625_s13 = scalar_lea.sflag [#allocation4], %s624_s30  ;;  %s13009_s0 = int_to_ptr.vmem [resolvable:$true] %s636_s0 }
  0xba   : > { %p12554_p8 = pneg %p13005_p11 }
  0xbc   : > { %s13003_s28 = scalar_lea.hbm %s15355_s14, %s10428_s4  ;;  %s12557_s11 = scalar_lea.hbm %s15355_s14, 512 }
  0xbd   : > { %s12552_s19 = scalar_lea.hbm %s13003_s28, 256  ;;  %p12558_p13 = scmp.lt.u32.totalorder %s13003_s28, %s15355_s14 }
  0xbe   : > { %p12553_p12 = scmp.ne.s32.totalorder %s13003_s28, %s12552_s19  ;;  %p12559_p0 = scmp.lt.u32.totalorder %s12557_s11, %s12552_s19 }
  0xbf   : > { %p12561_p5 = scmp.lt.u32.totalorder %s12552_s19, %s13003_s28 }
  0xc0   : > { %p12555_p1 = pnand %p12554_p8, %p12553_p12  ;;  %p12560_p2 = por %p12559_p0, %p12558_p13 }
  0xc2   : > { %p12556_p3 = pneg %p12555_p1  ;;  %p12562_p9 = por %p12561_p5, %p12560_p2 }
  0xc4   : > { %p12563_p4 = pnand %p12562_p9, %p12556_p3 }
  0xc6   : > { %12566 = shalt.err (!%p12563_p4)
}
  0xc7   : > { %s12567_s30 = scalar_lea.vmem %s13009_s0, 256  ;;  %s12671_s4 = smov [#allocation3]  }
  0xc8   : > { %p12568_p12 = scmp.ne.s32.totalorder %s13009_s0, %s12567_s30  ;;  %s12572_s3 = sshll.u32 %s12671_s4, 4  ;;  %s12573_s3 = int_to_ptr.vmem [resolvable:$false] %s12572_s3 }
  0xc9   : > { %s12574_s18 = scalar_lea.vmem %s12573_s3, 512  ;;  %p12575_p6 = scmp.lt.s32.totalorder %s13009_s0, %s12573_s3 }
  0xca   : > { %p12570_p1 = pnand %p12568_p12, %p12554_p8  ;;  %p12576_p13 = scmp.lt.s32.totalorder %s12574_s18, %s12567_s30 }
  0xcc   : > { %p12571_p10 = pneg %p12570_p1  ;;  %p12577_p0 = por %p12576_p13, %p12575_p6 }
  0xce   : > { %p12578_p2 = pnand %p12577_p0, %p12571_p10 }
  0xd0   : > { %12581 = shalt.err (!%p12578_p2)
}
  0xd1   : > { %12106 = dma.hbm_to_vmem [thread:$0]  (!%p13005_p11), %s13003_s28, 256, %s13009_s0, %s625_s13  }
  0xd2   : > { %p15357_p3 = scmp.ne.s32.totalorder %s15343_s27, 0 }
  0xd4   : > { %653 = sbr.rel (%p15357_p3) target bundleno = 5202 (0x1452), region = 92 }
  0xdb   : > { %s13039_s19 = sand.u32 1, %s12652_s24  }
  0xdc   : > { %s9476_s11 = sshll.u32 %s13039_s19, 4  ;;  %s656_s20 = scalar_lea.sflag [#allocation4], %s13039_s19 }
  0xdd   : > { %s659_s30 = scalar_lea.vmem [#allocation3], %s9476_s11 }
  0xde   : > { %12627 = dma.done.wait (%p12985_p7), %s656_s20, 256  }
  0xdf   : > { %12629 = vsyncadd (%p12985_p7), %s656_s20, 4294967040  ;;  %p15358_p6 = scmp.eq.s32.totalorder %s12820_s26, 0 }
  0xe1   : > { %12631 = dma.done.wait (%p15358_p6), [#allocation7], 3840   ;;  %p15359_p10 = pmov %p15358_p6 }
  0xe2   : > { %p15360_p11 = pmov %p15358_p6 }
  0xe3   : > { %12633 = vsyncadd (%p15359_p10), [#allocation7], 4294963456 }
  0xe4   : > { %12635 = dma.done.wait (%p15360_p11), [#allocation10], 5120   ;;  %p15361_p8 = pmov %p15358_p6 }
  0xe5   : > { %p15362_p5 = pmov %p15358_p6 }
  0xe6   : > { %12637 = vsyncadd (%p15361_p8), [#allocation10], 4294962176 }
  0xe7   : > { %12639 = dma.done.wait (%p15362_p5), [#allocation13], 80   ;;  %p15363_p9 = pmov %p15362_p5 }
  0xe8   : > { %v15294_v1 = vmov 0   ;;  %v767_v2 = vld [vmem:[%s659_s30] sm:$0xff]  ;;  %v768_v3 = vld [vmem:[%s659_s30 + $0x8] sm:$0xff]  ;;  %s15279_s27 = smov 127   ;;  %s15277_s29 = smov 126   ;;  %v15293_v6 = vlaneseq  ;;  %v12677_v7 = vmov 0.0|0.0  }
  0xe9   : > { %12641 = vsyncadd (%p15363_p9), [#allocation13], 4294967216  ;;  %844 = vmatprep.mubr.bf16.mxu0 %v15294_v1  ;;  %12182 = vset.pattern.permute.xlu0 %v15294_v1  ;;  %v769_v4 = vpack.c.bf16 %v767_v2, %v767_v2  ;;  %v13063_v5 = vpack.c.bf16 %v768_v3, %v768_v3  ;;  %s15275_s28 = smov 125   ;;  %s15287_s0 = smov 124   ;;  %v15296_v19 = vmov 1.0|1.0  }
  0xea   : > { %12183 = vset.pattern.permute.xlu1 %v15294_v1  ;;  %11653 = vmatprep.subr.bf16.mxu1 %v12677_v7  ;;  %v13078_v8 = vshrl.u32 %v15293_v6, 7  ;;  %v13081_v9 = vand.u32 127, %v15293_v6  ;;  %vm805_vm8 = vcmask 1043456   ;;  %v15298_v36 = vmov 0.0   ;;  %v12184_v40 = vld [vmem:[#allocation6 + $0x10] sm:$0xff]   ;;  %v12185_v45 = vld [vmem:[#allocation6 + $0x18] sm:$0xff]  }
  0xeb   : > { %792 = vrot.lane.b32.xlu0 %v769_v4, %s15279_s27  ;;  %955 = vrot.lane.b32.xlu1 %v769_v4, %s15277_s29  ;;  %v882_v25 = vsel %vm805_vm8, %v769_v4, 0  ;;  %v12186_v47 = vld [vmem:[#allocation6] sm:$0xff]   ;;  %v12187_v49 = vld [vmem:[#allocation6 + $0x8] sm:$0xff]   ;;  %v12190_v58 = vld [vmem:[#allocation6 + $0x30] sm:$0xff]   ;;  %s15382_s4 = sld [smem:[#allocation64_spill]]  ;;  %s15283_s6 = smov 120  }
  0xec   : > { %15364 = vst [vmem:[#allocation20_spill] sm:$0xff] %v13078_v8  ;;  %v13084_v10 = vadd.s32 8, %v13078_v8  ;;  %v13087_v11 = vmul.u32 2, %v13081_v9  ;;  %v13090_v12 = vadd.s32 16, %v13078_v8  ;;  %v13093_v13 = vadd.s32 24, %v13078_v8  ;;  %v12188_v52 = vld [vmem:[#allocation6 + $0x20] sm:$0xff]  }
  0xed   : > { %v13096_v14 = vadd.s32 32, %v13078_v8  ;;  %v13105_v15 = vadd.s32 40, %v13078_v8  ;;  %v13114_v17 = vadd.s32 48, %v13078_v8  ;;  %v13117_v18 = vadd.s32 56, %v13078_v8  ;;  %v12189_v55 = vld [vmem:[#allocation6 + $0x28] sm:$0xff]   ;;  %v12191_v60 = vld [vmem:[#allocation6 + $0x38] sm:$0xff]  }
  0xee   : > { %15365 = vst [vmem:[#allocation21_spill] sm:$0xff] %v13090_v12  ;;  %15366 = vst [vmem:[#allocation22_spill] sm:$0xff] %v13093_v13  ;;  %vm1247_vm0 = vcmp.eq.s32.totalorder %v13078_v8, %v13087_v11  ;;  %vm1248_vm1 = vcmp.eq.s32.totalorder %v13084_v10, %v13087_v11  ;;  %vm15272_vm2 = vcmp.eq.s32.totalorder %v13090_v12, %v13087_v11  ;;  %v13131_v21 = vadd.s32 64, %v13078_v8  ;;  %v12192_v61 = vld [vmem:[#allocation6 + $0x40] sm:$0xff]   ;;  %v12193_v62 = vld [vmem:[#allocation6 + $0x48] sm:$0xff]   ;;  %s15383_s5 = sld [smem:[#allocation66_spill]] }
  0xef   : > { %794 = vrot.lane.b32.xlu0 %v13063_v5, %s15279_s27  ;;  %957 = vrot.lane.b32.xlu1 %v13063_v5, %s15277_s29  ;;  %15367 = vst [vmem:[#allocation23_spill] sm:$0xff] %v13096_v14  ;;  %15368 = vst [vmem:[#allocation24_spill] sm:$0xff] %v13105_v15  ;;  %vm1250_vm4 = vcmp.eq.s32.totalorder %v13093_v13, %v13087_v11  ;;  %v13134_v22 = vadd.s32 72, %v13078_v8  ;;  %vm1251_vm6 = vcmp.eq.s32.totalorder %v13096_v14, %v13087_v11  ;;  %s15387_s7 = sld [smem:[#allocation68_spill]]  ;;  %s15389_s8 = sld [smem:[#allocation69_spill]] }
  0xf0   : > { %vm13107_vm3 = vmpackc.low %vm1248_vm1, %vm1247_vm0  ;;  %15371 = vst [vmem:[#allocation25_spill] sm:$0xff] %v13114_v17  ;;  %vm1252_vm7 = vcmp.eq.s32.totalorder %v13105_v15, %v13087_v11  ;;  %v13141_v23 = vadd.s32 80, %v13078_v8  ;;  %v1234_v24 = vadd.s32 88, %v13078_v8  ;;  %vm1253_vm9 = vcmp.eq.s32.totalorder %v13114_v17, %v13087_v11  ;;  %s15391_s27 = smov 126   ;;  %s15392_s11 = smov 125  }
  0xf1   : > { %15372 = vst [vmem:[#allocation26_spill] sm:$0xff] %v13117_v18  ;;  %11655 = vmatpush1.bf16.msk.msra.mxu1 %vm13107_vm3, %v15296_v19  ;;  %vm13126_vm5 = vmpackc.low %vm1250_vm4, %vm15272_vm2  ;;  %vm1254_vm10 = vcmp.eq.s32.totalorder %v13117_v18, %v13087_v11  ;;  %vm15273_vm12 = vcmp.eq.s32.totalorder %v13131_v21, %v13087_v11  ;;  %vm15274_vm13 = vcmp.eq.s32.totalorder %v13134_v22, %v13087_v11  ;;  %v1235_v27 = vadd.s32 96, %v13078_v8  ;;  %v1310_v2 = vld [vmem:[%s15382_s4] sm:$0xff]  ;;  %v1311_v3 = vld [vmem:[%s15382_s4 + $0x8] sm:$0xff]  ;;  %s15393_s13 = smov 124   ;;  %s12686_s30 = smov 121  }
  0xf2   : > { %11656 = vmatprep.subr.bf16.mxu1 %v12677_v7  ;;  %15375 = vst [vmem:[#allocation27_spill] sm:$0xff] %v13131_v21  ;;  %15376 = vst [vmem:[#allocation28_spill] sm:$0xff] %v13134_v22  ;;  %v1236_v28 = vadd.s32 104, %v13078_v8  ;;  %vm1257_vm15 = vcmp.eq.s32.totalorder %v13141_v23, %v13087_v11  ;;  %vm1258_vm0 = vcmp.eq.s32.totalorder %v1234_v24, %v13087_v11  ;;  %v1237_v30 = vadd.s32 112, %v13078_v8  ;;  %s12688_s3 = smov 118   ;;  %p751_p7 = scmp.lt.s32.totalorder %s12820_s26, 1 }
  0xf3   : > { %1051 = vrot.lane.b32.xlu1 %v13063_v5, %s15275_s28  ;;  %1049 = vrot.lane.b32.xlu0 %v769_v4, %s15275_s28  ;;  %15377 = vst [vmem:[#allocation29_spill] sm:$0xff] %v13141_v23  ;;  %vm13153_vm11 = vmpackc.low %vm1252_vm7, %vm1251_vm6  ;;  %v1238_v31 = vadd.s32 120, %v13078_v8  ;;  %v1239_v32 = vadd.s32 128, %v13078_v8  ;;  %v1240_v33 = vadd.s32 136, %v13078_v8  ;;  %v1241_v34 = vadd.s32 144, %v13078_v8  ;;  %s15281_s28 = smov 122  }
  0xf4   : > { %vm13163_vm14 = vmpackc.low %vm1254_vm10, %vm1253_vm9  ;;  %v1242_v35 = vadd.s32 152, %v13078_v8  ;;  %vm1259_vm6 = vcmp.eq.s32.totalorder %v1235_v27, %v13087_v11  ;;  %vm1260_vm7 = vcmp.eq.s32.totalorder %v1236_v28, %v13087_v11  ;;  %vm1261_vm10 = vcmp.eq.s32.totalorder %v1237_v30, %v13087_v11  ;;  %s15395_s14 = sld [smem:[#allocation77_spill]]  ;;  %s15396_s20 = sld [smem:[#allocation78_spill]] }
  0xf5   : > { %11658 = vmatpush1.bf16.msk.msra.mxu1 %vm13126_vm5, %v15296_v19  ;;  %vm11666_vm1 = vmpackc.low %vm15274_vm13, %vm15273_vm12  ;;  %vm1262_vm2 = vcmp.eq.s32.totalorder %v1238_v31, %v13087_v11  ;;  %vm1264_vm12 = vcmp.eq.s32.totalorder %v1240_v33, %v13087_v11  ;;  %v1243_v63 = vadd.s32 160, %v13078_v8  ;;  %s15397_s16 = sld [smem:[#allocation62_spill]]  ;;  %s15460_s12 = smov 116  }
  0xf6   : > { %11659 = vmatprep.subr.bf16.mxu1 %v12677_v7  ;;  %vm11669_vm4 = vmpackc.low %vm1258_vm0, %vm1257_vm15  ;;  %vm1263_vm0 = vcmp.eq.s32.totalorder %v1239_v32, %v13087_v11  ;;  %p15494_p12 = scmp.ne.s32.totalorder %s15353_s17, 0 }
  0xf7   : > { %1145 = vrot.lane.b32.xlu1 %v13063_v5, %s15287_s0  ;;  %1143 = vrot.lane.b32.xlu0 %v769_v4, %s15287_s0  ;;  %vm11672_vm9 = vmpackc.low %vm1260_vm7, %vm1259_vm6  ;;  %vm1265_vm6 = vcmp.eq.s32.totalorder %v1241_v34, %v13087_v11  ;;  %vm1266_vm7 = vcmp.eq.s32.totalorder %v1242_v35, %v13087_v11  ;;  %v1312_v4 = vld [vmem:[%s15382_s4 + $0x10] sm:$0xff] }
  0xf8   : > { %vm11675_vm15 = vmpackc.low %vm1262_vm2, %vm1261_vm10  ;;  %vm15324_vm2 = vcmask 1039360   ;;  %vm2098_vm10 = vcmask 1041408  }
  0xf9   : > { %11661 = vmatpush1.bf16.msk.msra.mxu1 %vm13153_vm11, %v15296_v19  ;;  %vm11678_vm13 = vmpackc.low %vm1264_vm12, %vm1263_vm0  ;;  %vm798_vm12 = vcmask 64512  }
  0xfa   : > { %11662 = vmatprep.subr.bf16.mxu1 %v12677_v7 }
  0xfb   : > { %1316 = vperm.xlu0 %12182, %v1310_v2   ;;  %1321 = vperm.xlu1 %12183, %v1311_v3   ;;  %v2032_v2 = vld [vmem:[%s15383_s5 + $0x38] sm:$0xff] }
  0xfd   : > { %11664 = vmatpush1.bf16.msk.msra.mxu1 %vm13163_vm14, %v15296_v19 }
  0xfe   : > { %11665 = vmatprep.subr.bf16.mxu1 %v12677_v7 }
  0xff   : > { %1326 = vperm.xlu1 %12183, %v1312_v4  }
 0x101   : > { %11667 = vmatpush1.bf16.msk.msra.mxu1 %vm11666_vm1, %v15296_v19  ;;  %vm11681_vm1 = vmpackc.low %vm1266_vm7, %vm1265_vm6  ;;  %vm2280_vm6 = vcmask 523264   ;;  %vm15388_vm7 = vcmp.eq.s32.totalorder %v13090_v12, %v13087_v11 }
 0x102   : > { %11668 = vmatprep.subr.bf16.mxu1 %v12677_v7 }
 0x105   : > { %11670 = vmatpush1.bf16.msk.msra.mxu1 %vm11669_vm4, %v15296_v19  ;;  %vm15321_vm4 = vcmask 1031168  }
 0x106   : > { %11671 = vmatprep.subr.bf16.mxu1 %v12677_v7 }
 0x109   : > { %11673 = vmatpush1.bf16.msk.msra.mxu1 %vm11672_vm9, %v15296_v19  ;;  %vm15318_vm9 = vcmask 1014784  }
 0x10a   : > { %11674 = vmatprep.subr.bf16.mxu1 %v12677_v7 }
 0x10d   : > { %11676 = vmatpush1.bf16.msk.msra.mxu1 %vm11675_vm15, %v15296_v19  ;;  %vm15385_vm15 = vcmp.eq.s32.totalorder %v13131_v21, %v13087_v11 }
 0x10e   : > { %11677 = vmatprep.subr.bf16.mxu1 %v12677_v7  ;;  %vm11700_vm0 = vmpackc.low %vm2098_vm10, %vm15385_vm15  ;;  %vm7324_vm15 = vcmask 1042432  }
 0x111   : > { %11679 = vmatpush1.bf16.msk.msra.mxu1 %vm11678_vm13, %v15296_v19  ;;  %vm15322_vm13 = vcmask 1022976  }
 0x112   : > { %11680 = vmatprep.subr.bf16.mxu1 %v12677_v7 }
 0x115   : > { %11682 = vmatpush1.bf16.msk.msra.mxu1 %vm11681_vm1, %v15296_v19  ;;  %vm2906_vm1 = vcmask 1044480  }
 0x116   : > { %1390 = vmatprep.subr.mxu1 %v15298_v36 }
 0x15d   : > { %v793_v37 = vpop.permute.xlu0 %792  ;;  %v956_v38 = vpop.permute.xlu1 %955 }
 0x161   : > { %v795_v39 = vpop.permute.xlu0 %794  ;;  %v958_v43 = vpop.permute.xlu1 %957 }
 0x162   : > { %9491 = vmatprep.subr.msk.bf16.mxu0 %vm805_vm8, %v795_v39  ;;  %v797_v41 = vsel %vm15324_vm2, %v793_v37, %v795_v39  ;;  %v960_v44 = vsel %vm15321_vm4, %v956_v38, %v958_v43 }
 0x163   : > { %v807_v42 = vsel %vm805_vm8, %v797_v41, 0  ;;  %v968_v46 = vsel %vm805_vm8, %v960_v44, 0 }
 0x164   : > { %813 = vmatpush1.bf16.msra.mxu0 %v807_v42 }
 0x165   : > { %9496 = vmatprep.subr.msk.bf16.mxu0 %vm805_vm8, %v13063_v5  ;;  %v1052_v48 = vpop.permute.xlu1 %1051  ;;  %v1050_v50 = vpop.permute.xlu0 %1049  ;;  %v1313_v5 = vld [vmem:[%s15382_s4 + $0x18] sm:$0xff]  ;;  %s15462_s4 = sld [smem:[#allocation72_spill]] }
 0x166   : > { %v1054_v51 = vsel %vm15322_vm13, %v1050_v50, %v1052_v48  ;;  %1331 = vperm.xlu0 %12182, %v1313_v5   ;;  %v12195_v5 = vld [vmem:[#allocation8 + $0x28] sm:$0xff]  }
 0x167   : > { %9492 = vmatmul.mubr.msk.bf16.vlgmr.msra.gmra.mrb[0].mxu0 %vm798_vm12, %v12184_v40  ;;  %v1062_v53 = vsel %vm805_vm8, %v1054_v51, 0 }
 0x168   : > { %854 = vmatprep.mubr.bf16.mxu0 %v15294_v1  ;;  %888 = vmatpush1.bf16.msra.mxu0 %v882_v25 }
 0x169   : > { %9501 = vmatprep.subr.msk.bf16.mxu0 %vm805_vm8, %v958_v43  ;;  %v1146_v54 = vpop.permute.xlu1 %1145  ;;  %v1144_v56 = vpop.permute.xlu0 %1143 }
 0x16a   : > { %v1148_v57 = vsel %vm15318_vm9, %v1144_v56, %v1146_v54  ;;  %vm6882_vm9 = vcmp.eq.s32.totalorder %v13081_v9, 8 }
 0x16b   : > { %v1156_v59 = vsel %vm805_vm8, %v1148_v57, 0 }
 0x16f   : > { %9493 = vmatmul.mubr.msk.bf16.gmra.mrb[4].mxu0 %vm798_vm12, %v12185_v45 }
 0x170   : > { %919 = vmatprep.mubr.bf16.mxu0 %v15294_v1 }
 0x177   : > { %9497 = vmatmul.mubr.msk.bf16.vlgmr.msra.gmra.mrb[0].mxu0 %vm798_vm12, %v12186_v47  ;;  %v12194_v47 = vld [vmem:[#allocation8 + $0x20] sm:$0xff]  }
 0x178   : > { %929 = vmatprep.mubr.bf16.mxu0 %v15294_v1  ;;  %974 = vmatpush1.bf16.msra.mxu0 %v968_v46 }
 0x179   : > { %9506 = vmatprep.subr.msk.bf16.mxu0 %vm805_vm8, %v1052_v48 }
 0x17a   : > { %v1317_v30 = vpop.permute.xlu0 %1316  ;;  %v1322_v32 = vpop.permute.xlu1 %1321 }
 0x17e   : > { %v1327_v40 = vpop.permute.xlu1 %1326 }
 0x17f   : > { %9498 = vmatmul.mubr.msk.bf16.gmra.mrb[4].mxu0 %vm798_vm12, %v12187_v49 }
 0x180   : > { %1005 = vmatprep.mubr.bf16.mxu0 %v15294_v1 }
 0x187   : > { %9502 = vmatmul.mubr.msk.bf16.vlgmr.msra.gmra.mrb[0].mxu0 %vm798_vm12, %v12188_v52 }
 0x188   : > { %1015 = vmatprep.mubr.bf16.mxu0 %v15294_v1  ;;  %1068 = vmatpush1.bf16.msra.mxu0 %v1062_v53 }
 0x189   : > { %9511 = vmatprep.subr.msk.bf16.mxu0 %vm805_vm8, %v1146_v54 }
 0x18f   : > { %9503 = vmatmul.mubr.msk.bf16.gmra.mrb[4].mxu0 %vm798_vm12, %v12189_v55 }
 0x190   : > { %1099 = vmatprep.mubr.bf16.mxu0 %v15294_v1 }
 0x197   : > { %9507 = vmatmul.mubr.msk.bf16.vlgmr.msra.gmra.mrb[0].mxu0 %vm798_vm12, %v12190_v58  ;;  %v2025_v58 = vld [vmem:[%s15383_s5] sm:$0xff] }
 0x198   : > { %1109 = vmatprep.mubr.bf16.mxu0 %v15294_v1  ;;  %1162 = vmatpush1.bf16.msra.mxu0 %v1156_v59  ;;  %v2027_v59 = vld [vmem:[%s15383_s5 + $0x10] sm:$0xff] }
 0x199   : > { %11684 = vmatprep.subr.msk.bf16.mxu0 %vm13107_vm3, %v15296_v19 }
 0x19f   : > { %9508 = vmatmul.mubr.msk.bf16.gmra.mrb[4].mxu0 %vm798_vm12, %v12191_v60  ;;  %v2029_v60 = vld [vmem:[%s15383_s5 + $0x20] sm:$0xff] }
 0x1a0   : > { %1193 = vmatprep.mubr.bf16.mxu0 %v15294_v1 }
 0x1a7   : > { %9512 = vmatmul.mubr.msk.bf16.vlgmr.msra.gmra.mrb[0].mxu0 %vm798_vm12, %v12192_v61  ;;  %v2026_v61 = vld [vmem:[%s15383_s5 + $0x8] sm:$0xff] }
 0x1a8   : > { %1203 = vmatprep.mubr.bf16.mxu0 %v15294_v1  ;;  %11686 = vmatpush3.bf16.msk.msra.mxu0 %vm13107_vm3, %v15296_v19 }
 0x1a9   : > { %11688 = vmatprep.subr.msk.bf16.mxu0 %vm13126_vm5, %v15296_v19 }
 0x1ac   : > { %11690 = vmatpush3.bf16.msk.msra.mxu0 %vm13126_vm5, %v15296_v19  ;;  %vm1267_vm5 = vcmp.eq.s32.totalorder %v1243_v63, %v13087_v11  ;;  %v2028_v63 = vld [vmem:[%s15383_s5 + $0x18] sm:$0xff] }
 0x1ad   : > { %11692 = vmatprep.subr.msk.bf16.mxu0 %vm13153_vm11, %v15296_v19  ;;  %v9534_v0 = vsel %vm1267_vm5, 1.0, %v15298_v36  ;;  %vm5308_vm5 = vcmask 7168  }
 0x1ae   : > { %9555 = vmatpush1.msk.msra.mxu1 %vm805_vm8, %v9534_v0  ;;  %vm1334_vm8 = vcmask 293888   ;;  %v2030_v0 = vld [vmem:[%s15383_s5 + $0x28] sm:$0xff] }
 0x1af   : > { %9513 = vmatmul.mubr.msk.bf16.gmra.mrb[4].mxu0 %vm798_vm12, %v12193_v62  ;;  %v2031_v62 = vld [vmem:[%s15383_s5 + $0x30] sm:$0xff]  ;;  %vm2881_vm12 = vcmask 171008   ;;  %s15398_s5 = sld [smem:[#allocation70_spill]] }
 0x1b0   : > { %11694 = vmatpush3.bf16.msk.msra.mxu0 %vm13153_vm11, %v15296_v19  ;;  %vm15323_vm11 = vcmask 261120  }
 0x1b1   : > { %11696 = vmatprep.subr.msk.bf16.mxu0 %vm13163_vm14, %v15296_v19 }
 0x1b4   : > { %11698 = vmatpush3.bf16.msk.msra.mxu0 %vm13163_vm14, %v15296_v19  ;;  %vm15384_vm14 = vcmp.eq.s32.totalorder %v13134_v22, %v13087_v11 }
 0x1e5   : > { %v1332_v49 = vpop.permute.xlu0 %1331 }
 0x27a   : > { %v1195_v7 = vpop.f32.mrb[0].mxu0 }
 0x27b   : > { %v1197_v20 = vpop.f32.mrb[1].mxu0 }
 0x27c   : > { %v1199_v24 = vpop.f32.mrb[2].mxu0  ;;  %9556 = vmatprep.mubr.msk.f32.mxu1 %vm1334_vm8, %v1197_v20  ;;  %v12197_v20 = vld [vmem:[#allocation8 + $0x38] sm:$0xff]  }
 0x27d   : > { %v1201_v25 = vpop.f32.mrb[3].mxu0  ;;  %1415 = vmatmul.mubr.f32.vlgmr.msra.gmra.mrb[0].mxu1 %v1195_v7  ;;  %v12196_v7 = vld [vmem:[#allocation8 + $0x30] sm:$0xff]  }
 0x27e   : > { %9557 = vmatprep.mubr.msk.f32.mxu1 %vm1334_vm8, %v1201_v25  ;;  %v12198_v25 = vld [vmem:[#allocation8] sm:$0xff]  }
 0x281   : > { %1420 = vmatmul.mubr.f32.gmra.mrb[2].mxu1 %v1199_v24 }
 0x282   : > { %v1205_v26 = vpop.f32.mrb[4].mxu0 }
 0x283   : > { %v1207_v27 = vpop.f32.mrb[5].mxu0 }
 0x284   : > { %v1209_v28 = vpop.f32.mrb[6].mxu0  ;;  %9558 = vmatprep.mubr.msk.f32.mxu1 %vm1334_vm8, %v1207_v27  ;;  %v12200_v27 = vld [vmem:[#allocation8 + $0x10] sm:$0xff]  }
 0x285   : > { %v1211_v29 = vpop.f32.mrb[7].mxu0  ;;  %1425 = vmatmul.mubr.f32.gmra.mrb[4].mxu1 %v1205_v26  ;;  %v12199_v26 = vld [vmem:[#allocation8 + $0x8] sm:$0xff]  }
 0x286   : > { %9559 = vmatprep.mubr.msk.f32.mxu1 %vm1334_vm8, %v1211_v29  ;;  %v12201_v29 = vld [vmem:[#allocation8 + $0x18] sm:$0xff]  }
 0x289   : > { %1430 = vmatmul.mubr.f32.gmra.mrb[6].mxu1 %v1209_v28 }
 0x28a   : > { %10849 = vmatprep.mubr.msk.bf16.mxu1 %vm15323_vm11, %v12194_v47  ;;  %v9523_v47 = vsel %vm15384_vm14, 1.0, %v15298_v36 }
 0x350   : > { %v1416_v31 = vpop.f32.mrb[0].mxu1 }
 0x351   : > { %v1417_v33 = vadd.f32 %v1416_v31, %v1317_v30  ;;  %v1418_v34 = vpop.f32.mrb[1].mxu1  ;;  %v12202_v31 = vld [vmem:[#allocation8 + $0x40] sm:$0xff]  }
 0x353   : > { %v1435_v37 = vmul.f32 0.01, %v1417_v33 }
 0x354   : > { %v1421_v35 = vpop.f32.mrb[2].mxu1 }
 0x355   : > { %v1422_v38 = vadd.f32 %v1421_v35, %v1322_v32  ;;  %v1423_v39 = vpop.f32.mrb[3].mxu1  ;;  %v1439_v43 = vmax.f32 %v1417_v33, %v1435_v37  ;;  %v12203_v32 = vld [vmem:[#allocation8 + $0x48] sm:$0xff]   ;;  %v12204_v33 = vld [vmem:[#allocation8 + $0x50] sm:$0xff]   ;;  %v12205_v35 = vld [vmem:[#allocation8 + $0x58] sm:$0xff]  }
 0x356   : > { %v12207_v39 = vld [vmem:[#allocation8 + $0x68] sm:$0xff]  }
 0x357   : > { %v1436_v41 = vmul.f32 0.01, %v1422_v38 }
 0x358   : > { %v1426_v42 = vpop.f32.mrb[4].mxu1 }
 0x359   : > { %v1440_v44 = vmax.f32 %v1422_v38, %v1436_v41  ;;  %v1427_v45 = vadd.f32 %v1426_v42, %v1327_v40  ;;  %v1428_v46 = vpop.f32.mrb[5].mxu1  ;;  %v12206_v38 = vld [vmem:[#allocation8 + $0x60] sm:$0xff]   ;;  %v12208_v40 = vld [vmem:[#allocation8 + $0x70] sm:$0xff]   ;;  %v12209_v42 = vld [vmem:[#allocation8 + $0x78] sm:$0xff]  }
 0x35a   : > { %v12213_v46 = vld [vmem:[#allocation8 + $0x98] sm:$0xff]  }
 0x35b   : > { %v1443_v48 = vpack.c.bf16 %v1440_v44, %v1439_v43  ;;  %v1437_v51 = vmul.f32 0.01, %v1427_v45  ;;  %v12210_v43 = vld [vmem:[#allocation8 + $0x80] sm:$0xff]   ;;  %v12211_v44 = vld [vmem:[#allocation8 + $0x88] sm:$0xff]  }
 0x35c   : > { %v1431_v50 = vpop.f32.mrb[6].mxu1 }
 0x35d   : > { %v1432_v52 = vadd.f32 %v1431_v50, %v1332_v49  ;;  %1484 = vrot.lane.b32.xlu1 %v1443_v48, %s15277_s29  ;;  %v1433_v53 = vpop.f32.mrb[7].mxu1  ;;  %v1441_v55 = vmax.f32 %v1427_v45, %v1437_v51  ;;  %v12212_v45 = vld [vmem:[#allocation8 + $0x90] sm:$0xff]  }
 0x35f   : > { %v1438_v54 = vmul.f32 0.01, %v1432_v52 }
 0x361   : > { %v1442_v56 = vmax.f32 %v1432_v52, %v1438_v54  ;;  %1694 = vrot.lane.b32.xlu1 %v1443_v48, %s15287_s0 }
 0x363   : > { %v1444_v57 = vpack.c.bf16 %v1442_v56, %v1441_v55 }
 0x365   : > { %1814 = vrot.lane.b32.xlu1 %v1443_v48, %s15281_s28  ;;  %1486 = vrot.lane.b32.xlu0 %v1444_v57, %s15277_s29  ;;  %s15386_s29 = smov 120  }
 0x369   : > { %1934 = vrot.lane.b32.xlu1 %v1443_v48, %s15283_s6  ;;  %1696 = vrot.lane.b32.xlu0 %v1444_v57, %s15287_s0 }
 0x36d   : > { %2035 = vperm.xlu1 %12183, %v2025_v58   ;;  %1816 = vrot.lane.b32.xlu0 %v1444_v57, %s15281_s28  ;;  %s15285_s28 = smov 116  }
 0x371   : > { %2045 = vperm.xlu1 %12183, %v2027_v59   ;;  %1936 = vrot.lane.b32.xlu0 %v1444_v57, %s15283_s6  ;;  %s15289_s6 = smov 112  }
 0x375   : > { %2055 = vperm.xlu1 %12183, %v2029_v60   ;;  %2040 = vperm.xlu0 %12182, %v2026_v61  }
 0x379   : > { %2065 = vperm.xlu1 %12183, %v2031_v62   ;;  %2050 = vperm.xlu0 %12182, %v2028_v63  }
 0x37d   : > { %2060 = vperm.xlu0 %12182, %v2030_v0  }
 0x381   : > { %2070 = vperm.xlu0 %12182, %v2032_v2  }
 0x3cf   : > { %v1485_v3 = vpop.permute.xlu1 %1484 }
 0x3d0   : > { %10845 = vmatprep.subr.bf16.mxu1 %v1485_v3 }
 0x3d1   : > { %10846 = vmatpush3.bf16.msra.mxu1 %v1485_v3 }
 0x3d3   : > { %v1695_v24 = vpop.permute.xlu1 %1694 }
 0x3d7   : > { %v1487_v4 = vpop.permute.xlu0 %1486  ;;  %v1815_v30 = vpop.permute.xlu1 %1814 }
 0x3d8   : > { %10847 = vmatprep.subr.bf16.mxu1 %v1487_v4 }
 0x3d9   : > { %10848 = vmatpush3.bf16.msra.mxu1 %v1487_v4 }
 0x3da   : > { %10857 = vmatprep.subr.bf16.mxu1 %v1443_v48 }
 0x3db   : > { %v1697_v28 = vpop.permute.xlu0 %1696  ;;  %v1935_v37 = vpop.permute.xlu1 %1934 }
 0x3dc   : > { %10850 = vmatmul.mubr.msk.bf16.vlgmr.msra.gmra.mrb[8].mxu1 %vm15323_vm11, %v12195_v5 }
 0x3dd   : > { %10858 = vmatpush3.bf16.msra.mxu1 %v1443_v48  ;;  %10853 = vmatprep.mubr.msk.bf16.mxu1 %vm15323_vm11, %v12196_v7  ;;  %v12682_v48 = vmov 1.0  }
 0x3de   : > { %10859 = vmatprep.subr.bf16.mxu1 %v1444_v57  ;;  %v11699_v49 = vpack.c.bf16 %v9523_v47, %v12682_v48 }
 0x3df   : > { %v1817_v34 = vpop.permute.xlu0 %1816 }
 0x3e0   : > { %11701 = vmatprep.subr.msk.bf16.mxu0 %vm11700_vm0, %v11699_v49 }
 0x3e1   : > { %10860 = vmatpush3.bf16.msra.mxu1 %v1444_v57  ;;  %11704 = vmatpush3.bf16.msk.msra.mxu0 %vm11700_vm0, %v11699_v49 }
 0x3e2   : > { %10869 = vmatprep.subr.bf16.mxu1 %v1695_v24 }
 0x3e3   : > { %v1937_v41 = vpop.permute.xlu0 %1936 }
 0x3e4   : > { %10854 = vmatmul.mubr.msk.bf16.gmra.mrb[12].mxu1 %vm15323_vm11, %v12197_v20 }
 0x3e5   : > { %10861 = vmatprep.mubr.msk.bf16.mxu1 %vm15323_vm11, %v12198_v25 }
 0x3ec   : > { %10862 = vmatmul.mubr.msk.bf16.vlgmr.msra.gmra.mrb[8].mxu1 %vm15323_vm11, %v12199_v26  ;;  %v2036_v58 = vpop.permute.xlu1 %2035 }
 0x3ed   : > { %10870 = vmatpush3.bf16.msra.mxu1 %v1695_v24  ;;  %10865 = vmatprep.mubr.msk.bf16.mxu1 %vm15323_vm11, %v12200_v27 }
 0x3ee   : > { %10871 = vmatprep.subr.bf16.mxu1 %v1697_v28 }
 0x3f0   : > { %v2046_v61 = vpop.permute.xlu1 %2045 }
 0x3f1   : > { %10872 = vmatpush3.bf16.msra.mxu1 %v1697_v28 }
 0x3f2   : > { %10881 = vmatprep.subr.bf16.mxu1 %v1815_v30 }
 0x3f4   : > { %10866 = vmatmul.mubr.msk.bf16.gmra.mrb[12].mxu1 %vm15323_vm11, %v12201_v29  ;;  %v2041_v57 = vpop.permute.xlu0 %2040  ;;  %v2056_v27 = vpop.permute.xlu1 %2055 }
 0x3f5   : > { %10873 = vmatprep.mubr.msk.bf16.mxu1 %vm15323_vm11, %v12202_v31 }
 0x3f8   : > { %v2051_v59 = vpop.permute.xlu0 %2050 }
 0x3fc   : > { %10874 = vmatmul.mubr.msk.bf16.vlgmr.msra.gmra.mrb[8].mxu1 %vm15323_vm11, %v12203_v32  ;;  %v2061_v24 = vpop.permute.xlu0 %2060 }
 0x3fd   : > { %10882 = vmatpush3.bf16.msra.mxu1 %v1815_v30  ;;  %10877 = vmatprep.mubr.msk.bf16.mxu1 %vm15323_vm11, %v12204_v33 }
 0x3fe   : > { %10883 = vmatprep.subr.bf16.mxu1 %v1817_v34 }
 0x401   : > { %10884 = vmatpush3.bf16.msra.mxu1 %v1817_v34 }
 0x402   : > { %10893 = vmatprep.subr.bf16.mxu1 %v1935_v37 }
 0x404   : > { %10878 = vmatmul.mubr.msk.bf16.gmra.mrb[12].mxu1 %vm15323_vm11, %v12205_v35 }
 0x405   : > { %10885 = vmatprep.mubr.msk.bf16.mxu1 %vm15323_vm11, %v12206_v38 }
 0x40c   : > { %10886 = vmatmul.mubr.msk.bf16.vlgmr.msra.gmra.mrb[8].mxu1 %vm15323_vm11, %v12207_v39  ;;  %v12214_v39 = vld [vmem:[#allocation9 + $0x20] sm:$0xff]  }
 0x40d   : > { %10894 = vmatpush3.bf16.msra.mxu1 %v1935_v37  ;;  %10889 = vmatprep.mubr.msk.bf16.mxu1 %vm15323_vm11, %v12208_v40  ;;  %v2071_v40 = vpop.permute.xlu0 %2070 }
 0x40e   : > { %10895 = vmatprep.subr.bf16.mxu1 %v1937_v41 }
 0x411   : > { %10896 = vmatpush3.bf16.msra.mxu1 %v1937_v41 }
 0x412   : > { %11706 = vmatprep.subr.msk.bf16.mxu1 %vm13107_vm3, %v15296_v19 }
 0x414   : > { %10890 = vmatmul.mubr.msk.bf16.gmra.mrb[12].mxu1 %vm15323_vm11, %v12209_v42 }
 0x415   : > { %10897 = vmatprep.mubr.msk.bf16.mxu1 %vm15323_vm11, %v12210_v43 }
 0x41c   : > { %10898 = vmatmul.mubr.msk.bf16.vlgmr.msra.gmra.mrb[8].mxu1 %vm15323_vm11, %v12211_v44  ;;  %v2066_v44 = vpop.permute.xlu1 %2065 }
 0x41d   : > { %10901 = vmatprep.mubr.msk.bf16.mxu1 %vm15323_vm11, %v12212_v45  ;;  %11708 = vmatpush3.bf16.msk.msra.mxu1 %vm13107_vm3, %v15296_v19  ;;  %vm2073_vm3 = vcmask 605184  }
 0x424   : > { %10902 = vmatmul.mubr.msk.bf16.gmra.mrb[12].mxu1 %vm15323_vm11, %v12213_v46 }
 0x4ef   : > { %v10899_v16 = vpop.f32.mrb[8].mxu1 }
 0x4f0   : > { %v1986_v50 = vpop.f32.mrb[9].mxu1 }
 0x4f1   : > { %v10900_v51 = vpop.f32.mrb[10].mxu1  ;;  %10925 = vmatprep.mubr.msk.f32.mxu0 %vm2073_vm3, %v1986_v50 }
 0x4f2   : > { %v1989_v52 = vpop.f32.mrb[11].mxu1 }
 0x4f3   : > { %10926 = vmatmul.mubr.msk.f32.vlgmr.msra.gmra.mrb[8].mxu0 %vm2073_vm3, %v1989_v52 }
 0x4f4   : > { %10928 = vmatprep.mubr.msk.f32.mxu0 %vm2073_vm3, %v10899_v16 }
 0x4f7   : > { %v10903_v53 = vpop.f32.mrb[12].mxu1  ;;  %10929 = vmatmul.mubr.msk.f32.gmra.mrb[10].mxu0 %vm2073_vm3, %v10900_v51 }
 0x4f8   : > { %v2002_v54 = vpop.f32.mrb[13].mxu1 }
 0x4f9   : > { %v10904_v55 = vpop.f32.mrb[14].mxu1  ;;  %10931 = vmatprep.mubr.msk.f32.mxu0 %vm2073_vm3, %v2002_v54 }
 0x4fa   : > { %v2005_v56 = vpop.f32.mrb[15].mxu1 }
 0x4fb   : > { %10932 = vmatmul.mubr.msk.f32.gmra.mrb[12].mxu0 %vm2073_vm3, %v2005_v56  ;;  %v2833_v56 = vld [vmem:[%s15387_s7] sm:$0xff] }
 0x4fc   : > { %10934 = vmatprep.mubr.msk.f32.mxu0 %vm2073_vm3, %v10903_v53 }
 0x4ff   : > { %10935 = vmatmul.mubr.msk.f32.gmra.mrb[14].mxu0 %vm2073_vm3, %v10904_v55  ;;  %vm5490_vm3 = vcmp.eq.s32.totalorder %v13081_v9, 0 }
 0x500   : > { %10945 = vmatprep.mubr.msk.bf16.mxu0 %vm2280_vm6, %v12214_v39 }
 0x5c6   : > { %v10927_v60 = vpop.f32.mrb[8].mxu0 }
 0x5c7   : > { %v2174_v62 = vadd.f32 %v10927_v60, %v2041_v57  ;;  %v2168_v63 = vpop.f32.mrb[9].mxu0  ;;  %v2835_v57 = vld [vmem:[%s15387_s7 + $0x10] sm:$0xff]  ;;  %v2836_v60 = vld [vmem:[%s15387_s7 + $0x18] sm:$0xff] }
 0x5c8   : > { %v2169_v0 = vadd.f32 %v2168_v63, %v2036_v58  ;;  %v2834_v58 = vld [vmem:[%s15387_s7 + $0x8] sm:$0xff]  ;;  %v2840_v63 = vld [vmem:[%s15387_s7 + $0x38] sm:$0xff] }
 0x5c9   : > { %v2208_v2 = vmul.f32 0.01, %v2174_v62 }
 0x5ca   : > { %v2207_v3 = vmul.f32 0.01, %v2169_v0  ;;  %v10930_v4 = vpop.f32.mrb[10].mxu0 }
 0x5cb   : > { %v2216_v5 = vmax.f32 %v2174_v62, %v2208_v2  ;;  %v2184_v7 = vadd.f32 %v10930_v4, %v2051_v59  ;;  %v2178_v20 = vpop.f32.mrb[11].mxu0  ;;  %v2837_v59 = vld [vmem:[%s15387_s7 + $0x20] sm:$0xff]  ;;  %v2838_v62 = vld [vmem:[%s15387_s7 + $0x28] sm:$0xff] }
 0x5cc   : > { %v2215_v25 = vmax.f32 %v2169_v0, %v2207_v3  ;;  %v2179_v26 = vadd.f32 %v2178_v20, %v2046_v61  ;;  %v2839_v61 = vld [vmem:[%s15387_s7 + $0x30] sm:$0xff]  ;;  %s9254_s7 = scalar_lea.sflag [#allocation5], %s13039_s19 }
 0x5cd   : > { %v2210_v28 = vmul.f32 0.01, %v2184_v7  ;;  %v12217_v20 = vld [vmem:[#allocation9 + $0x38] sm:$0xff]  }
 0x5ce   : > { %v13358_v29 = vpack.c.bf16 %v2216_v5, %v2215_v25  ;;  %v2209_v30 = vmul.f32 0.01, %v2179_v26  ;;  %v10933_v31 = vpop.f32.mrb[12].mxu0  ;;  %v12215_v5 = vld [vmem:[#allocation9 + $0x28] sm:$0xff]  }
 0x5cf   : > { %v2218_v32 = vmax.f32 %v2184_v7, %v2210_v28  ;;  %v2194_v33 = vadd.f32 %v10933_v31, %v2061_v24  ;;  %v2188_v34 = vpop.f32.mrb[13].mxu0  ;;  %v12216_v7 = vld [vmem:[#allocation9 + $0x30] sm:$0xff]   ;;  %v12218_v24 = vld [vmem:[#allocation9] sm:$0xff]   ;;  %v12219_v25 = vld [vmem:[#allocation9 + $0x8] sm:$0xff]  }
 0x5d0   : > { %v2217_v35 = vmax.f32 %v2179_v26, %v2209_v30  ;;  %v2189_v37 = vadd.f32 %v2188_v34, %v2056_v27  ;;  %2268 = vrot.lane.b32.xlu1 %v13358_v29, %s15287_s0  ;;  %v12220_v27 = vld [vmem:[#allocation9 + $0x10] sm:$0xff]   ;;  %v12222_v31 = vld [vmem:[#allocation9 + $0x40] sm:$0xff]  }
 0x5d1   : > { %v2212_v38 = vmul.f32 0.01, %v2194_v33 }
 0x5d2   : > { %v13362_v41 = vpack.c.bf16 %v2218_v32, %v2217_v35  ;;  %v2211_v42 = vmul.f32 0.01, %v2189_v37  ;;  %v10936_v43 = vpop.f32.mrb[14].mxu0  ;;  %v12224_v35 = vld [vmem:[#allocation9 + $0x50] sm:$0xff]  }
 0x5d3   : > { %v2220_v45 = vmax.f32 %v2194_v33, %v2212_v38  ;;  %v2204_v46 = vadd.f32 %v10936_v43, %v2071_v40  ;;  %v2198_v47 = vpop.f32.mrb[15].mxu0  ;;  %v12223_v33 = vld [vmem:[#allocation9 + $0x48] sm:$0xff]   ;;  %v12225_v38 = vld [vmem:[#allocation9 + $0x58] sm:$0xff]   ;;  %v12226_v40 = vld [vmem:[#allocation9 + $0x60] sm:$0xff]  }
 0x5d4   : > { %v2219_v49 = vmax.f32 %v2189_v37, %v2211_v42  ;;  %v2199_v16 = vadd.f32 %v2198_v47, %v2066_v44  ;;  %2270 = vrot.lane.b32.xlu0 %v13362_v41, %s15287_s0  ;;  %v12227_v42 = vld [vmem:[#allocation9 + $0x68] sm:$0xff]   ;;  %v12228_v44 = vld [vmem:[#allocation9 + $0x70] sm:$0xff]  }
 0x5d5   : > { %v2214_v50 = vmul.f32 0.01, %v2204_v46 }
 0x5d6   : > { %v2225_v51 = vpack.c.bf16 %v2220_v45, %v2219_v49  ;;  %v2213_v52 = vmul.f32 0.01, %v2199_v16  ;;  %v12230_v49 = vld [vmem:[#allocation9 + $0x80] sm:$0xff]  }
 0x5d7   : > { %v2222_v53 = vmax.f32 %v2204_v46, %v2214_v50  ;;  %v12229_v46 = vld [vmem:[#allocation9 + $0x78] sm:$0xff]   ;;  %v12231_v50 = vld [vmem:[#allocation9 + $0x88] sm:$0xff]  }
 0x5d8   : > { %v2221_v54 = vmax.f32 %v2199_v16, %v2213_v52  ;;  %2272 = vrot.lane.b32.xlu1 %v2225_v51, %s15287_s0  ;;  %v12233_v52 = vld [vmem:[#allocation9 + $0x98] sm:$0xff]  }
 0x5da   : > { %v2226_v55 = vpack.c.bf16 %v2222_v53, %v2221_v54  ;;  %v9516_v53 = vsel %vm15388_vm7, 1.0, %v15298_v36  ;;  %vm5664_vm7 = vcmp.eq.s32.totalorder %v13081_v9, 1 }
 0x5db   : > { %11021 = vmatprep.subr.msk.mxu1 %vm2906_vm1, %v9516_v53 }
 0x5dc   : > { %2484 = vrot.lane.b32.xlu1 %v13358_v29, %s15386_s29  ;;  %2274 = vrot.lane.b32.xlu0 %v2226_v55, %s15287_s0  ;;  %s15394_s0 = smov 122  }
 0x5dd   : > { %11022 = vmatpush3.msk.msra.mxu1 %vm2906_vm1, %v9516_v53 }
 0x5e0   : > { %2488 = vrot.lane.b32.xlu1 %v2225_v51, %s15386_s29  ;;  %2486 = vrot.lane.b32.xlu0 %v13362_v41, %s15386_s29 }
 0x5e4   : > { %2610 = vrot.lane.b32.xlu1 %v13358_v29, %s15285_s28  ;;  %2490 = vrot.lane.b32.xlu0 %v2226_v55, %s15386_s29 }
 0x5e8   : > { %2614 = vrot.lane.b32.xlu1 %v2225_v51, %s15285_s28  ;;  %2612 = vrot.lane.b32.xlu0 %v13362_v41, %s15285_s28 }
 0x5ec   : > { %2736 = vrot.lane.b32.xlu1 %v13358_v29, %s15289_s6  ;;  %2616 = vrot.lane.b32.xlu0 %v2226_v55, %s15285_s28  ;;  %s12685_s28 = smov 123  }
 0x5f0   : > { %2740 = vrot.lane.b32.xlu1 %v2225_v51, %s15289_s6  ;;  %2738 = vrot.lane.b32.xlu0 %v13362_v41, %s15289_s6 }
 0x5f4   : > { %2843 = vperm.xlu1 %12183, %v2833_v56   ;;  %2742 = vrot.lane.b32.xlu0 %v2226_v55, %s15289_s6  ;;  %s15390_s6 = smov 127  }
 0x5f8   : > { %2853 = vperm.xlu1 %12183, %v2835_v57   ;;  %2848 = vperm.xlu0 %12182, %v2834_v58  }
 0x5fc   : > { %2863 = vperm.xlu1 %12183, %v2837_v59   ;;  %2858 = vperm.xlu0 %12182, %v2836_v60  }
 0x600   : > { %2873 = vperm.xlu1 %12183, %v2839_v61   ;;  %2868 = vperm.xlu0 %12182, %v2838_v62   ;;  %v12234_v61 = vld [vmem:[%s15389_s8] sm:$0xff]  }
 0x604   : > { %2878 = vperm.xlu0 %12182, %v2840_v63  }
 0x642   : > { %v2269_v0 = vpop.permute.xlu1 %2268 }
 0x643   : > { %10937 = vmatprep.subr.bf16.mxu0 %v2269_v0 }
 0x644   : > { %10938 = vmatpush3.bf16.msra.mxu0 %v2269_v0 }
 0x646   : > { %v2271_v2 = vpop.permute.xlu0 %2270 }
 0x647   : > { %10939 = vmatprep.subr.bf16.mxu0 %v2271_v2 }
 0x648   : > { %10940 = vmatpush3.bf16.msra.mxu0 %v2271_v2 }
 0x64a   : > { %v2273_v3 = vpop.permute.xlu1 %2272 }
 0x64b   : > { %10941 = vmatprep.subr.bf16.mxu0 %v2273_v3 }
 0x64c   : > { %10942 = vmatpush3.bf16.msra.mxu0 %v2273_v3 }
 0x64e   : > { %v2275_v4 = vpop.permute.xlu0 %2274  ;;  %v2485_v26 = vpop.permute.xlu1 %2484 }
 0x64f   : > { %10943 = vmatprep.subr.bf16.mxu0 %v2275_v4 }
 0x650   : > { %10944 = vmatpush3.bf16.msra.mxu0 %v2275_v4 }
 0x651   : > { %10953 = vmatprep.subr.bf16.mxu0 %v13358_v29 }
 0x652   : > { %v2487_v28 = vpop.permute.xlu0 %2486  ;;  %v2489_v30 = vpop.permute.xlu1 %2488 }
 0x653   : > { %10946 = vmatmul.mubr.msk.bf16.vlgmr.msra.gmra.mrb[16].mxu0 %vm2280_vm6, %v12215_v5 }
 0x654   : > { %10954 = vmatpush3.bf16.msra.mxu0 %v13358_v29  ;;  %10949 = vmatprep.mubr.msk.bf16.mxu0 %vm2280_vm6, %v12216_v7  ;;  %v12221_v29 = vld [vmem:[#allocation9 + $0x18] sm:$0xff]  }
 0x655   : > { %10955 = vmatprep.subr.bf16.mxu0 %v13362_v41 }
 0x656   : > { %v2491_v32 = vpop.permute.xlu0 %2490  ;;  %v2611_v34 = vpop.permute.xlu1 %2610 }
 0x658   : > { %10956 = vmatpush3.bf16.msra.mxu0 %v13362_v41 }
 0x659   : > { %10957 = vmatprep.subr.bf16.mxu0 %v2225_v51 }
 0x65a   : > { %v2613_v37 = vpop.permute.xlu0 %2612  ;;  %v2615_v39 = vpop.permute.xlu1 %2614 }
 0x65b   : > { %10950 = vmatmul.mubr.msk.bf16.gmra.mrb[20].mxu0 %vm2280_vm6, %v12217_v20 }
 0x65c   : > { %10958 = vmatpush3.bf16.msra.mxu0 %v2225_v51  ;;  %10961 = vmatprep.mubr.msk.bf16.mxu0 %vm2280_vm6, %v12218_v24  ;;  %v12232_v51 = vld [vmem:[#allocation9 + $0x90] sm:$0xff]  }
 0x65d   : > { %10959 = vmatprep.subr.bf16.mxu0 %v2226_v55 }
 0x65e   : > { %v2617_v41 = vpop.permute.xlu0 %2616  ;;  %v2737_v43 = vpop.permute.xlu1 %2736 }
 0x660   : > { %10960 = vmatpush3.bf16.msra.mxu0 %v2226_v55 }
 0x661   : > { %10969 = vmatprep.subr.bf16.mxu0 %v2485_v26 }
 0x662   : > { %v2739_v45 = vpop.permute.xlu0 %2738  ;;  %v2741_v47 = vpop.permute.xlu1 %2740 }
 0x663   : > { %10962 = vmatmul.mubr.msk.bf16.vlgmr.msra.gmra.mrb[16].mxu0 %vm2280_vm6, %v12219_v25 }
 0x664   : > { %10970 = vmatpush3.bf16.msra.mxu0 %v2485_v26  ;;  %10965 = vmatprep.mubr.msk.bf16.mxu0 %vm2280_vm6, %v12220_v27 }
 0x665   : > { %10971 = vmatprep.subr.bf16.mxu0 %v2487_v28 }
 0x666   : > { %v2743_v16 = vpop.permute.xlu0 %2742 }
 0x668   : > { %10972 = vmatpush3.bf16.msra.mxu0 %v2487_v28 }
 0x669   : > { %10973 = vmatprep.subr.bf16.mxu0 %v2489_v30 }
 0x66b   : > { %10966 = vmatmul.mubr.msk.bf16.gmra.mrb[20].mxu0 %vm2280_vm6, %v12221_v29 }
 0x66c   : > { %10974 = vmatpush3.bf16.msra.mxu0 %v2489_v30  ;;  %10977 = vmatprep.mubr.msk.bf16.mxu0 %vm2280_vm6, %v12222_v31 }
 0x66d   : > { %10975 = vmatprep.subr.bf16.mxu0 %v2491_v32 }
 0x670   : > { %10976 = vmatpush3.bf16.msra.mxu0 %v2491_v32 }
 0x671   : > { %10985 = vmatprep.subr.bf16.mxu0 %v2611_v34 }
 0x673   : > { %10978 = vmatmul.mubr.msk.bf16.vlgmr.msra.gmra.mrb[16].mxu0 %vm2280_vm6, %v12223_v33  ;;  %v2844_v63 = vpop.permute.xlu1 %2843 }
 0x674   : > { %10986 = vmatpush3.bf16.msra.mxu0 %v2611_v34  ;;  %10981 = vmatprep.mubr.msk.bf16.mxu0 %vm2280_vm6, %v12224_v35 }
 0x675   : > { %10987 = vmatprep.subr.bf16.mxu0 %v2613_v37 }
 0x677   : > { %v2849_v62 = vpop.permute.xlu0 %2848  ;;  %v2854_v3 = vpop.permute.xlu1 %2853 }
 0x678   : > { %10988 = vmatpush3.bf16.msra.mxu0 %v2613_v37 }
 0x679   : > { %10989 = vmatprep.subr.bf16.mxu0 %v2615_v39 }
 0x67b   : > { %10982 = vmatmul.mubr.msk.bf16.gmra.mrb[20].mxu0 %vm2280_vm6, %v12225_v38  ;;  %v2859_v0 = vpop.permute.xlu0 %2858  ;;  %v2864_v32 = vpop.permute.xlu1 %2863 }
 0x67c   : > { %10990 = vmatpush3.bf16.msra.mxu0 %v2615_v39  ;;  %10993 = vmatprep.mubr.msk.bf16.mxu0 %vm2280_vm6, %v12226_v40 }
 0x67d   : > { %10991 = vmatprep.subr.bf16.mxu0 %v2617_v41 }
 0x67f   : > { %v2869_v29 = vpop.permute.xlu0 %2868 }
 0x680   : > { %10992 = vmatpush3.bf16.msra.mxu0 %v2617_v41 }
 0x681   : > { %11001 = vmatprep.subr.bf16.mxu0 %v2737_v43 }
 0x683   : > { %10994 = vmatmul.mubr.msk.bf16.vlgmr.msra.gmra.mrb[16].mxu0 %vm2280_vm6, %v12227_v42 }
 0x684   : > { %11002 = vmatpush3.bf16.msra.mxu0 %v2737_v43  ;;  %10997 = vmatprep.mubr.msk.bf16.mxu0 %vm2280_vm6, %v12228_v44  ;;  %v2879_v44 = vpop.permute.xlu0 %2878 }
 0x685   : > { %11003 = vmatprep.subr.bf16.mxu0 %v2739_v45 }
 0x688   : > { %11004 = vmatpush3.bf16.msra.mxu0 %v2739_v45 }
 0x689   : > { %11005 = vmatprep.subr.bf16.mxu0 %v2741_v47 }
 0x68b   : > { %10998 = vmatmul.mubr.msk.bf16.gmra.mrb[20].mxu0 %vm2280_vm6, %v12229_v46 }
 0x68c   : > { %11006 = vmatpush3.bf16.msra.mxu0 %v2741_v47  ;;  %11009 = vmatprep.mubr.msk.bf16.mxu0 %vm2280_vm6, %v12230_v49  ;;  %v2874_v49 = vpop.permute.xlu1 %2873 }
 0x68d   : > { %11007 = vmatprep.subr.bf16.mxu0 %v2743_v16 }
 0x690   : > { %11008 = vmatpush3.bf16.msra.mxu0 %v2743_v16 }
 0x693   : > { %11010 = vmatmul.mubr.msk.bf16.vlgmr.msra.gmra.mrb[16].mxu0 %vm2280_vm6, %v12231_v50 }
 0x694   : > { %11013 = vmatprep.mubr.msk.bf16.mxu0 %vm2280_vm6, %v12232_v51 }
 0x69b   : > { %11014 = vmatmul.mubr.msk.bf16.gmra.mrb[20].mxu0 %vm2280_vm6, %v12233_v52 }
 0x766   : > { %v11011_v54 = vpop.f32.mrb[16].mxu0 }
 0x767   : > { %v2794_v55 = vpop.f32.mrb[17].mxu0 }
 0x768   : > { %v11012_v56 = vpop.f32.mrb[18].mxu0  ;;  %11023 = vmatprep.mubr.msk.f32.mxu1 %vm2881_vm12, %v2794_v55 }
 0x769   : > { %v2797_v57 = vpop.f32.mrb[19].mxu0 }
 0x76a   : > { %11024 = vmatmul.mubr.msk.f32.vlgmr.msra.gmra.mrb[16].mxu1 %vm2881_vm12, %v2797_v57 }
 0x76b   : > { %11026 = vmatprep.mubr.msk.f32.mxu1 %vm2881_vm12, %v11011_v54 }
 0x76e   : > { %v11015_v58 = vpop.f32.mrb[20].mxu0  ;;  %11027 = vmatmul.mubr.msk.f32.gmra.mrb[18].mxu1 %vm2881_vm12, %v11012_v56 }
 0x76f   : > { %v2810_v11 = vpop.f32.mrb[21].mxu0 }
 0x770   : > { %v11016_v59 = vpop.f32.mrb[22].mxu0  ;;  %11029 = vmatprep.mubr.msk.f32.mxu1 %vm2881_vm12, %v2810_v11 }
 0x771   : > { %v2813_v60 = vpop.f32.mrb[23].mxu0 }
 0x772   : > { %11030 = vmatmul.mubr.msk.f32.gmra.mrb[20].mxu1 %vm2881_vm12, %v2813_v60  ;;  %v12236_v60 = vld [vmem:[%s15389_s8 + $0x10] sm:$0xff]  }
 0x773   : > { %11032 = vmatprep.mubr.msk.f32.mxu1 %vm2881_vm12, %v11015_v58 }
 0x776   : > { %11033 = vmatmul.mubr.msk.f32.gmra.mrb[22].mxu1 %vm2881_vm12, %v11016_v59  ;;  %v12235_v59 = vld [vmem:[%s15389_s8 + $0x8] sm:$0xff]   ;;  %vm5838_vm12 = vcmp.eq.s32.totalorder %v13081_v9, 2 }
 0x777   : > { %11043 = vmatprep.mubr.msk.bf16.mxu1 %vm2280_vm6, %v12234_v61  ;;  %v12237_v61 = vld [vmem:[%s15389_s8 + $0x18] sm:$0xff]  }
 0x83d   : > { %v11025_v2 = vpop.f32.mrb[16].mxu1 }
 0x83e   : > { %v2982_v4 = vadd.f32 %v11025_v2, %v2849_v62  ;;  %v2976_v5 = vpop.f32.mrb[17].mxu1  ;;  %v12238_v62 = vld [vmem:[%s15389_s8 + $0x20] sm:$0xff]   ;;  %v12241_v2 = vld [vmem:[%s15389_s8 + $0x38] sm:$0xff]  }
 0x83f   : > { %v2977_v7 = vadd.f32 %v2976_v5, %v2844_v63  ;;  %v12239_v63 = vld [vmem:[%s15389_s8 + $0x28] sm:$0xff]  }
 0x840   : > { %v3016_v20 = vmul.f32 0.01, %v2982_v4 }
 0x841   : > { %v3015_v24 = vmul.f32 0.01, %v2977_v7  ;;  %v11028_v25 = vpop.f32.mrb[18].mxu1 }
 0x842   : > { %v3024_v26 = vmax.f32 %v2982_v4, %v3016_v20  ;;  %v2992_v27 = vadd.f32 %v11028_v25, %v2859_v0  ;;  %v2986_v28 = vpop.f32.mrb[19].mxu1  ;;  %v12240_v0 = vld [vmem:[%s15389_s8 + $0x30] sm:$0xff]  }
 0x843   : > { %v3023_v30 = vmax.f32 %v2977_v7, %v3015_v24  ;;  %v2987_v31 = vadd.f32 %v2986_v28, %v2854_v3  ;;  %v12242_v3 = vld [vmem:[%s15389_s8 + $0x40] sm:$0xff]   ;;  %v12243_v24 = vld [vmem:[%s15389_s8 + $0x48] sm:$0xff]   ;;  %v12245_v28 = vld [vmem:[%s15389_s8 + $0x58] sm:$0xff]  }
 0x844   : > { %v3018_v33 = vmul.f32 0.01, %v2992_v27 }
 0x845   : > { %v13452_v34 = vpack.c.bf16 %v3024_v26, %v3023_v30  ;;  %v3017_v35 = vmul.f32 0.01, %v2987_v31  ;;  %v11031_v37 = vpop.f32.mrb[20].mxu1  ;;  %v12244_v26 = vld [vmem:[%s15389_s8 + $0x50] sm:$0xff]   ;;  %v12246_v30 = vld [vmem:[%s15389_s8 + $0x60] sm:$0xff]  }
 0x846   : > { %v3026_v38 = vmax.f32 %v2992_v27, %v3018_v33  ;;  %v3002_v39 = vadd.f32 %v11031_v37, %v2869_v29  ;;  %v2996_v40 = vpop.f32.mrb[21].mxu1  ;;  %v12250_v37 = vld [vmem:[%s15389_s8 + $0x80] sm:$0xff]  }
 0x847   : > { %v3025_v41 = vmax.f32 %v2987_v31, %v3017_v35  ;;  %v2997_v42 = vadd.f32 %v2996_v40, %v2864_v32  ;;  %3305 = vrot.lane.b32.xlu1 %v13452_v34, %s15390_s6  ;;  %11035 = vmatprep.subr.bf16.mxu1 %v13452_v34  ;;  %v12247_v32 = vld [vmem:[%s15389_s8 + $0x68] sm:$0xff]   ;;  %v12249_v35 = vld [vmem:[%s15389_s8 + $0x78] sm:$0xff]  }
 0x848   : > { %v3020_v43 = vmul.f32 0.01, %v3002_v39  ;;  %11036 = vmatpush3.bf16.msra.mxu1 %v13452_v34 }
 0x849   : > { %v13458_v45 = vpack.c.bf16 %v3026_v38, %v3025_v41  ;;  %v3019_v46 = vmul.f32 0.01, %v2997_v42  ;;  %v11034_v47 = vpop.f32.mrb[22].mxu1  ;;  %v12251_v38 = vld [vmem:[%s15389_s8 + $0x88] sm:$0xff]   ;;  %v12253_v41 = vld [vmem:[%s15389_s8 + $0x98] sm:$0xff]  }
 0x84a   : > { %v3028_v16 = vmax.f32 %v3002_v39, %v3020_v43  ;;  %v3012_v50 = vadd.f32 %v11034_v47, %v2879_v44  ;;  %v3006_v51 = vpop.f32.mrb[23].mxu1  ;;  %v12252_v39 = vld [vmem:[%s15389_s8 + $0x90] sm:$0xff]   ;;  %v12254_v43 = vld [vmem:[%s15389_s8 + $0xa0] sm:$0xff]  }
 0x84b   : > { %v3027_v52 = vmax.f32 %v2997_v42, %v3019_v46  ;;  %v3007_v53 = vadd.f32 %v3006_v51, %v2874_v49  ;;  %3307 = vrot.lane.b32.xlu0 %v13458_v45, %s15390_s6  ;;  %11037 = vmatprep.subr.bf16.mxu1 %v13458_v45  ;;  %v12256_v47 = vld [vmem:[%s15389_s8 + $0xb0] sm:$0xff]   ;;  %v12257_v49 = vld [vmem:[%s15389_s8 + $0xb8] sm:$0xff]  }
 0x84c   : > { %v3022_v54 = vmul.f32 0.01, %v3012_v50  ;;  %11038 = vmatpush3.bf16.msra.mxu1 %v13458_v45  ;;  %v12260_v51 = vld [vmem:[%s15389_s8 + $0xd0] sm:$0xff]  }
 0x84d   : > { %v13464_v55 = vpack.c.bf16 %v3028_v16, %v3027_v52  ;;  %v3021_v56 = vmul.f32 0.01, %v3007_v53  ;;  %v12258_v16 = vld [vmem:[%s15389_s8 + $0xc0] sm:$0xff]  }
 0x84e   : > { %v3030_v57 = vmax.f32 %v3012_v50, %v3022_v54  ;;  %v12259_v50 = vld [vmem:[%s15389_s8 + $0xc8] sm:$0xff]  }
 0x84f   : > { %v3029_v58 = vmax.f32 %v3007_v53, %v3021_v56  ;;  %3309 = vrot.lane.b32.xlu1 %v13464_v55, %s15390_s6  ;;  %11039 = vmatprep.subr.bf16.mxu1 %v13464_v55  ;;  %v12261_v53 = vld [vmem:[%s15389_s8 + $0xd8] sm:$0xff]  }
 0x850   : > { %11040 = vmatpush3.bf16.msra.mxu1 %v13464_v55 }
 0x851   : > { %v3034_v11 = vpack.c.bf16 %v3030_v57, %v3029_v58  ;;  %v12263_v57 = vld [vmem:[%s15389_s8 + $0xe8] sm:$0xff]  }
 0x853   : > { %3511 = vrot.lane.b32.xlu1 %v13452_v34, %s15391_s27  ;;  %3311 = vrot.lane.b32.xlu0 %v3034_v11, %s15390_s6 }
 0x854   : > { %11041 = vmatprep.subr.bf16.mxu1 %v3034_v11 }
 0x855   : > { %11042 = vmatpush3.bf16.msra.mxu1 %v3034_v11 }
 0x857   : > { %3515 = vrot.lane.b32.xlu1 %v13464_v55, %s15391_s27  ;;  %3513 = vrot.lane.b32.xlu0 %v13458_v45, %s15391_s27 }
 0x858   : > { %11044 = vmatmul.mubr.msk.bf16.vlgmr.msra.gmra.mrb[24].mxu1 %vm2280_vm6, %v12235_v59  ;;  %v12265_v59 = vld [vmem:[%s15389_s8 + $0xf8] sm:$0xff]  }
 0x859   : > { %11047 = vmatprep.mubr.msk.bf16.mxu1 %vm2280_vm6, %v12236_v60  ;;  %v12266_v60 = vld [vmem:[%s15389_s8 + $0x100] sm:$0xff]  }
 0x85b   : > { %3717 = vrot.lane.b32.xlu1 %v13452_v34, %s15392_s11  ;;  %3517 = vrot.lane.b32.xlu0 %v3034_v11, %s15391_s27 }
 0x85f   : > { %3721 = vrot.lane.b32.xlu1 %v13464_v55, %s15392_s11  ;;  %3719 = vrot.lane.b32.xlu0 %v13458_v45, %s15392_s11 }
 0x860   : > { %11048 = vmatmul.mubr.msk.bf16.gmra.mrb[28].mxu1 %vm2280_vm6, %v12237_v61  ;;  %v12267_v61 = vld [vmem:[%s15389_s8 + $0x108] sm:$0xff]  }
 0x861   : > { %11051 = vmatprep.mubr.msk.bf16.mxu1 %vm2280_vm6, %v12238_v62  ;;  %v12268_v62 = vld [vmem:[%s15389_s8 + $0x110] sm:$0xff]  }
 0x863   : > { %3923 = vrot.lane.b32.xlu1 %v13452_v34, %s15393_s13  ;;  %3723 = vrot.lane.b32.xlu0 %v3034_v11, %s15392_s11 }
 0x867   : > { %3927 = vrot.lane.b32.xlu1 %v13464_v55, %s15393_s13  ;;  %3925 = vrot.lane.b32.xlu0 %v13458_v45, %s15393_s13 }
 0x868   : > { %11052 = vmatmul.mubr.msk.bf16.gmra.mrb[32].mxu1 %vm2280_vm6, %v12239_v63 }
 0x869   : > { %11055 = vmatprep.mubr.msk.bf16.mxu1 %vm2280_vm6, %v12240_v0  ;;  %v12269_v0 = vld [vmem:[%s15389_s8 + $0x118] sm:$0xff]  }
 0x86b   : > { %4129 = vrot.lane.b32.xlu1 %v13452_v34, %s12685_s28  ;;  %3929 = vrot.lane.b32.xlu0 %v3034_v11, %s15393_s13 }
 0x86f   : > { %4133 = vrot.lane.b32.xlu1 %v13464_v55, %s12685_s28  ;;  %4131 = vrot.lane.b32.xlu0 %v13458_v45, %s12685_s28 }
 0x870   : > { %11056 = vmatmul.mubr.msk.bf16.gmra.mrb[36].mxu1 %vm2280_vm6, %v12241_v2 }
 0x871   : > { %11067 = vmatprep.mubr.msk.bf16.mxu1 %vm2280_vm6, %v12242_v3  ;;  %v12270_v3 = vld [vmem:[%s15389_s8 + $0x120] sm:$0xff]  }
 0x873   : > { %4335 = vrot.lane.b32.xlu1 %v13452_v34, %s15394_s0  ;;  %4135 = vrot.lane.b32.xlu0 %v3034_v11, %s12685_s28  ;;  %s12687_s28 = smov 119  }
 0x877   : > { %4339 = vrot.lane.b32.xlu1 %v13464_v55, %s15394_s0  ;;  %4337 = vrot.lane.b32.xlu0 %v13458_v45, %s15394_s0 }
 0x87b   : > { %4541 = vrot.lane.b32.xlu1 %v13452_v34, %s12686_s30  ;;  %4341 = vrot.lane.b32.xlu0 %v3034_v11, %s15394_s0 }
 0x87f   : > { %4545 = vrot.lane.b32.xlu1 %v13464_v55, %s12686_s30  ;;  %4543 = vrot.lane.b32.xlu0 %v13458_v45, %s12686_s30 }
 0x883   : > { %4747 = vrot.lane.b32.xlu1 %v13452_v34, %s15386_s29  ;;  %4547 = vrot.lane.b32.xlu0 %v3034_v11, %s12686_s30  ;;  %s752_s30 = scalar_select %p751_p7, %s12820_s26, 1 }
 0x887   : > { %4751 = vrot.lane.b32.xlu1 %v13464_v55, %s15386_s29  ;;  %4749 = vrot.lane.b32.xlu0 %v13458_v45, %s15386_s29 }
 0x88b   : > { %4953 = vrot.lane.b32.xlu1 %v13452_v34, %s12687_s28  ;;  %4753 = vrot.lane.b32.xlu0 %v3034_v11, %s15386_s29 }
 0x88f   : > { %4957 = vrot.lane.b32.xlu1 %v13464_v55, %s12687_s28  ;;  %4955 = vrot.lane.b32.xlu0 %v13458_v45, %s12687_s28 }
 0x893   : > { %5159 = vrot.lane.b32.xlu1 %v13452_v34, %s12688_s3  ;;  %4959 = vrot.lane.b32.xlu0 %v3034_v11, %s12687_s28  ;;  %v12248_v34 = vld [vmem:[%s15389_s8 + $0x70] sm:$0xff]   ;;  %s13873_s28 = sshll.u32 %s752_s30, 6 }
 0x894   : > { %s13885_s18 = scalar_lea.vmem %s15395_s14, %s13873_s28  ;;  %s13955_s30 = scalar_lea.vmem %s15396_s20, %s13873_s28 }
 0x895   : > { %s15461_s14 = smov 112   ;;  %s15470_s20 = sld [smem:[#allocation74_spill]] }
 0x897   : > { %5163 = vrot.lane.b32.xlu1 %v13464_v55, %s12688_s3  ;;  %5161 = vrot.lane.b32.xlu0 %v13458_v45, %s12688_s3  ;;  %v12255_v45 = vld [vmem:[%s15389_s8 + $0xa8] sm:$0xff]   ;;  %v12262_v55 = vld [vmem:[%s15389_s8 + $0xe0] sm:$0xff]  }
 0x89b   : > { %5165 = vrot.lane.b32.xlu0 %v3034_v11, %s12688_s3  ;;  %v12264_v11 = vld [vmem:[%s15389_s8 + $0xf0] sm:$0xff]  }
 0x8b9   : > { %v3306_v4 = vpop.permute.xlu1 %3305 }
 0x8ba   : > { %11059 = vmatprep.subr.bf16.mxu1 %v3306_v4 }
 0x8bb   : > { %11060 = vmatpush3.bf16.msra.mxu1 %v3306_v4 }
 0x8bd   : > { %v3308_v5 = vpop.permute.xlu0 %3307 }
 0x8be   : > { %11061 = vmatprep.subr.bf16.mxu1 %v3308_v5 }
 0x8bf   : > { %11062 = vmatpush3.bf16.msra.mxu1 %v3308_v5  ;;  %v12271_v5 = vld [vmem:[%s15389_s8 + $0x128] sm:$0xff]  }
 0x8c1   : > { %v3310_v7 = vpop.permute.xlu1 %3309 }
 0x8c2   : > { %11063 = vmatprep.subr.bf16.mxu1 %v3310_v7 }
 0x8c3   : > { %11064 = vmatpush3.bf16.msra.mxu1 %v3310_v7 }
 0x8c5   : > { %v3312_v20 = vpop.permute.xlu0 %3311  ;;  %v3512_v25 = vpop.permute.xlu1 %3511 }
 0x8c6   : > { %11065 = vmatprep.subr.bf16.mxu1 %v3312_v20 }
 0x8c7   : > { %11066 = vmatpush3.bf16.msra.mxu1 %v3312_v20  ;;  %v12272_v20 = vld [vmem:[%s15389_s8 + $0x130] sm:$0xff]  }
 0x8c8   : > { %11083 = vmatprep.subr.bf16.mxu1 %v3512_v25 }
 0x8c9   : > { %v3514_v27 = vpop.permute.xlu0 %3513  ;;  %v3516_v29 = vpop.permute.xlu1 %3515 }
 0x8ca   : > { %11068 = vmatmul.mubr.msk.bf16.vlgmr.msra.gmra.mrb[24].mxu1 %vm2280_vm6, %v12243_v24  ;;  %v12273_v24 = vld [vmem:[%s15389_s8 + $0x138] sm:$0xff]  }
 0x8cb   : > { %11084 = vmatpush3.bf16.msra.mxu1 %v3512_v25  ;;  %11071 = vmatprep.mubr.msk.bf16.mxu1 %vm2280_vm6, %v12244_v26  ;;  %v12274_v25 = vld [vmem:[%s15389_s8 + $0x140] sm:$0xff]   ;;  %v12275_v26 = vld [vmem:[%s15389_s8 + $0x148] sm:$0xff]  }
 0x8cc   : > { %11085 = vmatprep.subr.bf16.mxu1 %v3514_v27 }
 0x8cd   : > { %v3518_v31 = vpop.permute.xlu0 %3517  ;;  %v3718_v33 = vpop.permute.xlu1 %3717 }
 0x8cf   : > { %11086 = vmatpush3.bf16.msra.mxu1 %v3514_v27  ;;  %v12276_v27 = vld [vmem:[%s15389_s8 + $0x150] sm:$0xff]  }
 0x8d0   : > { %11087 = vmatprep.subr.bf16.mxu1 %v3516_v29 }
 0x8d1   : > { %v3720_v40 = vpop.permute.xlu0 %3719  ;;  %v3722_v42 = vpop.permute.xlu1 %3721 }
 0x8d2   : > { %11072 = vmatmul.mubr.msk.bf16.gmra.mrb[28].mxu1 %vm2280_vm6, %v12245_v28 }
 0x8d3   : > { %11088 = vmatpush3.bf16.msra.mxu1 %v3516_v29  ;;  %11075 = vmatprep.mubr.msk.bf16.mxu1 %vm2280_vm6, %v12246_v30  ;;  %v12277_v29 = vld [vmem:[%s15389_s8 + $0x158] sm:$0xff]  }
 0x8d4   : > { %11089 = vmatprep.subr.bf16.mxu1 %v3518_v31 }
 0x8d5   : > { %v3724_v44 = vpop.permute.xlu0 %3723  ;;  %v3924_v46 = vpop.permute.xlu1 %3923 }
 0x8d7   : > { %11090 = vmatpush3.bf16.msra.mxu1 %v3518_v31  ;;  %v12278_v31 = vld [vmem:[%s15389_s8 + $0x160] sm:$0xff]  }
 0x8d8   : > { %11107 = vmatprep.subr.bf16.mxu1 %v3718_v33 }
 0x8d9   : > { %v3926_v52 = vpop.permute.xlu0 %3925  ;;  %v3928_v54 = vpop.permute.xlu1 %3927 }
 0x8da   : > { %11076 = vmatmul.mubr.msk.bf16.gmra.mrb[32].mxu1 %vm2280_vm6, %v12247_v32 }
 0x8db   : > { %11079 = vmatprep.mubr.msk.bf16.mxu1 %vm2280_vm6, %v12248_v34 }
 0x8dd   : > { %v3930_v56 = vpop.permute.xlu0 %3929  ;;  %v4130_v58 = vpop.permute.xlu1 %4129 }
 0x8e1   : > { %v4132_v63 = vpop.permute.xlu0 %4131  ;;  %v4134_v2 = vpop.permute.xlu1 %4133 }
 0x8e2   : > { %11080 = vmatmul.mubr.msk.bf16.gmra.mrb[36].mxu1 %vm2280_vm6, %v12249_v35  ;;  %v12280_v35 = vld [vmem:[%s15389_s8 + $0x170] sm:$0xff]  }
 0x8e3   : > { %11091 = vmatprep.mubr.msk.bf16.mxu1 %vm2280_vm6, %v12250_v37  ;;  %v12281_v37 = vld [vmem:[%s15389_s8 + $0x178] sm:$0xff]  }
 0x8e5   : > { %v4136_v4 = vpop.permute.xlu0 %4135  ;;  %v4336_v7 = vpop.permute.xlu1 %4335 }
 0x8e9   : > { %v4338_v28 = vpop.permute.xlu0 %4337  ;;  %v4340_v30 = vpop.permute.xlu1 %4339 }
 0x8ea   : > { %11092 = vmatmul.mubr.msk.bf16.vlgmr.msra.gmra.mrb[24].mxu1 %vm2280_vm6, %v12251_v38  ;;  %v12282_v38 = vld [vmem:[%s15389_s8 + $0x180] sm:$0xff]  }
 0x8eb   : > { %11108 = vmatpush3.bf16.msra.mxu1 %v3718_v33  ;;  %11095 = vmatprep.mubr.msk.bf16.mxu1 %vm2280_vm6, %v12252_v39  ;;  %v12279_v33 = vld [vmem:[%s15389_s8 + $0x168] sm:$0xff]  }
 0x8ec   : > { %11109 = vmatprep.subr.bf16.mxu1 %v3720_v40  ;;  %v12283_v39 = vld [vmem:[%s15389_s8 + $0x188] sm:$0xff]  }
 0x8ed   : > { %v4342_v32 = vpop.permute.xlu0 %4341  ;;  %v4542_v34 = vpop.permute.xlu1 %4541 }
 0x8ef   : > { %11110 = vmatpush3.bf16.msra.mxu1 %v3720_v40  ;;  %v12284_v40 = vld [vmem:[%s15389_s8 + $0x190] sm:$0xff]  }
 0x8f0   : > { %11111 = vmatprep.subr.bf16.mxu1 %v3722_v42 }
 0x8f2   : > { %11096 = vmatmul.mubr.msk.bf16.gmra.mrb[28].mxu1 %vm2280_vm6, %v12253_v41  ;;  %v4544_v41 = vpop.permute.xlu0 %4543 }
 0x8f3   : > { %11112 = vmatpush3.bf16.msra.mxu1 %v3722_v42  ;;  %11099 = vmatprep.mubr.msk.bf16.mxu1 %vm2280_vm6, %v12254_v43  ;;  %v12285_v42 = vld [vmem:[%s15389_s8 + $0x198] sm:$0xff]   ;;  %v4546_v43 = vpop.permute.xlu1 %4545 }
 0x8f4   : > { %11113 = vmatprep.subr.bf16.mxu1 %v3724_v44 }
 0x8f7   : > { %11114 = vmatpush3.bf16.msra.mxu1 %v3724_v44  ;;  %v12286_v44 = vld [vmem:[%s15389_s8 + $0x1a0] sm:$0xff]  }
 0x8f8   : > { %11131 = vmatprep.subr.bf16.mxu1 %v3924_v46 }
 0x8fa   : > { %11100 = vmatmul.mubr.msk.bf16.gmra.mrb[32].mxu1 %vm2280_vm6, %v12255_v45  ;;  %v4548_v45 = vpop.permute.xlu0 %4547 }
 0x8fb   : > { %11103 = vmatprep.mubr.msk.bf16.mxu1 %vm2280_vm6, %v12256_v47  ;;  %v4748_v47 = vpop.permute.xlu1 %4747 }
 0x902   : > { %11104 = vmatmul.mubr.msk.bf16.gmra.mrb[36].mxu1 %vm2280_vm6, %v12257_v49  ;;  %v12288_v49 = vld [vmem:[%s15389_s8 + $0x1b0] sm:$0xff]  }
 0x903   : > { %11115 = vmatprep.mubr.msk.bf16.mxu1 %vm2280_vm6, %v12258_v16  ;;  %v12289_v16 = vld [vmem:[%s15389_s8 + $0x1b8] sm:$0xff]  }
 0x90a   : > { %11116 = vmatmul.mubr.msk.bf16.vlgmr.msra.gmra.mrb[24].mxu1 %vm2280_vm6, %v12259_v50  ;;  %v12290_v50 = vld [vmem:[%s15389_s8 + $0x1c0] sm:$0xff]  }
 0x90b   : > { %11132 = vmatpush3.bf16.msra.mxu1 %v3924_v46  ;;  %11119 = vmatprep.mubr.msk.bf16.mxu1 %vm2280_vm6, %v12260_v51  ;;  %v12287_v46 = vld [vmem:[%s15389_s8 + $0x1a8] sm:$0xff]  }
 0x90c   : > { %11133 = vmatprep.subr.bf16.mxu1 %v3926_v52  ;;  %v12291_v51 = vld [vmem:[%s15389_s8 + $0x1c8] sm:$0xff]  }
 0x90f   : > { %11134 = vmatpush3.bf16.msra.mxu1 %v3926_v52  ;;  %v12292_v52 = vld [vmem:[%s15389_s8 + $0x1d0] sm:$0xff]  }
 0x910   : > { %11135 = vmatprep.subr.bf16.mxu1 %v3928_v54 }
 0x912   : > { %11120 = vmatmul.mubr.msk.bf16.gmra.mrb[28].mxu1 %vm2280_vm6, %v12261_v53  ;;  %v4750_v53 = vpop.permute.xlu0 %4749 }
 0x913   : > { %11136 = vmatpush3.bf16.msra.mxu1 %v3928_v54  ;;  %11123 = vmatprep.mubr.msk.bf16.mxu1 %vm2280_vm6, %v12262_v55  ;;  %v12293_v54 = vld [vmem:[%s15389_s8 + $0x1d8] sm:$0xff]   ;;  %v4752_v55 = vpop.permute.xlu1 %4751 }
 0x914   : > { %11137 = vmatprep.subr.bf16.mxu1 %v3930_v56 }
 0x917   : > { %11138 = vmatpush3.bf16.msra.mxu1 %v3930_v56  ;;  %v12294_v56 = vld [vmem:[%s15389_s8 + $0x1e0] sm:$0xff]  }
 0x918   : > { %11155 = vmatprep.subr.bf16.mxu1 %v4130_v58 }
 0x91a   : > { %11124 = vmatmul.mubr.msk.bf16.gmra.mrb[32].mxu1 %vm2280_vm6, %v12263_v57  ;;  %v4754_v57 = vpop.permute.xlu0 %4753 }
 0x91b   : > { %11127 = vmatprep.mubr.msk.bf16.mxu1 %vm2280_vm6, %v12264_v11  ;;  %v4954_v11 = vpop.permute.xlu1 %4953 }
 0x922   : > { %11128 = vmatmul.mubr.msk.bf16.gmra.mrb[36].mxu1 %vm2280_vm6, %v12265_v59  ;;  %v12296_v59 = vld [vmem:[%s15389_s8 + $0x1f0] sm:$0xff]  }
 0x923   : > { %11139 = vmatprep.mubr.msk.bf16.mxu1 %vm2280_vm6, %v12266_v60  ;;  %v12297_v60 = vld [vmem:[%s15389_s8 + $0x1f8] sm:$0xff]  }
 0x92a   : > { %11140 = vmatmul.mubr.msk.bf16.vlgmr.msra.gmra.mrb[24].mxu1 %vm2280_vm6, %v12267_v61  ;;  %v12298_v61 = vld [vmem:[%s15389_s8 + $0x200] sm:$0xff]  }
 0x92b   : > { %11156 = vmatpush3.bf16.msra.mxu1 %v4130_v58  ;;  %11143 = vmatprep.mubr.msk.bf16.mxu1 %vm2280_vm6, %v12268_v62  ;;  %v12295_v58 = vld [vmem:[%s15389_s8 + $0x1e8] sm:$0xff]  }
 0x92c   : > { %11157 = vmatprep.subr.bf16.mxu1 %v4132_v63  ;;  %v12299_v62 = vld [vmem:[%s15389_s8 + $0x208] sm:$0xff]  }
 0x92f   : > { %11158 = vmatpush3.bf16.msra.mxu1 %v4132_v63  ;;  %v12300_v63 = vld [vmem:[%s15389_s8 + $0x210] sm:$0xff]  }
 0x930   : > { %11159 = vmatprep.subr.bf16.mxu1 %v4134_v2 }
 0x932   : > { %11144 = vmatmul.mubr.msk.bf16.gmra.mrb[28].mxu1 %vm2280_vm6, %v12269_v0  ;;  %v4956_v0 = vpop.permute.xlu0 %4955 }
 0x933   : > { %11160 = vmatpush3.bf16.msra.mxu1 %v4134_v2  ;;  %11147 = vmatprep.mubr.msk.bf16.mxu1 %vm2280_vm6, %v12270_v3  ;;  %v12301_v2 = vld [vmem:[%s15389_s8 + $0x218] sm:$0xff]   ;;  %v4958_v3 = vpop.permute.xlu1 %4957 }
 0x934   : > { %11161 = vmatprep.subr.bf16.mxu1 %v4136_v4 }
 0x937   : > { %11162 = vmatpush3.bf16.msra.mxu1 %v4136_v4  ;;  %v12302_v4 = vld [vmem:[%s15389_s8 + $0x220] sm:$0xff]  }
 0x938   : > { %11179 = vmatprep.subr.bf16.mxu1 %v4336_v7 }
 0x93a   : > { %11148 = vmatmul.mubr.msk.bf16.gmra.mrb[32].mxu1 %vm2280_vm6, %v12271_v5  ;;  %v4960_v5 = vpop.permute.xlu0 %4959 }
 0x93b   : > { %11151 = vmatprep.mubr.msk.bf16.mxu1 %vm2280_vm6, %v12272_v20  ;;  %v5160_v20 = vpop.permute.xlu1 %5159 }
 0x942   : > { %11152 = vmatmul.mubr.msk.bf16.gmra.mrb[36].mxu1 %vm2280_vm6, %v12273_v24  ;;  %v12304_v24 = vld [vmem:[%s15389_s8 + $0x230] sm:$0xff]  }
 0x943   : > { %11163 = vmatprep.mubr.msk.bf16.mxu1 %vm2280_vm6, %v12274_v25  ;;  %v12305_v25 = vld [vmem:[%s15389_s8 + $0x238] sm:$0xff]  }
 0x94a   : > { %11164 = vmatmul.mubr.msk.bf16.vlgmr.msra.gmra.mrb[24].mxu1 %vm2280_vm6, %v12275_v26  ;;  %v12306_v26 = vld [vmem:[%s15389_s8 + $0x240] sm:$0xff]  }
 0x94b   : > { %11180 = vmatpush3.bf16.msra.mxu1 %v4336_v7  ;;  %11167 = vmatprep.mubr.msk.bf16.mxu1 %vm2280_vm6, %v12276_v27  ;;  %v12303_v7 = vld [vmem:[%s15389_s8 + $0x228] sm:$0xff]  }
 0x94c   : > { %11181 = vmatprep.subr.bf16.mxu1 %v4338_v28  ;;  %v12307_v27 = vld [vmem:[%s15389_s8 + $0x248] sm:$0xff]  }
 0x94f   : > { %11182 = vmatpush3.bf16.msra.mxu1 %v4338_v28  ;;  %v12308_v28 = vld [vmem:[%s15389_s8 + $0x250] sm:$0xff]  }
 0x950   : > { %11183 = vmatprep.subr.bf16.mxu1 %v4340_v30 }
 0x952   : > { %11168 = vmatmul.mubr.msk.bf16.gmra.mrb[28].mxu1 %vm2280_vm6, %v12277_v29  ;;  %v5162_v29 = vpop.permute.xlu0 %5161 }
 0x953   : > { %11184 = vmatpush3.bf16.msra.mxu1 %v4340_v30  ;;  %11171 = vmatprep.mubr.msk.bf16.mxu1 %vm2280_vm6, %v12278_v31  ;;  %v12309_v30 = vld [vmem:[%s15389_s8 + $0x258] sm:$0xff]   ;;  %v5164_v31 = vpop.permute.xlu1 %5163 }
 0x954   : > { %11185 = vmatprep.subr.bf16.mxu1 %v4342_v32 }
 0x957   : > { %11186 = vmatpush3.bf16.msra.mxu1 %v4342_v32  ;;  %v12310_v32 = vld [vmem:[%s15389_s8 + $0x260] sm:$0xff]  }
 0x958   : > { %11203 = vmatprep.subr.bf16.mxu1 %v4542_v34 }
 0x95a   : > { %11172 = vmatmul.mubr.msk.bf16.gmra.mrb[32].mxu1 %vm2280_vm6, %v12279_v33  ;;  %v5166_v33 = vpop.permute.xlu0 %5165 }
 0x95b   : > { %11175 = vmatprep.mubr.msk.bf16.mxu1 %vm2280_vm6, %v12280_v35  ;;  %v12312_v35 = vld [vmem:[%s15389_s8 + $0x270] sm:$0xff]  }
 0x962   : > { %11176 = vmatmul.mubr.msk.bf16.gmra.mrb[36].mxu1 %vm2280_vm6, %v12281_v37  ;;  %v12313_v37 = vld [vmem:[%s15389_s8 + $0x278] sm:$0xff]  }
 0x963   : > { %11187 = vmatprep.mubr.msk.bf16.mxu1 %vm2280_vm6, %v12282_v38  ;;  %v12314_v38 = vld [vmem:[%s15389_s8 + $0x280] sm:$0xff]  }
 0x96a   : > { %11188 = vmatmul.mubr.msk.bf16.vlgmr.msra.gmra.mrb[24].mxu1 %vm2280_vm6, %v12283_v39  ;;  %v12315_v39 = vld [vmem:[%s15389_s8 + $0x288] sm:$0xff]  }
 0x96b   : > { %11204 = vmatpush3.bf16.msra.mxu1 %v4542_v34  ;;  %11191 = vmatprep.mubr.msk.bf16.mxu1 %vm2280_vm6, %v12284_v40  ;;  %v12311_v34 = vld [vmem:[%s15389_s8 + $0x268] sm:$0xff]   ;;  %v12316_v40 = vld [vmem:[%s15389_s8 + $0x290] sm:$0xff]  }
 0x96c   : > { %11205 = vmatprep.subr.bf16.mxu1 %v4544_v41 }
 0x96f   : > { %11206 = vmatpush3.bf16.msra.mxu1 %v4544_v41  ;;  %v12317_v41 = vld [vmem:[%s15389_s8 + $0x298] sm:$0xff]  }
 0x970   : > { %11207 = vmatprep.subr.bf16.mxu1 %v4546_v43 }
 0x972   : > { %11192 = vmatmul.mubr.msk.bf16.gmra.mrb[28].mxu1 %vm2280_vm6, %v12285_v42  ;;  %v12318_v42 = vld [vmem:[%s15389_s8 + $0x2a0] sm:$0xff]  }
 0x973   : > { %11208 = vmatpush3.bf16.msra.mxu1 %v4546_v43  ;;  %11195 = vmatprep.mubr.msk.bf16.mxu1 %vm2280_vm6, %v12286_v44  ;;  %v12319_v43 = vld [vmem:[%s15389_s8 + $0x2a8] sm:$0xff]   ;;  %v12320_v44 = vld [vmem:[%s15389_s8 + $0x2b0] sm:$0xff]  }
 0x974   : > { %11209 = vmatprep.subr.bf16.mxu1 %v4548_v45 }
 0x977   : > { %11210 = vmatpush3.bf16.msra.mxu1 %v4548_v45  ;;  %v12321_v45 = vld [vmem:[%s15389_s8 + $0x2b8] sm:$0xff]   ;;  %s13989_s8 = scalar_lea.vmem %s15397_s16, %s13873_s28 }
 0x978   : > { %11227 = vmatprep.subr.bf16.mxu1 %v4748_v47 }
 0x97a   : > { %11196 = vmatmul.mubr.msk.bf16.gmra.mrb[32].mxu1 %vm2280_vm6, %v12287_v46  ;;  %v12322_v46 = vld [vmem:[%s15248_s10] sm:$0xff]  }
 0x97b   : > { %11199 = vmatprep.mubr.msk.bf16.mxu1 %vm2280_vm6, %v12288_v49  ;;  %11307 = vmatprep.mubr.msk.bf16.mxu0 %vm2280_vm6, %v12322_v46  ;;  %v3035_v49 = vld [vmem:[%s15247_s9] sm:$0xff] }
 0x982   : > { %11200 = vmatmul.mubr.msk.bf16.gmra.mrb[36].mxu1 %vm2280_vm6, %v12289_v16 }
 0x983   : > { %11211 = vmatprep.mubr.msk.bf16.mxu1 %vm2280_vm6, %v12290_v50  ;;  %v3038_v50 = vld [vmem:[%s15247_s9 + $0x18] sm:$0xff] }
 0x98a   : > { %11212 = vmatmul.mubr.msk.bf16.vlgmr.msra.gmra.mrb[24].mxu1 %vm2280_vm6, %v12291_v51 }
 0x98b   : > { %11228 = vmatpush3.bf16.msra.mxu1 %v4748_v47  ;;  %11215 = vmatprep.mubr.msk.bf16.mxu1 %vm2280_vm6, %v12292_v52  ;;  %v3037_v47 = vld [vmem:[%s15247_s9 + $0x10] sm:$0xff] }
 0x98c   : > { %11229 = vmatprep.subr.bf16.mxu1 %v4750_v53 }
 0x98f   : > { %11230 = vmatpush3.bf16.msra.mxu1 %v4750_v53  ;;  %v3036_v53 = vld [vmem:[%s15247_s9 + $0x8] sm:$0xff] }
 0x990   : > { %11231 = vmatprep.subr.bf16.mxu1 %v4752_v55 }
 0x992   : > { %11216 = vmatmul.mubr.msk.bf16.gmra.mrb[28].mxu1 %vm2280_vm6, %v12293_v54 }
 0x993   : > { %11232 = vmatpush3.bf16.msra.mxu1 %v4752_v55  ;;  %11219 = vmatprep.mubr.msk.bf16.mxu1 %vm2280_vm6, %v12294_v56 }
 0x994   : > { %11233 = vmatprep.subr.bf16.mxu1 %v4754_v57 }
 0x997   : > { %11234 = vmatpush3.bf16.msra.mxu1 %v4754_v57 }
 0x998   : > { %11251 = vmatprep.subr.bf16.mxu1 %v4954_v11 }
 0x99a   : > { %11220 = vmatmul.mubr.msk.bf16.gmra.mrb[32].mxu1 %vm2280_vm6, %v12295_v58 }
 0x99b   : > { %11223 = vmatprep.mubr.msk.bf16.mxu1 %vm2280_vm6, %v12296_v59  ;;  %v3039_v59 = vld [vmem:[%s15247_s9 + $0x20] sm:$0xff] }
 0x9a2   : > { %11224 = vmatmul.mubr.msk.bf16.gmra.mrb[36].mxu1 %vm2280_vm6, %v12297_v60 }
 0x9a3   : > { %11235 = vmatprep.mubr.msk.bf16.mxu1 %vm2280_vm6, %v12298_v61  ;;  %v3042_v61 = vld [vmem:[%s15247_s9 + $0x38] sm:$0xff] }
 0x9aa   : > { %11236 = vmatmul.mubr.msk.bf16.vlgmr.msra.gmra.mrb[24].mxu1 %vm2280_vm6, %v12299_v62 }
 0x9ab   : > { %11252 = vmatpush3.bf16.msra.mxu1 %v4954_v11  ;;  %11239 = vmatprep.mubr.msk.bf16.mxu1 %vm2280_vm6, %v12300_v63  ;;  %v3041_v11 = vld [vmem:[%s15247_s9 + $0x30] sm:$0xff] }
 0x9ac   : > { %11253 = vmatprep.subr.bf16.mxu1 %v4956_v0 }
 0x9af   : > { %11254 = vmatpush3.bf16.msra.mxu1 %v4956_v0  ;;  %v3040_v0 = vld [vmem:[%s15247_s9 + $0x28] sm:$0xff] }
 0x9b0   : > { %11255 = vmatprep.subr.bf16.mxu1 %v4958_v3 }
 0x9b2   : > { %11240 = vmatmul.mubr.msk.bf16.gmra.mrb[28].mxu1 %vm2280_vm6, %v12301_v2 }
 0x9b3   : > { %11256 = vmatpush3.bf16.msra.mxu1 %v4958_v3  ;;  %11243 = vmatprep.mubr.msk.bf16.mxu1 %vm2280_vm6, %v12302_v4 }
 0x9b4   : > { %11257 = vmatprep.subr.bf16.mxu1 %v4960_v5 }
 0x9b7   : > { %11258 = vmatpush3.bf16.msra.mxu1 %v4960_v5 }
 0x9b8   : > { %11275 = vmatprep.subr.bf16.mxu1 %v5160_v20 }
 0x9ba   : > { %11244 = vmatmul.mubr.msk.bf16.gmra.mrb[32].mxu1 %vm2280_vm6, %v12303_v7 }
 0x9bb   : > { %11247 = vmatprep.mubr.msk.bf16.mxu1 %vm2280_vm6, %v12304_v24  ;;  %v3043_v24 = vld [vmem:[%s15247_s9 + $0x40] sm:$0xff] }
 0x9c2   : > { %11248 = vmatmul.mubr.msk.bf16.gmra.mrb[36].mxu1 %vm2280_vm6, %v12305_v25 }
 0x9c3   : > { %11259 = vmatprep.mubr.msk.bf16.mxu1 %vm2280_vm6, %v12306_v26  ;;  %v3046_v26 = vld [vmem:[%s15247_s9 + $0x58] sm:$0xff] }
 0x9ca   : > { %11260 = vmatmul.mubr.msk.bf16.vlgmr.msra.gmra.mrb[24].mxu1 %vm2280_vm6, %v12307_v27 }
 0x9cb   : > { %11276 = vmatpush3.bf16.msra.mxu1 %v5160_v20  ;;  %11263 = vmatprep.mubr.msk.bf16.mxu1 %vm2280_vm6, %v12308_v28  ;;  %v3045_v20 = vld [vmem:[%s15247_s9 + $0x50] sm:$0xff] }
 0x9cc   : > { %11277 = vmatprep.subr.bf16.mxu1 %v5162_v29 }
 0x9cf   : > { %11278 = vmatpush3.bf16.msra.mxu1 %v5162_v29  ;;  %v3044_v29 = vld [vmem:[%s15247_s9 + $0x48] sm:$0xff] }
 0x9d0   : > { %11279 = vmatprep.subr.bf16.mxu1 %v5164_v31 }
 0x9d2   : > { %11264 = vmatmul.mubr.msk.bf16.gmra.mrb[28].mxu1 %vm2280_vm6, %v12309_v30 }
 0x9d3   : > { %11280 = vmatpush3.bf16.msra.mxu1 %v5164_v31  ;;  %11267 = vmatprep.mubr.msk.bf16.mxu1 %vm2280_vm6, %v12310_v32 }
 0x9d4   : > { %11281 = vmatprep.subr.bf16.mxu1 %v5166_v33 }
 0x9d7   : > { %11282 = vmatpush3.bf16.msra.mxu1 %v5166_v33 }
 0x9da   : > { %11268 = vmatmul.mubr.msk.bf16.gmra.mrb[32].mxu1 %vm2280_vm6, %v12311_v34 }
 0x9db   : > { %11271 = vmatprep.mubr.msk.bf16.mxu1 %vm2280_vm6, %v12312_v35 }
 0x9e2   : > { %11272 = vmatmul.mubr.msk.bf16.gmra.mrb[36].mxu1 %vm2280_vm6, %v12313_v37 }
 0x9e3   : > { %11283 = vmatprep.mubr.msk.bf16.mxu1 %vm2280_vm6, %v12314_v38 }
 0x9ea   : > { %11284 = vmatmul.mubr.msk.bf16.vlgmr.msra.gmra.mrb[24].mxu1 %vm2280_vm6, %v12315_v39 }
 0x9eb   : > { %11287 = vmatprep.mubr.msk.bf16.mxu1 %vm2280_vm6, %v12316_v40 }
 0x9f2   : > { %11288 = vmatmul.mubr.msk.bf16.gmra.mrb[28].mxu1 %vm2280_vm6, %v12317_v41 }
 0x9f3   : > { %11291 = vmatprep.mubr.msk.bf16.mxu1 %vm2280_vm6, %v12318_v42  ;;  %v3049_v42 = vld [vmem:[%s15247_s9 + $0x70] sm:$0xff] }
 0x9fa   : > { %11292 = vmatmul.mubr.msk.bf16.gmra.mrb[32].mxu1 %vm2280_vm6, %v12319_v43 }
 0x9fb   : > { %11295 = vmatprep.mubr.msk.bf16.mxu1 %vm2280_vm6, %v12320_v44  ;;  %v3047_v44 = vld [vmem:[%s15247_s9 + $0x60] sm:$0xff] }
 0xa02   : > { %11296 = vmatmul.mubr.msk.bf16.gmra.mrb[36].mxu1 %vm2280_vm6, %v12321_v45 }
 0xa03   : > { %8890 = vmatprep.mubr.f32.mxu1 %v15298_v36 }
 0xabd   : > { %v11285_v16 = vpop.f32.mrb[24].mxu1 }
 0xabe   : > { %v13890_v51 = vadd.f32 %v11285_v16, %v3037_v47  ;;  %v5229_v52 = vpop.f32.mrb[25].mxu1  ;;  %v3050_v47 = vld [vmem:[%s15247_s9 + $0x78] sm:$0xff] }
 0xabf   : > { %v13895_v54 = vadd.f32 %v5229_v52, %v3035_v49  ;;  %v11286_v55 = vpop.f32.mrb[26].mxu1 }
 0xac0   : > { %5311 = vst.msk [vmem:[%s13885_s18 + $0x10] sm:$0xff] %vm5308_vm5, %v13890_v51  ;;  %v13900_v56 = vadd.f32 %v11286_v55, %v3038_v50  ;;  %v5232_v57 = vpop.f32.mrb[27].mxu1  ;;  %v3048_v50 = vld [vmem:[%s15247_s9 + $0x68] sm:$0xff] }
 0xac1   : > { %5309 = vst.msk [vmem:[%s13885_s18] sm:$0xff] %vm5308_vm5, %v13895_v54  ;;  %v13905_v58 = vadd.f32 %v5232_v57, %v3036_v53 }
 0xac2   : > { %5312 = vst.msk [vmem:[%s13885_s18 + $0x18] sm:$0xff] %vm5308_vm5, %v13900_v56 }
 0xac3   : > { %5310 = vst.msk [vmem:[%s13885_s18 + $0x8] sm:$0xff] %vm5308_vm5, %v13905_v58 }
 0xac5   : > { %v11289_v60 = vpop.f32.mrb[28].mxu1 }
 0xac6   : > { %v13922_v62 = vadd.f32 %v11289_v60, %v3041_v11  ;;  %v5245_v63 = vpop.f32.mrb[29].mxu1 }
 0xac7   : > { %v13927_v2 = vadd.f32 %v5245_v63, %v3039_v59  ;;  %v11290_v3 = vpop.f32.mrb[30].mxu1 }
 0xac8   : > { %5315 = vst.msk [vmem:[%s13885_s18 + $0x30] sm:$0xff] %vm5308_vm5, %v13922_v62  ;;  %v13932_v4 = vadd.f32 %v11290_v3, %v3042_v61  ;;  %v5248_v5 = vpop.f32.mrb[31].mxu1 }
 0xac9   : > { %5313 = vst.msk [vmem:[%s13885_s18 + $0x20] sm:$0xff] %vm5308_vm5, %v13927_v2  ;;  %v13937_v7 = vadd.f32 %v5248_v5, %v3040_v0  ;;  %v5327_v5 = vld [vmem:[%s13989_s8 + $0x10] sm:$0xff] }
 0xaca   : > { %5316 = vst.msk [vmem:[%s13885_s18 + $0x38] sm:$0xff] %vm5308_vm5, %v13932_v4 }
 0xacb   : > { %5314 = vst.msk [vmem:[%s13885_s18 + $0x28] sm:$0xff] %vm5308_vm5, %v13937_v7 }
 0xacd   : > { %v11293_v25 = vpop.f32.mrb[32].mxu1 }
 0xace   : > { %v11751_v27 = vadd.f32 %v11293_v25, %v3045_v20  ;;  %v5261_v28 = vpop.f32.mrb[33].mxu1 }
 0xacf   : > { %v11752_v30 = vadd.f32 %v5261_v28, %v3043_v24  ;;  %v11294_v31 = vpop.f32.mrb[34].mxu1  ;;  %v5325_v24 = vld [vmem:[%s13989_s8] sm:$0xff] }
 0xad0   : > { %5319 = vst.msk [vmem:[%s13955_s30 + $0x10] sm:$0xff] %vm5308_vm5, %v11751_v27  ;;  %v5335_v32 = vmul.f32 0.5, %v11751_v27  ;;  %v11753_v33 = vadd.f32 %v11294_v31, %v3046_v26  ;;  %v5264_v34 = vpop.f32.mrb[35].mxu1  ;;  %v5328_v27 = vld [vmem:[%s13989_s8 + $0x18] sm:$0xff] }
 0xad1   : > { %5317 = vst.msk [vmem:[%s13955_s30] sm:$0xff] %vm5308_vm5, %v11752_v30  ;;  %v5333_v35 = vmul.f32 0.5, %v11752_v30  ;;  %v11754_v37 = vadd.f32 %v5264_v34, %v3044_v29  ;;  %v5326_v30 = vld [vmem:[%s13989_s8 + $0x8] sm:$0xff] }
 0xad2   : > { %v5345_v38 = vmul.f32 1.442695, %v5335_v32  ;;  %5320 = vst.msk [vmem:[%s13955_s30 + $0x18] sm:$0xff] %vm5308_vm5, %v11753_v33  ;;  %v5336_v39 = vmul.f32 0.5, %v11753_v33 }
 0xad3   : > { %v5341_v40 = vmul.f32 1.442695, %v5333_v35  ;;  %5318 = vst.msk [vmem:[%s13955_s30 + $0x8] sm:$0xff] %vm5308_vm5, %v11754_v37  ;;  %v5334_v41 = vmul.f32 0.5, %v11754_v37 }
 0xad4   : > { %12396 = vpow2.f32 %v5345_v38  ;;  %v5347_v43 = vmul.f32 1.442695, %v5336_v39 }
 0xad5   : > { %12398 = vpow2.f32 %v5341_v40  ;;  %v5343_v45 = vmul.f32 1.442695, %v5334_v41  ;;  %v11297_v46 = vpop.f32.mrb[36].mxu1  ;;  %v5331_v41 = vld [vmem:[%s13989_s8 + $0x30] sm:$0xff] }
 0xad6   : > { %12400 = vpow2.f32 %v5347_v43  ;;  %v11755_v49 = vadd.f32 %v11297_v46, %v3049_v42  ;;  %v5277_v16 = vpop.f32.mrb[37].mxu1  ;;  %v5329_v43 = vld [vmem:[%s13989_s8 + $0x20] sm:$0xff]  ;;  %v5332_v46 = vld [vmem:[%s13989_s8 + $0x38] sm:$0xff] }
 0xad7   : > { %12402 = vpow2.f32 %v5343_v45  ;;  %v11756_v52 = vadd.f32 %v5277_v16, %v3047_v44  ;;  %v11298_v53 = vpop.f32.mrb[38].mxu1  ;;  %v5330_v16 = vld [vmem:[%s13989_s8 + $0x28] sm:$0xff] }
 0xad8   : > { %5323 = vst.msk [vmem:[%s13955_s30 + $0x30] sm:$0xff] %vm5308_vm5, %v11755_v49  ;;  %v5339_v55 = vmul.f32 0.5, %v11755_v49  ;;  %v11757_v57 = vadd.f32 %v11298_v53, %v3050_v47  ;;  %v5280_v11 = vpop.f32.mrb[39].mxu1 }
 0xad9   : > { %5321 = vst.msk [vmem:[%s13955_s30 + $0x20] sm:$0xff] %vm5308_vm5, %v11756_v52  ;;  %v5337_v59 = vmul.f32 0.5, %v11756_v52  ;;  %v11758_v60 = vadd.f32 %v5280_v11, %v3048_v50 }
 0xada   : > { %v5353_v61 = vmul.f32 1.442695, %v5339_v55  ;;  %5324 = vst.msk [vmem:[%s13955_s30 + $0x38] sm:$0xff] %vm5308_vm5, %v11757_v57  ;;  %v5340_v63 = vmul.f32 0.5, %v11757_v57 }
 0xadb   : > { %v5349_v0 = vmul.f32 1.442695, %v5337_v59  ;;  %5322 = vst.msk [vmem:[%s13955_s30 + $0x28] sm:$0xff] %vm5308_vm5, %v11758_v60  ;;  %v5338_v3 = vmul.f32 0.5, %v11758_v60  ;;  %v12327_v60 = vld [vmem:[%s15248_s10 + $0x28] sm:$0xff]   ;;  %vm6012_vm5 = vcmp.eq.s32.totalorder %v13081_v9, 3 }
 0xadc   : > { %12404 = vpow2.f32 %v5353_v61  ;;  %v5355_v20 = vmul.f32 1.442695, %v5340_v63  ;;  %v12328_v61 = vld [vmem:[%s15248_s10 + $0x30] sm:$0xff]   ;;  %v12329_v63 = vld [vmem:[%s15248_s10 + $0x38] sm:$0xff]  }
 0xadd   : > { %12406 = vpow2.f32 %v5349_v0  ;;  %v5351_v25 = vmul.f32 1.442695, %v5338_v3  ;;  %v12330_v0 = vld [vmem:[%s15248_s10 + $0x40] sm:$0xff]   ;;  %v12331_v3 = vld [vmem:[%s15248_s10 + $0x48] sm:$0xff]  }
 0xade   : > { %v12397_v26 = vpop.eup %12396  ;;  %12408 = vpow2.f32 %v5355_v20  ;;  %v12333_v20 = vld [vmem:[%s15248_s10 + $0x58] sm:$0xff]  }
 0xadf   : > { %v12399_v28 = vpop.eup %12398  ;;  %v5359_v29 = vmul.f32 %v12397_v26, %v5327_v5  ;;  %12410 = vpow2.f32 %v5351_v25  ;;  %v12332_v5 = vld [vmem:[%s15248_s10 + $0x50] sm:$0xff]   ;;  %v12335_v25 = vld [vmem:[%s15248_s10 + $0x68] sm:$0xff]  }
 0xae0   : > { %v12401_v31 = vpop.eup %12400  ;;  %v5357_v32 = vmul.f32 %v12399_v28, %v5325_v24  ;;  %v12334_v24 = vld [vmem:[%s15248_s10 + $0x60] sm:$0xff]   ;;  %v12336_v26 = vld [vmem:[%s15248_s10 + $0x70] sm:$0xff]  }
 0xae1   : > { %v12403_v33 = vpop.eup %12402  ;;  %v5367_v34 = vadd.f32 %v13890_v51, %v5359_v29  ;;  %v5360_v35 = vmul.f32 %v12401_v31, %v5328_v27  ;;  %v12337_v27 = vld [vmem:[%s15248_s10 + $0x78] sm:$0xff]   ;;  %v12338_v28 = vld [vmem:[%s15248_s10 + $0x80] sm:$0xff]   ;;  %v12339_v29 = vld [vmem:[%s15248_s10 + $0x88] sm:$0xff]  }
 0xae2   : > { %v5365_v37 = vadd.f32 %v13895_v54, %v5357_v32  ;;  %v5358_v38 = vmul.f32 %v12403_v33, %v5326_v30  ;;  %v12340_v30 = vld [vmem:[%s15248_s10 + $0x90] sm:$0xff]   ;;  %v12341_v31 = vld [vmem:[%s15248_s10 + $0x98] sm:$0xff]   ;;  %v12342_v32 = vld [vmem:[%s15248_s10 + $0xa0] sm:$0xff]  }
 0xae3   : > { %v5368_v39 = vadd.f32 %v13900_v56, %v5360_v35  ;;  %v12343_v33 = vld [vmem:[%s15248_s10 + $0xa8] sm:$0xff]   ;;  %v12345_v35 = vld [vmem:[%s15248_s10 + $0xb8] sm:$0xff]  }
 0xae4   : > { %v5366_v40 = vadd.f32 %v13905_v58, %v5358_v38  ;;  %v12347_v38 = vld [vmem:[%s15248_s10 + $0xc8] sm:$0xff]  }
 0xae5   : > { %v14006_v42 = vpack.c.bf16 %v5368_v39, %v5367_v34  ;;  %v12344_v34 = vld [vmem:[%s15248_s10 + $0xb0] sm:$0xff]  }
 0xae6   : > { %v12405_v44 = vpop.eup %12404  ;;  %v14009_v45 = vpack.c.bf16 %v5366_v40, %v5365_v37  ;;  %v12346_v37 = vld [vmem:[%s15248_s10 + $0xc0] sm:$0xff]   ;;  %v12348_v39 = vld [vmem:[%s15248_s10 + $0xd0] sm:$0xff]   ;;  %v12349_v40 = vld [vmem:[%s15248_s10 + $0xd8] sm:$0xff]  }
 0xae7   : > { %v12407_v47 = vpop.eup %12406  ;;  %v5363_v49 = vmul.f32 %v12405_v44, %v5331_v41  ;;  %v12350_v41 = vld [vmem:[%s15248_s10 + $0xe0] sm:$0xff]   ;;  %v12352_v44 = vld [vmem:[%s15248_s10 + $0xf0] sm:$0xff]  }
 0xae8   : > { %v12409_v51 = vpop.eup %12408  ;;  %v5361_v50 = vmul.f32 %v12407_v47, %v5329_v43  ;;  %11299 = vmatprep.subr.bf16.mxu0 %v14009_v45  ;;  %v12351_v43 = vld [vmem:[%s15248_s10 + $0xe8] sm:$0xff]   ;;  %v12354_v47 = vld [vmem:[%s15248_s10 + $0x100] sm:$0xff]  }
 0xae9   : > { %v12411_v54 = vpop.eup %12410  ;;  %v5371_v56 = vadd.f32 %v13922_v62, %v5363_v49  ;;  %v5364_v52 = vmul.f32 %v12409_v51, %v5332_v46  ;;  %11300 = vmatpush3.bf16.msra.mxu0 %v14009_v45  ;;  %v12323_v62 = vld [vmem:[%s15248_s10 + $0x8] sm:$0xff]   ;;  %v12353_v46 = vld [vmem:[%s15248_s10 + $0xf8] sm:$0xff]  }
 0xaea   : > { %v5369_v58 = vadd.f32 %v13927_v2, %v5361_v50  ;;  %v5362_v53 = vmul.f32 %v12411_v54, %v5330_v16  ;;  %11301 = vmatprep.subr.bf16.mxu0 %v14006_v42  ;;  %v12324_v2 = vld [vmem:[%s15248_s10 + $0x10] sm:$0xff]   ;;  %v12355_v49 = vld [vmem:[%s15248_s10 + $0x108] sm:$0xff]   ;;  %v12357_v51 = vld [vmem:[%s15248_s10 + $0x118] sm:$0xff]  }
 0xaeb   : > { %v5372_v55 = vadd.f32 %v13932_v4, %v5364_v52  ;;  %v12325_v4 = vld [vmem:[%s15248_s10 + $0x18] sm:$0xff]   ;;  %v12356_v16 = vld [vmem:[%s15248_s10 + $0x110] sm:$0xff]   ;;  %v12358_v50 = vld [vmem:[%s15248_s10 + $0x120] sm:$0xff]  }
 0xaec   : > { %v5370_v57 = vadd.f32 %v13937_v7, %v5362_v53  ;;  %v12326_v7 = vld [vmem:[%s15248_s10 + $0x20] sm:$0xff]   ;;  %v12359_v54 = vld [vmem:[%s15248_s10 + $0x128] sm:$0xff]   ;;  %v12361_v52 = vld [vmem:[%s15248_s10 + $0x138] sm:$0xff]  }
 0xaed   : > { %v14020_v11 = vpack.c.bf16 %v5372_v55, %v5371_v56  ;;  %11302 = vmatpush3.bf16.msra.mxu0 %v14006_v42  ;;  %v12360_v56 = vld [vmem:[%s15248_s10 + $0x130] sm:$0xff]   ;;  %v12365_v53 = vld [vmem:[%s15248_s10 + $0x158] sm:$0xff]  }
 0xaee   : > { %v14023_v59 = vpack.c.bf16 %v5370_v57, %v5369_v58  ;;  %v12362_v58 = vld [vmem:[%s15248_s10 + $0x140] sm:$0xff]   ;;  %v5387_v55 = vld [vmem:[%s15398_s5 + $0x10] sm:$0xff] }
 0xaf0   : > { %11303 = vmatprep.subr.bf16.mxu0 %v14023_v59 }
 0xaf1   : > { %11304 = vmatpush3.bf16.msra.mxu0 %v14023_v59 }
 0xaf2   : > { %11305 = vmatprep.subr.bf16.mxu0 %v14020_v11 }
 0xaf5   : > { %11306 = vmatpush3.bf16.msra.mxu0 %v14020_v11 }
 0xaf6   : > { %11315 = vmatprep.subr.bf16.mxu0 %v14009_v45 }
 0xaf8   : > { %11308 = vmatmul.mubr.msk.bf16.vlgmr.msra.gmra.mrb[24].mxu0 %vm2280_vm6, %v12323_v62 }
 0xaf9   : > { %11316 = vmatpush3.bf16.msra.mxu0 %v14009_v45  ;;  %11311 = vmatprep.mubr.msk.bf16.mxu0 %vm2280_vm6, %v12324_v2  ;;  %v5385_v2 = vld [vmem:[%s15398_s5] sm:$0xff] }
 0xafa   : > { %11317 = vmatprep.subr.bf16.mxu0 %v14006_v42 }
 0xafd   : > { %11318 = vmatpush3.bf16.msra.mxu0 %v14006_v42 }
 0xafe   : > { %11319 = vmatprep.subr.bf16.mxu0 %v14023_v59 }
 0xb00   : > { %11312 = vmatmul.mubr.msk.bf16.gmra.mrb[28].mxu0 %vm2280_vm6, %v12325_v4 }
 0xb01   : > { %11320 = vmatpush3.bf16.msra.mxu0 %v14023_v59  ;;  %11323 = vmatprep.mubr.msk.bf16.mxu0 %vm2280_vm6, %v12326_v7 }
 0xb02   : > { %11321 = vmatprep.subr.bf16.mxu0 %v14020_v11 }
 0xb05   : > { %11322 = vmatpush3.bf16.msra.mxu0 %v14020_v11 }
 0xb06   : > { %11331 = vmatprep.subr.bf16.mxu0 %v14009_v45 }
 0xb08   : > { %11324 = vmatmul.mubr.msk.bf16.vlgmr.msra.gmra.mrb[32].mxu0 %vm2280_vm6, %v12327_v60 }
 0xb09   : > { %11332 = vmatpush3.bf16.msra.mxu0 %v14009_v45  ;;  %11327 = vmatprep.mubr.msk.bf16.mxu0 %vm2280_vm6, %v12328_v61 }
 0xb0a   : > { %11333 = vmatprep.subr.bf16.mxu0 %v14006_v42 }
 0xb0d   : > { %11334 = vmatpush3.bf16.msra.mxu0 %v14006_v42 }
 0xb0e   : > { %11335 = vmatprep.subr.bf16.mxu0 %v14023_v59 }
 0xb10   : > { %11328 = vmatmul.mubr.msk.bf16.gmra.mrb[36].mxu0 %vm2280_vm6, %v12329_v63  ;;  %v5386_v63 = vld [vmem:[%s15398_s5 + $0x8] sm:$0xff] }
 0xb11   : > { %11336 = vmatpush3.bf16.msra.mxu0 %v14023_v59  ;;  %11339 = vmatprep.mubr.msk.bf16.mxu0 %vm2280_vm6, %v12330_v0 }
 0xb12   : > { %11337 = vmatprep.subr.bf16.mxu0 %v14020_v11 }
 0xb15   : > { %11338 = vmatpush3.bf16.msra.mxu0 %v14020_v11 }
 0xb16   : > { %11347 = vmatprep.subr.bf16.mxu0 %v14009_v45 }
 0xb18   : > { %11340 = vmatmul.mubr.msk.bf16.vlgmr.msra.gmra.mrb[40].mxu0 %vm2280_vm6, %v12331_v3  ;;  %v5392_v3 = vld [vmem:[%s15398_s5 + $0x38] sm:$0xff] }
 0xb19   : > { %11348 = vmatpush3.bf16.msra.mxu0 %v14009_v45  ;;  %11343 = vmatprep.mubr.msk.bf16.mxu0 %vm2280_vm6, %v12332_v5 }
 0xb1a   : > { %11349 = vmatprep.subr.bf16.mxu0 %v14006_v42 }
 0xb1d   : > { %11350 = vmatpush3.bf16.msra.mxu0 %v14006_v42 }
 0xb1e   : > { %11351 = vmatprep.subr.bf16.mxu0 %v14023_v59 }
 0xb20   : > { %11344 = vmatmul.mubr.msk.bf16.gmra.mrb[44].mxu0 %vm2280_vm6, %v12333_v20 }
 0xb21   : > { %11352 = vmatpush3.bf16.msra.mxu0 %v14023_v59  ;;  %11355 = vmatprep.mubr.msk.bf16.mxu0 %vm2280_vm6, %v12334_v24  ;;  %v5391_v24 = vld [vmem:[%s15398_s5 + $0x30] sm:$0xff] }
 0xb22   : > { %11353 = vmatprep.subr.bf16.mxu0 %v14020_v11 }
 0xb25   : > { %11354 = vmatpush3.bf16.msra.mxu0 %v14020_v11 }
 0xb26   : > { %11363 = vmatprep.subr.bf16.mxu0 %v14009_v45 }
 0xb28   : > { %11356 = vmatmul.mubr.msk.bf16.vlgmr.msra.gmra.mrb[48].mxu0 %vm2280_vm6, %v12335_v25 }
 0xb29   : > { %11364 = vmatpush3.bf16.msra.mxu0 %v14009_v45  ;;  %11359 = vmatprep.mubr.msk.bf16.mxu0 %vm2280_vm6, %v12336_v26 }
 0xb2a   : > { %11365 = vmatprep.subr.bf16.mxu0 %v14006_v42 }
 0xb2d   : > { %11366 = vmatpush3.bf16.msra.mxu0 %v14006_v42 }
 0xb2e   : > { %11367 = vmatprep.subr.bf16.mxu0 %v14023_v59 }
 0xb30   : > { %11360 = vmatmul.mubr.msk.bf16.gmra.mrb[52].mxu0 %vm2280_vm6, %v12337_v27 }
 0xb31   : > { %11368 = vmatpush3.bf16.msra.mxu0 %v14023_v59  ;;  %11371 = vmatprep.mubr.msk.bf16.mxu0 %vm2280_vm6, %v12338_v28 }
 0xb32   : > { %11369 = vmatprep.subr.bf16.mxu0 %v14020_v11 }
 0xb35   : > { %11370 = vmatpush3.bf16.msra.mxu0 %v14020_v11 }
 0xb36   : > { %11379 = vmatprep.subr.bf16.mxu0 %v14009_v45 }
 0xb38   : > { %11372 = vmatmul.mubr.msk.bf16.vlgmr.msra.gmra.mrb[56].mxu0 %vm2280_vm6, %v12339_v29  ;;  %v5389_v29 = vld [vmem:[%s15398_s5 + $0x20] sm:$0xff] }
 0xb39   : > { %11380 = vmatpush3.bf16.msra.mxu0 %v14009_v45  ;;  %11375 = vmatprep.mubr.msk.bf16.mxu0 %vm2280_vm6, %v12340_v30  ;;  %v10024_v30 = vld [vmem:[%s15398_s5 + $0x50] sm:$0xff] }
 0xb3a   : > { %11381 = vmatprep.subr.bf16.mxu0 %v14006_v42 }
 0xb3d   : > { %11382 = vmatpush3.bf16.msra.mxu0 %v14006_v42 }
 0xb3e   : > { %11383 = vmatprep.subr.bf16.mxu0 %v14023_v59 }
 0xb40   : > { %11376 = vmatmul.mubr.msk.bf16.gmra.mrb[60].mxu0 %vm2280_vm6, %v12341_v31 }
 0xb41   : > { %11384 = vmatpush3.bf16.msra.mxu0 %v14023_v59  ;;  %11387 = vmatprep.mubr.msk.bf16.mxu0 %vm2280_vm6, %v12342_v32 }
 0xb42   : > { %11385 = vmatprep.subr.bf16.mxu0 %v14020_v11 }
 0xb45   : > { %11386 = vmatpush3.bf16.msra.mxu0 %v14020_v11 }
 0xb46   : > { %11395 = vmatprep.subr.bf16.mxu0 %v14009_v45 }
 0xb48   : > { %11388 = vmatmul.mubr.msk.bf16.vlgmr.msra.gmra.mrb[64].mxu0 %vm2280_vm6, %v12343_v33 }
 0xb49   : > { %11396 = vmatpush3.bf16.msra.mxu0 %v14009_v45  ;;  %11391 = vmatprep.mubr.msk.bf16.mxu0 %vm2280_vm6, %v12344_v34 }
 0xb4a   : > { %11397 = vmatprep.subr.bf16.mxu0 %v14006_v42 }
 0xb4d   : > { %11398 = vmatpush3.bf16.msra.mxu0 %v14006_v42 }
 0xb4e   : > { %11399 = vmatprep.subr.bf16.mxu0 %v14023_v59 }
 0xb50   : > { %11392 = vmatmul.mubr.msk.bf16.gmra.mrb[68].mxu0 %vm2280_vm6, %v12345_v35  ;;  %v5390_v35 = vld [vmem:[%s15398_s5 + $0x28] sm:$0xff] }
 0xb51   : > { %11400 = vmatpush3.bf16.msra.mxu0 %v14023_v59  ;;  %11403 = vmatprep.mubr.msk.bf16.mxu0 %vm2280_vm6, %v12346_v37  ;;  %v10022_v37 = vld [vmem:[%s15398_s5 + $0x40] sm:$0xff] }
 0xb52   : > { %11401 = vmatprep.subr.bf16.mxu0 %v14020_v11 }
 0xb55   : > { %11402 = vmatpush3.bf16.msra.mxu0 %v14020_v11 }
 0xb56   : > { %11411 = vmatprep.subr.bf16.mxu0 %v14009_v45 }
 0xb58   : > { %11404 = vmatmul.mubr.msk.bf16.vlgmr.msra.gmra.mrb[72].mxu0 %vm2280_vm6, %v12347_v38 }
 0xb59   : > { %11412 = vmatpush3.bf16.msra.mxu0 %v14009_v45  ;;  %11407 = vmatprep.mubr.msk.bf16.mxu0 %vm2280_vm6, %v12348_v39 }
 0xb5a   : > { %11413 = vmatprep.subr.bf16.mxu0 %v14006_v42 }
 0xb5d   : > { %11414 = vmatpush3.bf16.msra.mxu0 %v14006_v42 }
 0xb5e   : > { %11415 = vmatprep.subr.bf16.mxu0 %v14023_v59 }
 0xb60   : > { %11408 = vmatmul.mubr.msk.bf16.gmra.mrb[76].mxu0 %vm2280_vm6, %v12349_v40 }
 0xb61   : > { %11416 = vmatpush3.bf16.msra.mxu0 %v14023_v59  ;;  %11419 = vmatprep.mubr.msk.bf16.mxu0 %vm2280_vm6, %v12350_v41 }
 0xb62   : > { %11417 = vmatprep.subr.bf16.mxu0 %v14020_v11 }
 0xb65   : > { %11418 = vmatpush3.bf16.msra.mxu0 %v14020_v11 }
 0xb66   : > { %11427 = vmatprep.subr.bf16.mxu0 %v14009_v45 }
 0xb68   : > { %11420 = vmatmul.mubr.msk.bf16.vlgmr.msra.gmra.mrb[80].mxu0 %vm2280_vm6, %v12351_v43  ;;  %v10025_v43 = vld [vmem:[%s15398_s5 + $0x58] sm:$0xff] }
 0xb69   : > { %11428 = vmatpush3.bf16.msra.mxu0 %v14009_v45  ;;  %11423 = vmatprep.mubr.msk.bf16.mxu0 %vm2280_vm6, %v12352_v44  ;;  %v10023_v44 = vld [vmem:[%s15398_s5 + $0x48] sm:$0xff] }
 0xb6a   : > { %11429 = vmatprep.subr.bf16.mxu0 %v14006_v42 }
 0xb6d   : > { %11430 = vmatpush3.bf16.msra.mxu0 %v14006_v42 }
 0xb6e   : > { %11431 = vmatprep.subr.bf16.mxu0 %v14023_v59 }
 0xb70   : > { %11424 = vmatmul.mubr.msk.bf16.gmra.mrb[84].mxu0 %vm2280_vm6, %v12353_v46 }
 0xb71   : > { %11432 = vmatpush3.bf16.msra.mxu0 %v14023_v59  ;;  %11435 = vmatprep.mubr.msk.bf16.mxu0 %vm2280_vm6, %v12354_v47 }
 0xb72   : > { %11433 = vmatprep.subr.bf16.mxu0 %v14020_v11 }
 0xb75   : > { %11434 = vmatpush3.bf16.msra.mxu0 %v14020_v11 }
 0xb76   : > { %11443 = vmatprep.subr.bf16.mxu0 %v14009_v45 }
 0xb78   : > { %11436 = vmatmul.mubr.msk.bf16.vlgmr.msra.gmra.mrb[88].mxu0 %vm2280_vm6, %v12355_v49 }
 0xb79   : > { %11444 = vmatpush3.bf16.msra.mxu0 %v14009_v45  ;;  %11439 = vmatprep.mubr.msk.bf16.mxu0 %vm2280_vm6, %v12356_v16 }
 0xb7a   : > { %11445 = vmatprep.subr.bf16.mxu0 %v14006_v42 }
 0xb7d   : > { %11446 = vmatpush3.bf16.msra.mxu0 %v14006_v42 }
 0xb7e   : > { %11447 = vmatprep.subr.bf16.mxu0 %v14023_v59 }
 0xb80   : > { %11440 = vmatmul.mubr.msk.bf16.gmra.mrb[92].mxu0 %vm2280_vm6, %v12357_v51  ;;  %v10028_v51 = vld [vmem:[%s15398_s5 + $0x70] sm:$0xff] }
 0xb81   : > { %11448 = vmatpush3.bf16.msra.mxu0 %v14023_v59  ;;  %11451 = vmatprep.mubr.msk.bf16.mxu0 %vm2280_vm6, %v12358_v50  ;;  %v10029_v50 = vld [vmem:[%s15398_s5 + $0x78] sm:$0xff] }
 0xb82   : > { %11449 = vmatprep.subr.bf16.mxu0 %v14020_v11 }
 0xb85   : > { %11450 = vmatpush3.bf16.msra.mxu0 %v14020_v11 }
 0xb86   : > { %11459 = vmatprep.subr.bf16.mxu0 %v14009_v45 }
 0xb88   : > { %11452 = vmatmul.mubr.msk.bf16.vlgmr.msra.gmra.mrb[96].mxu0 %vm2280_vm6, %v12359_v54 }
 0xb89   : > { %11460 = vmatpush3.bf16.msra.mxu0 %v14009_v45  ;;  %11455 = vmatprep.mubr.msk.bf16.mxu0 %vm2280_vm6, %v12360_v56  ;;  %v12363_v45 = vld [vmem:[%s15248_s10 + $0x148] sm:$0xff]  }
 0xb8a   : > { %11461 = vmatprep.subr.bf16.mxu0 %v14006_v42 }
 0xb8d   : > { %11462 = vmatpush3.bf16.msra.mxu0 %v14006_v42  ;;  %v12364_v42 = vld [vmem:[%s15248_s10 + $0x150] sm:$0xff]  }
 0xb8e   : > { %11463 = vmatprep.subr.bf16.mxu0 %v14023_v59 }
 0xb90   : > { %11456 = vmatmul.mubr.msk.bf16.gmra.mrb[100].mxu0 %vm2280_vm6, %v12361_v52 }
 0xb91   : > { %11464 = vmatpush3.bf16.msra.mxu0 %v14023_v59  ;;  %11467 = vmatprep.mubr.msk.bf16.mxu0 %vm2280_vm6, %v12362_v58 }
 0xb92   : > { %11465 = vmatprep.subr.bf16.mxu0 %v14020_v11 }
 0xb95   : > { %11466 = vmatpush3.bf16.msra.mxu0 %v14020_v11  ;;  %v5388_v11 = vld [vmem:[%s15398_s5 + $0x18] sm:$0xff] }
 0xb98   : > { %11468 = vmatmul.mubr.msk.bf16.vlgmr.msra.gmra.mrb[104].mxu0 %vm2280_vm6, %v12363_v45  ;;  %v10026_v45 = vld [vmem:[%s15398_s5 + $0x60] sm:$0xff] }
 0xb99   : > { %11471 = vmatprep.mubr.msk.bf16.mxu0 %vm2280_vm6, %v12364_v42  ;;  %v10049_v42 = vld [vmem:[%s15398_s5 + $0x90] sm:$0xff] }
 0xba0   : > { %11472 = vmatmul.mubr.msk.bf16.gmra.mrb[108].mxu0 %vm2280_vm6, %v12365_v53 }
 0xbcb   : > { %v11309_v57 = vpop.f32.mrb[24].mxu0 }
 0xbcc   : > { %v5468_v59 = vadd.f32 %v11309_v57, %v5387_v55  ;;  %v5459_v62 = vpop.f32.mrb[25].mxu0 }
 0xbcd   : > { %v11310_v4 = vpop.f32.mrb[26].mxu0  ;;  %v5460_v61 = vadd.f32 %v5459_v62, %v5385_v2  ;;  %v10047_v62 = vld [vmem:[%s15398_s5 + $0x80] sm:$0xff] }
 0xbce   : > { %v5471_v7 = vadd.f32 %v11310_v4, %v5388_v11  ;;  %5505 = vperm.xlu1 %12183, %v5468_v59   ;;  %v5462_v60 = vpop.f32.mrb[27].mxu0  ;;  %v10027_v59 = vld [vmem:[%s15398_s5 + $0x68] sm:$0xff] }
 0xbcf   : > { %v5463_v5 = vadd.f32 %v5462_v60, %v5386_v63  ;;  %v10048_v63 = vld [vmem:[%s15398_s5 + $0x88] sm:$0xff] }
 0xbd0   : > { %5510 = vperm.xlu0 %12182, %v5471_v7  }
 0xbd2   : > { %5495 = vperm.xlu1 %12183, %v5460_v61   ;;  %v10050_v61 = vld [vmem:[%s15398_s5 + $0x98] sm:$0xff] }
 0xbd3   : > { %v11313_v0 = vpop.f32.mrb[28].mxu0 }
 0xbd4   : > { %v5475_v20 = vpop.f32.mrb[29].mxu0  ;;  %v5484_v28 = vadd.f32 %v11313_v0, %v5391_v24  ;;  %v10052_v24 = vld [vmem:[%s15398_s5 + $0xa8] sm:$0xff] }
 0xbd5   : > { %v11314_v25 = vpop.f32.mrb[30].mxu0  ;;  %v5476_v32 = vadd.f32 %v5475_v20, %v5389_v29 }
 0xbd6   : > { %v5487_v26 = vadd.f32 %v11314_v25, %v5392_v3  ;;  %5500 = vperm.xlu1 %12183, %v5463_v5   ;;  %v5478_v27 = vpop.f32.mrb[31].mxu0  ;;  %v10053_v25 = vld [vmem:[%s15398_s5 + $0xb0] sm:$0xff] }
 0xbd7   : > { %v5479_v40 = vadd.f32 %v5478_v27, %v5390_v35  ;;  %v10054_v35 = vld [vmem:[%s15398_s5 + $0xb8] sm:$0xff] }
 0xbd8   : > { %5530 = vperm.xlu0 %12182, %v5487_v26  }
 0xbda   : > { %5525 = vperm.xlu1 %12183, %v5484_v28  }
 0xbdb   : > { %v11325_v31 = vpop.f32.mrb[32].mxu0 }
 0xbdc   : > { %v5642_v33 = vadd.f32 %v11325_v31, %v10024_v30  ;;  %v5633_v34 = vpop.f32.mrb[33].mxu0  ;;  %v10051_v30 = vld [vmem:[%s15398_s5 + $0xa0] sm:$0xff] }
 0xbdd   : > { %v11326_v38 = vpop.f32.mrb[34].mxu0  ;;  %v5634_v41 = vadd.f32 %v10022_v37, %v5633_v34  ;;  %v10073_v34 = vld [vmem:[%s15398_s5 + $0xc8] sm:$0xff] }
 0xbde   : > { %5679 = vperm.xlu0 %12182, %v5642_v33   ;;  %5515 = vperm.xlu1 %12183, %v5476_v32   ;;  %v5636_v39 = vpop.f32.mrb[35].mxu0  ;;  %v5645_v47 = vadd.f32 %v11326_v38, %v10025_v43 }
 0xbdf   : > { %v5637_v49 = vadd.f32 %v10023_v44, %v5636_v39 }
 0xbe2   : > { %5669 = vperm.xlu0 %12182, %v5634_v41   ;;  %5520 = vperm.xlu1 %12183, %v5479_v40   ;;  %v10074_v41 = vld [vmem:[%s15398_s5 + $0xd0] sm:$0xff] }
 0xbe3   : > { %v11329_v46 = vpop.f32.mrb[36].mxu0 }
 0xbe4   : > { %v5649_v16 = vpop.f32.mrb[37].mxu0  ;;  %v5658_v52 = vadd.f32 %v11329_v46, %v10028_v51 }
 0xbe5   : > { %v11330_v54 = vpop.f32.mrb[38].mxu0  ;;  %v5650_v55 = vadd.f32 %v10026_v45, %v5649_v16 }
 0xbe6   : > { %5674 = vperm.xlu0 %12182, %v5637_v49   ;;  %5684 = vperm.xlu1 %12183, %v5645_v47   ;;  %v5652_v56 = vpop.f32.mrb[39].mxu0  ;;  %v5661_v58 = vadd.f32 %v11330_v54, %v10029_v50  ;;  %v10077_v47 = vld [vmem:[%s15398_s5 + $0xe8] sm:$0xff]  ;;  %v10072_v49 = vld [vmem:[%s15398_s5 + $0xc0] sm:$0xff] }
 0xbe7   : > { %v5653_v7 = vadd.f32 %v10027_v59, %v5652_v56  ;;  %v10075_v56 = vld [vmem:[%s15398_s5 + $0xd8] sm:$0xff] }
 0xbea   : > { %5699 = vperm.xlu0 %12182, %v5658_v52   ;;  %5704 = vperm.xlu1 %12183, %v5661_v58   ;;  %v10099_v52 = vld [vmem:[%s15398_s5 + $0x110] sm:$0xff] }
 0xbeb   : > { %v11341_v53 = vpop.f32.mrb[40].mxu0 }
 0xbec   : > { %v5816_v57 = vadd.f32 %v11341_v53, %v10049_v42  ;;  %v5807_v11 = vpop.f32.mrb[41].mxu0 }
 0xbed   : > { %v11342_v2 = vpop.f32.mrb[42].mxu0  ;;  %v5808_v60 = vadd.f32 %v10047_v62, %v5807_v11 }
 0xbee   : > { %5689 = vperm.xlu0 %12182, %v5650_v55   ;;  %5853 = vperm.xlu1 %12183, %v5816_v57   ;;  %v5810_v4 = vpop.f32.mrb[43].mxu0  ;;  %v5819_v3 = vadd.f32 %v11342_v2, %v10050_v61  ;;  %v10078_v55 = vld [vmem:[%s15398_s5 + $0xf0] sm:$0xff]  ;;  %v10097_v57 = vld [vmem:[%s15398_s5 + $0x100] sm:$0xff] }
 0xbef   : > { %v5811_v5 = vadd.f32 %v10048_v63, %v5810_v4  ;;  %v10076_v4 = vld [vmem:[%s15398_s5 + $0xe0] sm:$0xff] }
 0xbf2   : > { %5694 = vperm.xlu0 %12182, %v5653_v7   ;;  %5843 = vperm.xlu1 %12183, %v5808_v60   ;;  %v10098_v7 = vld [vmem:[%s15398_s5 + $0x108] sm:$0xff] }
 0xbf3   : > { %v11345_v0 = vpop.f32.mrb[44].mxu0 }
 0xbf4   : > { %v5823_v20 = vpop.f32.mrb[45].mxu0  ;;  %v5832_v29 = vadd.f32 %v11345_v0, %v10053_v25 }
 0xbf5   : > { %v11346_v26 = vpop.f32.mrb[46].mxu0  ;;  %v5824_v32 = vadd.f32 %v10051_v30, %v5823_v20 }
 0xbf6   : > { %5848 = vperm.xlu0 %12182, %v5811_v5   ;;  %5858 = vperm.xlu1 %12183, %v5819_v3   ;;  %v5826_v27 = vpop.f32.mrb[47].mxu0  ;;  %v5835_v40 = vadd.f32 %v11346_v26, %v10054_v35  ;;  %v10079_v3 = vld [vmem:[%s15398_s5 + $0xf8] sm:$0xff]  ;;  %v10101_v5 = vld [vmem:[%s15398_s5 + $0x120] sm:$0xff] }
 0xbf7   : > { %v5827_v28 = vadd.f32 %v10052_v24, %v5826_v27  ;;  %v10100_v27 = vld [vmem:[%s15398_s5 + $0x118] sm:$0xff] }
 0xbfa   : > { %5868 = vperm.xlu0 %12182, %v5827_v28   ;;  %5873 = vperm.xlu1 %12183, %v5832_v29   ;;  %v10102_v28 = vld [vmem:[%s15398_s5 + $0x128] sm:$0xff] }
 0xbfb   : > { %v11357_v31 = vpop.f32.mrb[48].mxu0 }
 0xbfc   : > { %v5981_v33 = vpop.f32.mrb[49].mxu0  ;;  %v5990_v44 = vadd.f32 %v11357_v31, %v10074_v41  ;;  %v10122_v41 = vld [vmem:[%s15398_s5 + $0x140] sm:$0xff] }
 0xbfd   : > { %v11358_v37 = vpop.f32.mrb[50].mxu0  ;;  %v5982_v54 = vadd.f32 %v10072_v49, %v5981_v33  ;;  %v10103_v33 = vld [vmem:[%s15398_s5 + $0x130] sm:$0xff]  ;;  %v10125_v49 = vld [vmem:[%s15398_s5 + $0x158] sm:$0xff] }
 0xbfe   : > { %v5984_v38 = vpop.f32.mrb[51].mxu0  ;;  %5863 = vperm.xlu1 %12183, %v5824_v32   ;;  %v5993_v45 = vadd.f32 %v11358_v37, %v10075_v56 }
 0xbff   : > { %v5985_v39 = vadd.f32 %v10073_v34, %v5984_v38  ;;  %v10124_v34 = vld [vmem:[%s15398_s5 + $0x150] sm:$0xff] }
 0xc01   : > { %6022 = vperm.xlu0 %12182, %v5985_v39  }
 0xc02   : > { %5878 = vperm.xlu1 %12183, %v5835_v40   ;;  %v10104_v40 = vld [vmem:[%s15398_s5 + $0x138] sm:$0xff] }
 0xc03   : > { %v11361_v43 = vpop.f32.mrb[52].mxu0 }
 0xc04   : > { %v5997_v46 = vpop.f32.mrb[53].mxu0  ;;  %v6006_v62 = vadd.f32 %v11361_v43, %v10078_v55 }
 0xc05   : > { %v11362_v16 = vpop.f32.mrb[54].mxu0  ;;  %v5998_v61 = vadd.f32 %v10076_v4, %v5997_v46 }
 0xc06   : > { %v6000_v51 = vpop.f32.mrb[55].mxu0  ;;  %6027 = vperm.xlu1 %12183, %v5990_v44   ;;  %v6009_v25 = vadd.f32 %v11362_v16, %v10079_v3  ;;  %v10123_v16 = vld [vmem:[%s15398_s5 + $0x148] sm:$0xff] }
 0xc07   : > { %v6001_v50 = vadd.f32 %v10077_v47, %v6000_v51 }
 0xc09   : > { %6042 = vperm.xlu0 %12182, %v6001_v50  }
 0xc0a   : > { %6017 = vperm.xlu1 %12183, %v5982_v54  }
 0xc0b   : > { %v11373_v58 = vpop.f32.mrb[56].mxu0 }
 0xc0c   : > { %v6164_v42 = vadd.f32 %v11373_v58, %v10099_v52  ;;  %v6155_v53 = vpop.f32.mrb[57].mxu0  ;;  %v10128_v52 = vld [vmem:[%s15398_s5 + $0x170] sm:$0xff]  ;;  %v10126_v58 = vld [vmem:[%s15398_s5 + $0x160] sm:$0xff] }
 0xc0d   : > { %v11374_v11 = vpop.f32.mrb[58].mxu0  ;;  %v6156_v2 = vadd.f32 %v10097_v57, %v6155_v53  ;;  %v10129_v57 = vld [vmem:[%s15398_s5 + $0x178] sm:$0xff] }
 0xc0e   : > { %6201 = vperm.xlu0 %12182, %v6164_v42   ;;  %6032 = vperm.xlu1 %12183, %v5993_v45   ;;  %v6158_v59 = vpop.f32.mrb[59].mxu0  ;;  %v6167_v30 = vadd.f32 %v11374_v11, %v10100_v27  ;;  %v10149_v11 = vld [vmem:[%s15398_s5 + $0x190] sm:$0xff] }
 0xc0f   : > { %v6159_v63 = vadd.f32 %v10098_v7, %v6158_v59  ;;  %v10127_v7 = vld [vmem:[%s15398_s5 + $0x168] sm:$0xff] }
 0xc12   : > { %6191 = vperm.xlu0 %12182, %v6156_v2   ;;  %6047 = vperm.xlu1 %12183, %v6006_v62  }
 0xc13   : > { %v11377_v60 = vpop.f32.mrb[60].mxu0 }
 0xc14   : > { %v6171_v0 = vpop.f32.mrb[61].mxu0  ;;  %v6180_v38 = vadd.f32 %v11377_v60, %v10103_v33  ;;  %v10147_v60 = vld [vmem:[%s15398_s5 + $0x180] sm:$0xff] }
 0xc15   : > { %v11378_v20 = vpop.f32.mrb[62].mxu0  ;;  %v6172_v26 = vadd.f32 %v10101_v5, %v6171_v0  ;;  %v10150_v5 = vld [vmem:[%s15398_s5 + $0x198] sm:$0xff] }
 0xc16   : > { %6196 = vperm.xlu0 %12182, %v6159_v63   ;;  %6037 = vperm.xlu1 %12183, %v5998_v61   ;;  %v6174_v24 = vpop.f32.mrb[63].mxu0  ;;  %v6183_v44 = vadd.f32 %v11378_v20, %v10104_v40  ;;  %v10148_v20 = vld [vmem:[%s15398_s5 + $0x188] sm:$0xff] }
 0xc17   : > { %v6175_v31 = vadd.f32 %v10102_v28, %v6174_v24  ;;  %v10153_v28 = vld [vmem:[%s15398_s5 + $0x1b0] sm:$0xff] }
 0xc1a   : > { %6211 = vperm.xlu0 %12182, %v6172_v26   ;;  %6052 = vperm.xlu1 %12183, %v6009_v25  }
 0xc1b   : > { %v11389_v29 = vpop.f32.mrb[64].mxu0 }
 0xc1c   : > { %v6329_v32 = vpop.f32.mrb[65].mxu0  ;;  %v6338_v39 = vadd.f32 %v11389_v29, %v10124_v34  ;;  %v10151_v29 = vld [vmem:[%s15398_s5 + $0x1a0] sm:$0xff]  ;;  %v10154_v34 = vld [vmem:[%s15398_s5 + $0x1b8] sm:$0xff] }
 0xc1d   : > { %v11390_v35 = vpop.f32.mrb[66].mxu0  ;;  %v6330_v46 = vadd.f32 %v10122_v41, %v6329_v32  ;;  %v10152_v41 = vld [vmem:[%s15398_s5 + $0x1a8] sm:$0xff] }
 0xc1e   : > { %6216 = vperm.xlu0 %12182, %v6175_v31   ;;  %6206 = vperm.xlu1 %12183, %v6167_v30   ;;  %v6332_v37 = vpop.f32.mrb[67].mxu0  ;;  %v6341_v54 = vadd.f32 %v11390_v35, %v10125_v49  ;;  %v10174_v35 = vld [vmem:[%s15398_s5 + $0x1d0] sm:$0xff] }
 0xc1f   : > { %v6333_v56 = vadd.f32 %v10123_v16, %v6332_v37  ;;  %v10175_v16 = vld [vmem:[%s15398_s5 + $0x1d8] sm:$0xff] }
 0xc22   : > { %6375 = vperm.xlu0 %12182, %v6338_v39   ;;  %6221 = vperm.xlu1 %12183, %v6180_v38  }
 0xc23   : > { %v11393_v43 = vpop.f32.mrb[68].mxu0 }
 0xc24   : > { %v6345_v47 = vpop.f32.mrb[69].mxu0  ;;  %v6354_v42 = vadd.f32 %v11393_v43, %v10128_v52  ;;  %v10172_v43 = vld [vmem:[%s15398_s5 + $0x1c0] sm:$0xff] }
 0xc25   : > { %v11394_v51 = vpop.f32.mrb[70].mxu0  ;;  %v6346_v53 = vadd.f32 %v10126_v58, %v6345_v47  ;;  %v10178_v58 = vld [vmem:[%s15398_s5 + $0x1f0] sm:$0xff] }
 0xc26   : > { %6365 = vperm.xlu0 %12182, %v6330_v46   ;;  %6226 = vperm.xlu1 %12183, %v6183_v44   ;;  %v6348_v50 = vpop.f32.mrb[71].mxu0  ;;  %v6357_v2 = vadd.f32 %v11394_v51, %v10129_v57  ;;  %v10173_v51 = vld [vmem:[%s15398_s5 + $0x1c8] sm:$0xff] }
 0xc27   : > { %v6349_v63 = vadd.f32 %v10127_v7, %v6348_v50 }
 0xc2a   : > { %6370 = vperm.xlu0 %12182, %v6333_v56   ;;  %6380 = vperm.xlu1 %12183, %v6341_v54  }
 0xc2b   : > { %v11405_v45 = vpop.f32.mrb[72].mxu0 }
 0xc2c   : > { %v6503_v55 = vpop.f32.mrb[73].mxu0  ;;  %v6512_v4 = vadd.f32 %v11405_v45, %v10149_v11  ;;  %v10176_v45 = vld [vmem:[%s15398_s5 + $0x1e0] sm:$0xff]  ;;  %v10179_v11 = vld [vmem:[%s15398_s5 + $0x1f8] sm:$0xff] }
 0xc2d   : > { %v11406_v59 = vpop.f32.mrb[74].mxu0  ;;  %v6504_v0 = vadd.f32 %v10147_v60, %v6503_v55 }
 0xc2e   : > { %6385 = vperm.xlu0 %12182, %v6346_v53   ;;  %6395 = vperm.xlu1 %12183, %v6354_v42   ;;  %v6506_v62 = vpop.f32.mrb[75].mxu0  ;;  %v6515_v26 = vadd.f32 %v11406_v59, %v10150_v5 }
 0xc2f   : > { %v6507_v27 = vadd.f32 %v10148_v20, %v6506_v62  ;;  %v10197_v62 = vld [vmem:[%s15398_s5 + $0x200] sm:$0xff] }
 0xc32   : > { %6400 = vperm.xlu0 %12182, %v6357_v2   ;;  %6549 = vperm.xlu1 %12183, %v6512_v4  }
 0xc33   : > { %v11409_v61 = vpop.f32.mrb[76].mxu0 }
 0xc34   : > { %v6519_v3 = vpop.f32.mrb[77].mxu0  ;;  %v6528_v31 = vadd.f32 %v11409_v61, %v10153_v28  ;;  %v10177_v61 = vld [vmem:[%s15398_s5 + $0x1e8] sm:$0xff]  ;;  %v10201_v28 = vld [vmem:[%s15398_s5 + $0x220] sm:$0xff] }
 0xc35   : > { %v11410_v24 = vpop.f32.mrb[78].mxu0  ;;  %v6520_v32 = vadd.f32 %v10151_v29, %v6519_v3 }
 0xc36   : > { %6390 = vperm.xlu0 %12182, %v6349_v63   ;;  %6539 = vperm.xlu1 %12183, %v6504_v0   ;;  %v6522_v25 = vpop.f32.mrb[79].mxu0  ;;  %v6531_v39 = vadd.f32 %v11410_v24, %v10154_v34  ;;  %v10198_v0 = vld [vmem:[%s15398_s5 + $0x208] sm:$0xff] }
 0xc37   : > { %v6523_v46 = vadd.f32 %v10152_v41, %v6522_v25  ;;  %v10203_v41 = vld [vmem:[%s15398_s5 + $0x230] sm:$0xff] }
 0xc3a   : > { %6544 = vperm.xlu0 %12182, %v6507_v27   ;;  %6554 = vperm.xlu1 %12183, %v6515_v26   ;;  %v10199_v26 = vld [vmem:[%s15398_s5 + $0x210] sm:$0xff] }
 0xc3b   : > { %v11421_v30 = vpop.f32.mrb[80].mxu0 }
 0xc3c   : > { %v6677_v33 = vpop.f32.mrb[81].mxu0  ;;  %v6686_v40 = vadd.f32 %v11421_v30, %v10174_v35 }
 0xc3d   : > { %v11422_v37 = vpop.f32.mrb[82].mxu0  ;;  %v6678_v47 = vadd.f32 %v10172_v43, %v6677_v33  ;;  %v10200_v33 = vld [vmem:[%s15398_s5 + $0x218] sm:$0xff] }
 0xc3e   : > { %6559 = vperm.xlu0 %12182, %v6520_v32   ;;  %6569 = vperm.xlu1 %12183, %v6528_v31   ;;  %v6680_v38 = vpop.f32.mrb[83].mxu0  ;;  %v6689_v56 = vadd.f32 %v11422_v37, %v10175_v16  ;;  %v10222_v37 = vld [vmem:[%s15398_s5 + $0x240] sm:$0xff] }
 0xc3f   : > { %v6681_v52 = vadd.f32 %v10173_v51, %v6680_v38 }
 0xc42   : > { %6574 = vperm.xlu0 %12182, %v6531_v39   ;;  %6723 = vperm.xlu1 %12183, %v6686_v40  }
 0xc43   : > { %v11425_v44 = vpop.f32.mrb[84].mxu0 }
 0xc44   : > { %v6693_v49 = vpop.f32.mrb[85].mxu0  ;;  %v6702_v53 = vadd.f32 %v11425_v44, %v10178_v58  ;;  %v10223_v58 = vld [vmem:[%s15398_s5 + $0x248] sm:$0xff] }
 0xc45   : > { %v11426_v50 = vpop.f32.mrb[86].mxu0  ;;  %v6694_v55 = vadd.f32 %v10176_v45, %v6693_v49 }
 0xc46   : > { %6564 = vperm.xlu0 %12182, %v6523_v46   ;;  %6713 = vperm.xlu1 %12183, %v6678_v47   ;;  %v6696_v54 = vpop.f32.mrb[87].mxu0  ;;  %v6705_v7 = vadd.f32 %v11426_v50, %v10179_v11  ;;  %v10225_v47 = vld [vmem:[%s15398_s5 + $0x258] sm:$0xff] }
 0xc47   : > { %v6697_v5 = vadd.f32 %v10177_v61, %v6696_v54  ;;  %v10204_v50 = vld [vmem:[%s15398_s5 + $0x238] sm:$0xff] }
 0xc4a   : > { %6718 = vperm.xlu0 %12182, %v6681_v52   ;;  %6728 = vperm.xlu1 %12183, %v6689_v56  }
 0xc4b   : > { %v11437_v42 = vpop.f32.mrb[88].mxu0 }
 0xc4c   : > { %v6851_v57 = vpop.f32.mrb[89].mxu0  ;;  %v6860_v31 = vadd.f32 %v11437_v42, %v10199_v26 }
 0xc4d   : > { %v14470_v59 = vpop.permute.xlu1 %5505  ;;  %v11438_v2 = vpop.f32.mrb[90].mxu0  ;;  %v6852_v60 = vadd.f32 %v10197_v62, %v6851_v57  ;;  %v10202_v57 = vld [vmem:[%s15398_s5 + $0x228] sm:$0xff] }
 0xc4e   : > { %6733 = vperm.xlu0 %12182, %v6694_v55   ;;  %6743 = vperm.xlu1 %12183, %v6702_v53   ;;  %v6854_v4 = vpop.f32.mrb[91].mxu0  ;;  %v6863_v39 = vadd.f32 %v11438_v2, %v10200_v33  ;;  %v10226_v55 = vld [vmem:[%s15398_s5 + $0x260] sm:$0xff] }
 0xc4f   : > { %v14483_v20 = vpop.permute.xlu0 %5510  ;;  %v6855_v24 = vadd.f32 %v10198_v0, %v6854_v4  ;;  %v10224_v0 = vld [vmem:[%s15398_s5 + $0x250] sm:$0xff] }
 0xc51   : > { %v14478_v63 = vpop.permute.xlu1 %5495 }
 0xc52   : > { %6887 = vperm.xlu0 %12182, %v6852_v60   ;;  %6748 = vperm.xlu1 %12183, %v6705_v7  }
 0xc53   : > { %v11441_v3 = vpop.f32.mrb[92].mxu0 }
 0xc54   : > { %v6867_v25 = vpop.f32.mrb[93].mxu0  ;;  %v6876_v51 = vadd.f32 %v11441_v3, %v10203_v41  ;;  %v10247_v41 = vld [vmem:[%s15398_s5 + $0x280] sm:$0xff] }
 0xc55   : > { %v14488_v27 = vpop.permute.xlu1 %5500  ;;  %v11442_v29 = vpop.f32.mrb[94].mxu0  ;;  %v6868_v32 = vadd.f32 %v10201_v28, %v6867_v25  ;;  %v10249_v25 = vld [vmem:[%s15398_s5 + $0x290] sm:$0xff] }
 0xc56   : > { %6892 = vperm.xlu0 %12182, %v6855_v24   ;;  %6738 = vperm.xlu1 %12183, %v6697_v5   ;;  %v6870_v30 = vpop.f32.mrb[95].mxu0  ;;  %v6879_v42 = vadd.f32 %v11442_v29, %v10204_v50  ;;  %v10227_v24 = vld [vmem:[%s15398_s5 + $0x268] sm:$0xff] }
 0xc57   : > { %v14496_v34 = vpop.permute.xlu0 %5530  ;;  %v6871_v61 = vadd.f32 %v10202_v57, %v6870_v30 }
 0xc59   : > { %v14498_v35 = vpop.permute.xlu1 %5525 }
 0xc5a   : > { %6907 = vperm.xlu0 %12182, %v6868_v32   ;;  %6897 = vperm.xlu1 %12183, %v6860_v31   ;;  %v10229_v32 = vld [vmem:[%s15398_s5 + $0x278] sm:$0xff] }
 0xc5b   : > { %v11453_v38 = vpop.f32.mrb[96].mxu0 }
 0xc5c   : > { %v7025_v40 = vpop.f32.mrb[97].mxu0  ;;  %v7034_v28 = vadd.f32 %v11453_v38, %v10224_v0  ;;  %v10228_v38 = vld [vmem:[%s15398_s5 + $0x270] sm:$0xff] }
 0xc5d   : > { %v7026_v43 = vadd.f32 %v10222_v37, %v7025_v40  ;;  %v14506_v44 = vpop.permute.xlu0 %5679  ;;  %v14508_v46 = vpop.permute.xlu1 %5515 }
 0xc5e   : > { %6902 = vperm.xlu1 %12183, %v6863_v39   ;;  %v11454_v49 = vpop.f32.mrb[98].mxu0 }
 0xc5f   : > { %7061 = vperm.xlu0 %12182, %v7026_v43   ;;  %v7028_v16 = vpop.f32.mrb[99].mxu0  ;;  %v7037_v54 = vadd.f32 %v11454_v49, %v10225_v47 }
 0xc60   : > { %v7029_v11 = vadd.f32 %v10223_v58, %v7028_v16  ;;  %v10253_v16 = vld [vmem:[%s15398_s5 + $0x2b0] sm:$0xff] }
 0xc61   : > { %v14516_v56 = vpop.permute.xlu0 %5669  ;;  %v14518_v52 = vpop.permute.xlu1 %5520 }
 0xc62   : > { %6917 = vperm.xlu1 %12183, %v6876_v51  }
 0xc63   : > { %7076 = vperm.xlu0 %12182, %v7037_v54   ;;  %v11457_v45 = vpop.f32.mrb[100].mxu0 }
 0xc64   : > { %v7041_v53 = vpop.f32.mrb[101].mxu0  ;;  %v7050_v50 = vadd.f32 %v11457_v45, %v10228_v38 }
 0xc65   : > { %v14529_v62 = vpop.permute.xlu0 %5674  ;;  %v14531_v2 = vpop.permute.xlu1 %5684  ;;  %v7042_v7 = vadd.f32 %v10226_v55, %v7041_v53  ;;  %v14569_v53 = vmul.u32 2, %v13084_v10  ;;  %v10250_v55 = vld [vmem:[%s15398_s5 + $0x298] sm:$0xff]  ;;  %v14582_v10 = vmul.u32 2, %v13078_v8 }
 0xc66   : > { %6922 = vperm.xlu1 %12183, %v6879_v42   ;;  %v11458_v4 = vpop.f32.mrb[102].mxu0 }
 0xc67   : > { %7066 = vperm.xlu0 %12182, %v7029_v11   ;;  %v7044_v60 = vpop.f32.mrb[103].mxu0  ;;  %v7053_v43 = vadd.f32 %v11458_v4, %v10229_v32  ;;  %15399 = vst [vmem:[#allocation30_spill] sm:$0xff] %v14569_v53  ;;  %15400 = vst [vmem:[#allocation31_spill] sm:$0xff] %v14582_v10  ;;  %v7292_v0 = vadd.s32 16, %v14569_v53 }
 0xc68   : > { %v7045_v30 = vadd.f32 %v10227_v24, %v7044_v60  ;;  %v10251_v24 = vld [vmem:[%s15398_s5 + $0x2a0] sm:$0xff] }
 0xc69   : > { %v14536_v3 = vpop.permute.xlu0 %5699  ;;  %v14538_v5 = vpop.permute.xlu1 %5704  ;;  %vm7294_vm8 = vcmp.eq.s32.totalorder %v13081_v9, %v7292_v0 }
 0xc6a   : > { %6912 = vperm.xlu1 %12183, %v6871_v61   ;;  %v10248_v61 = vld [vmem:[%s15398_s5 + $0x288] sm:$0xff] }
 0xc6b   : > { %7081 = vperm.xlu0 %12182, %v7042_v7   ;;  %v11469_v26 = vpop.f32.mrb[104].mxu0 }
 0xc6c   : > { %v7199_v29 = vpop.f32.mrb[105].mxu0  ;;  %v7208_v37 = vadd.f32 %v11469_v26, %v10249_v25  ;;  %v7291_v25 = vadd.s32 16, %v14582_v10 }
 0xc6d   : > { %v14546_v31 = vpop.permute.xlu1 %5853  ;;  %v14551_v33 = vpop.permute.xlu0 %5689  ;;  %v7200_v49 = vadd.f32 %v10247_v41, %v7199_v29  ;;  %v10265_v29 = vsel %vm7294_vm8, 1.0, %v15298_v36  ;;  %vm6186_vm8 = vcmp.eq.s32.totalorder %v13081_v9, 4 }
 0xc6e   : > { %7071 = vperm.xlu1 %12183, %v7034_v28   ;;  %v11470_v39 = vpop.f32.mrb[106].mxu0  ;;  %vm7293_vm14 = vcmp.eq.s32.totalorder %v13081_v9, %v7291_v25 }
 0xc6f   : > { %7086 = vperm.xlu0 %12182, %v7045_v30   ;;  %v7202_v40 = vpop.f32.mrb[107].mxu0  ;;  %v7211_v7 = vadd.f32 %v11470_v39, %v10250_v55  ;;  %v11709_v30 = vpack.c.bf16 %v10265_v29, %v12682_v48  ;;  %vm11710_vm0 = vmpackc.low %vm7324_vm15, %vm7293_vm14  ;;  %v10254_v48 = vld [vmem:[%s15398_s5 + $0x2b8] sm:$0xff]  ;;  %vm6360_vm14 = vcmp.eq.s32.totalorder %v13081_v9, 5  ;;  %vm6534_vm15 = vcmp.eq.s32.totalorder %v13081_v9, 6 }
 0xc70   : > { %v7203_v26 = vadd.f32 %v10248_v61, %v7202_v40  ;;  %v10252_v40 = vld [vmem:[%s15398_s5 + $0x2a8] sm:$0xff] }
 0xc71   : > { %v14559_v47 = vpop.permute.xlu1 %5843  ;;  %v14564_v54 = vpop.permute.xlu0 %5694  ;;  %11711 = vmatprep.subr.msk.bf16.mxu0 %vm11710_vm0, %v11709_v30 }
 0xc72   : > { %7245 = vperm.xlu1 %12183, %v7208_v37   ;;  %11714 = vmatpush3.bf16.msk.msra.mxu0 %vm11710_vm0, %v11709_v30  ;;  %vm6708_vm0 = vcmp.eq.s32.totalorder %v13081_v9, 7 }
 0xc73   : > { %7096 = vperm.xlu0 %12182, %v7053_v43   ;;  %v11473_v51 = vpop.f32.mrb[108].mxu0 }
 0xc74   : > { %v7215_v58 = vpop.f32.mrb[109].mxu0  ;;  %v7224_v57 = vadd.f32 %v11473_v51, %v10253_v16 }
 0xc75   : > { %v14566_v42 = vpop.permute.xlu1 %5858  ;;  %v11474_v11 = vpop.f32.mrb[110].mxu0  ;;  %v7216_v32 = vadd.f32 %v10251_v24, %v7215_v58 }
 0xc76   : > { %7091 = vperm.xlu1 %12183, %v7050_v50   ;;  %v7218_v4 = vpop.f32.mrb[111].mxu0  ;;  %v14576_v45 = vpop.permute.xlu0 %5848  ;;  %v7227_v16 = vadd.f32 %v11474_v11, %v10254_v48 }
 0xc77   : > { %7235 = vperm.xlu0 %12182, %v7200_v49   ;;  %v7219_v38 = vadd.f32 %v10252_v40, %v7218_v4 }
 0xc79   : > { %v14574_v60 = vpop.permute.xlu1 %5873 }
 0xc7a   : > { %7265 = vperm.xlu1 %12183, %v7224_v57   ;;  %v14595_v37 = vpop.permute.xlu0 %5868 }
 0xc7b   : > { %7250 = vperm.xlu0 %12182, %v7211_v7  }
 0xc7d   : > { %v14590_v28 = vpop.permute.xlu1 %5863 }
 0xc7f   : > { %7240 = vperm.xlu0 %12182, %v7203_v26  }
 0xc80   : > { %v14602_v41 = vpop.permute.xlu0 %6022 }
 0xc81   : > { %v14597_v39 = vpop.permute.xlu1 %5878 }
 0xc83   : > { %7255 = vperm.xlu0 %12182, %v7216_v32  }
 0xc85   : > { %v14604_v43 = vpop.permute.xlu1 %6027 }
 0xc87   : > { %7260 = vperm.xlu0 %12182, %v7219_v38  }
 0xc88   : > { %v14609_v49 = vpop.permute.xlu0 %6042 }
 0xc89   : > { %v14611_v51 = vpop.permute.xlu1 %6017 }
 0xc8b   : > { %7270 = vperm.xlu0 %12182, %v7227_v16  }
 0xc8d   : > { %v14613_v50 = vpop.permute.xlu0 %6201  ;;  %v14615_v58 = vpop.permute.xlu1 %6032 }
 0xc91   : > { %v14617_v55 = vpop.permute.xlu0 %6191  ;;  %v14619_v57 = vpop.permute.xlu1 %6047 }
 0xc95   : > { %v14621_v4 = vpop.permute.xlu0 %6196  ;;  %v14623_v7 = vpop.permute.xlu1 %6037 }
 0xc99   : > { %v14625_v61 = vpop.permute.xlu0 %6211  ;;  %v14627_v0 = vpop.permute.xlu1 %6052 }
 0xc9d   : > { %v14629_v11 = vpop.permute.xlu0 %6216  ;;  %v14631_v24 = vpop.permute.xlu1 %6206 }
 0xca1   : > { %v14633_v25 = vpop.permute.xlu0 %6375  ;;  %v14635_v26 = vpop.permute.xlu1 %6221 }
 0xca5   : > { %v14637_v29 = vpop.permute.xlu0 %6365  ;;  %v14639_v30 = vpop.permute.xlu1 %6226 }
 0xca6   : > { %15401 = vst [vmem:[#allocation32_spill] sm:$0xff] %v14639_v30 }
 0xca9   : > { %v14641_v32 = vpop.permute.xlu0 %6370  ;;  %v14643_v40 = vpop.permute.xlu1 %6380 }
 0xcaa   : > { %15402 = vst [vmem:[#allocation33_spill] sm:$0xff] %v14641_v32  ;;  %15403 = vst [vmem:[#allocation34_spill] sm:$0xff] %v14643_v40 }
 0xcad   : > { %v14645_v38 = vpop.permute.xlu0 %6385  ;;  %v14647_v48 = vpop.permute.xlu1 %6395 }
 0xcae   : > { %15404 = vst [vmem:[#allocation35_spill] sm:$0xff] %v14645_v38  ;;  %15405 = vst [vmem:[#allocation36_spill] sm:$0xff] %v14647_v48 }
 0xcb1   : > { %v14649_v16 = vpop.permute.xlu0 %6400  ;;  %v14651_v6 = vpop.permute.xlu1 %6549 }
 0xcb2   : > { %15406 = vst [vmem:[#allocation37_spill] sm:$0xff] %v14649_v16  ;;  %15407 = vst [vmem:[#allocation38_spill] sm:$0xff] %v14651_v6 }
 0xcb5   : > { %v14653_v1 = vpop.permute.xlu0 %6390  ;;  %v14655_v19 = vpop.permute.xlu1 %6539 }
 0xcb6   : > { %15408 = vst [vmem:[#allocation39_spill] sm:$0xff] %v14653_v1 }
 0xcb9   : > { %v14657_v36 = vpop.permute.xlu0 %6544  ;;  %v14659_v8 = vpop.permute.xlu1 %6554 }
 0xcba   : > { %15409 = vst [vmem:[#allocation40_spill] sm:$0xff] %v14657_v36  ;;  %15410 = vst [vmem:[#allocation41_spill] sm:$0xff] %v14659_v8 }
 0xcbd   : > { %v14661_v23 = vpop.permute.xlu0 %6559  ;;  %v14663_v22 = vpop.permute.xlu1 %6569 }
 0xcbe   : > { %15411 = vst [vmem:[#allocation42_spill] sm:$0xff] %v14661_v23  ;;  %15412 = vst [vmem:[#allocation43_spill] sm:$0xff] %v14663_v22 }
 0xcc1   : > { %v14665_v21 = vpop.permute.xlu0 %6574  ;;  %v14667_v18 = vpop.permute.xlu1 %6723 }
 0xcc2   : > { %15413 = vst [vmem:[#allocation44_spill] sm:$0xff] %v14665_v21  ;;  %15414 = vst [vmem:[#allocation45_spill] sm:$0xff] %v14667_v18 }
 0xcc5   : > { %v14669_v17 = vpop.permute.xlu0 %6564  ;;  %v14671_v15 = vpop.permute.xlu1 %6713 }
 0xcc6   : > { %15415 = vst [vmem:[#allocation46_spill] sm:$0xff] %v14669_v17 }
 0xcc9   : > { %v14673_v14 = vpop.permute.xlu0 %6718  ;;  %v14675_v13 = vpop.permute.xlu1 %6728 }
 0xcca   : > { %15416 = vst [vmem:[#allocation47_spill] sm:$0xff] %v14673_v14  ;;  %15417 = vst [vmem:[#allocation48_spill] sm:$0xff] %v14675_v13 }
 0xccd   : > { %v14677_v12 = vpop.permute.xlu0 %6733  ;;  %v14679_v53 = vpop.permute.xlu1 %6743 }
 0xcce   : > { %15418 = vst [vmem:[#allocation49_spill] sm:$0xff] %v14677_v12  ;;  %15419 = vst [vmem:[#allocation50_spill] sm:$0xff] %v14679_v53  ;;  %v15426_v12 = vmov 0.0  }
 0xccf   : > { %v14706_v13 = vsel %vm6012_vm5, 1.0, %v15426_v12  ;;  %v14713_v18 = vsel %vm6360_vm14, 1.0, %v15426_v12  ;;  %v14716_v14 = vsel %vm6534_vm15, 1.0, %v15426_v12  ;;  %v14719_v8 = vsel %vm6708_vm0, 1.0, %v15426_v12 }
 0xcd0   : > { %15427 = vst [vmem:[#allocation57_spill] sm:$0xff] %v14719_v8  ;;  %v14727_v48 = vsel %vm6882_vm9, 1.0, %v15426_v12  ;;  %vm7230_vm9 = vcmp.eq.s32.totalorder %v13081_v9, 10 }
 0xcd1   : > { %v14681_v10 = vpop.permute.xlu0 %6887  ;;  %v14683_v23 = vpop.permute.xlu1 %6748  ;;  %15429 = vst [vmem:[#allocation59_spill] sm:$0xff] %v14727_v48 }
 0xcd2   : > { %15420 = vst [vmem:[#allocation51_spill] sm:$0xff] %v14681_v10  ;;  %15421 = vst [vmem:[#allocation52_spill] sm:$0xff] %v14683_v23  ;;  %v10013_v23 = vsel %vm5490_vm3, 1.0, %v15426_v12  ;;  %vm7056_vm3 = vcmp.eq.s32.totalorder %v13081_v9, 9 }
 0xcd3   : > { %v5536_v36 = vmul.f32 %v10013_v23, %v14483_v20  ;;  %v5533_v38 = vmul.f32 %v10013_v23, %v14478_v63  ;;  %v5540_v20 = vmul.f32 %v10013_v23, %v14496_v34  ;;  %v5537_v48 = vmul.f32 %v10013_v23, %v14508_v46 }
 0xcd4   : > { %v14747_v34 = vsel %vm7056_vm3, 1.0, %v15426_v12 }
 0xcd5   : > { %v14685_v22 = vpop.permute.xlu0 %6892  ;;  %v14687_v21 = vpop.permute.xlu1 %6738 }
 0xcd6   : > { %15422 = vst [vmem:[#allocation53_spill] sm:$0xff] %v14685_v22  ;;  %15423 = vst [vmem:[#allocation54_spill] sm:$0xff] %v14687_v21  ;;  %v10038_v21 = vsel %vm5664_vm7, 1.0, %v15426_v12  ;;  %v10063_v22 = vsel %vm5838_vm12, 1.0, %v15426_v12  ;;  %vm7299_vm7 = vcmask 89088  }
 0xcd7   : > { %v5709_v6 = vmul.f32 %v10038_v21, %v14506_v44  ;;  %v5707_v16 = vmul.f32 %v10038_v21, %v14516_v56  ;;  %v5708_v10 = vmul.f32 %v10038_v21, %v14529_v62  ;;  %v5710_v40 = vmul.f32 %v10038_v21, %v14531_v2 }
 0xcd8   : > { %v5539_v44 = vmul.f32 %v10013_v23, %v14498_v35  ;;  %v5713_v56 = vmul.f32 %v10038_v21, %v14536_v3  ;;  %v5711_v63 = vmul.f32 %v10038_v21, %v14551_v33  ;;  %v5883_v62 = vmul.f32 %v10063_v22, %v14546_v31 }
 0xcd9   : > { %v14694_v17 = vpop.permute.xlu0 %6907  ;;  %v14696_v53 = vpop.permute.xlu1 %6897  ;;  %v5715_v30 = vadd.f32 %v5707_v16, %v5533_v38  ;;  %v5718_v8 = vadd.f32 %v5710_v40, %v5536_v36  ;;  %v5712_v46 = vmul.f32 %v10038_v21, %v14564_v54  ;;  %v5881_v31 = vmul.f32 %v10063_v22, %v14559_v47 }
 0xcda   : > { %15424 = vst [vmem:[#allocation55_spill] sm:$0xff] %v14694_v17  ;;  %15425 = vst [vmem:[#allocation56_spill] sm:$0xff] %v14696_v53  ;;  %v14709_v17 = vsel %vm6186_vm8, 1.0, %v15426_v12  ;;  %v5535_v53 = vmul.f32 %v10013_v23, %v14470_v59  ;;  %v5882_v33 = vmul.f32 %v10063_v22, %v14576_v45  ;;  %v5886_v38 = vmul.f32 %v10063_v22, %v14595_v37 }
 0xcdb   : > { %v6056_v36 = vmul.f32 %v14706_v13, %v14602_v41  ;;  %v14766_v47 = vsel %vm7230_vm9, 1.0, %v15426_v12  ;;  %v5888_v45 = vmul.f32 %v10063_v22, %v14597_v39  ;;  %v6055_v37 = vmul.f32 %v14706_v13, %v14611_v51 }
 0xcdc   : > { %v5717_v2 = vadd.f32 %v5709_v6, %v5535_v53  ;;  %v5884_v6 = vmul.f32 %v10063_v22, %v14566_v42  ;;  %v6060_v41 = vmul.f32 %v14706_v13, %v14609_v49  ;;  %v6059_v51 = vmul.f32 %v14706_v13, %v14623_v7 }
 0xcdd   : > { %v14721_v1 = vpop.permute.xlu1 %6902  ;;  %v6233_v7 = vmul.f32 %v14709_v17, %v14625_v61  ;;  %v6405_v61 = vmul.f32 %v14713_v18, %v14633_v25  ;;  %vm8137_vm9 = vcmask 302080  }
 0xcde   : > { %15428 = vst [vmem:[#allocation58_spill] sm:$0xff] %v14721_v1  ;;  %v14729_v59 = vpop.permute.xlu0 %7061  ;;  %v5534_v1 = vmul.f32 %v10013_v23, %v14488_v27  ;;  %v5538_v27 = vmul.f32 %v10013_v23, %v14518_v52  ;;  %v5719_v23 = vadd.f32 %v5711_v63, %v5537_v48  ;;  %v5891_v52 = vadd.f32 %v5883_v62, %v5717_v2 }
 0xcdf   : > { %15430 = vst [vmem:[#allocation60_spill] sm:$0xff] %v14729_v59  ;;  %v5714_v59 = vmul.f32 %v10038_v21, %v14538_v5  ;;  %v5721_v5 = vadd.f32 %v5713_v56, %v5539_v44  ;;  %v5885_v21 = vmul.f32 %v10063_v22, %v14590_v28  ;;  %v5892_v28 = vadd.f32 %v5884_v6, %v5718_v8 }
 0xce0   : > { %v5716_v3 = vadd.f32 %v5708_v10, %v5534_v1  ;;  %v5887_v1 = vmul.f32 %v10063_v22, %v14574_v60  ;;  %v5720_v42 = vadd.f32 %v5712_v46, %v5538_v27  ;;  %v6057_v10 = vmul.f32 %v14706_v13, %v14604_v43 }
 0xce1   : > { %v14743_v32 = vpop.permute.xlu1 %6917  ;;  %v5722_v53 = vadd.f32 %v5714_v59, %v5540_v20  ;;  %v5889_v60 = vadd.f32 %v5881_v31, %v5715_v30  ;;  %v6231_v59 = vmul.f32 %v14709_v17, %v14613_v50  ;;  %v6058_v20 = vmul.f32 %v14706_v13, %v14615_v58 }
 0xce2   : > { %v14749_v35 = vpop.permute.xlu0 %7076  ;;  %v5890_v40 = vadd.f32 %v5882_v33, %v5716_v3  ;;  %v5894_v48 = vadd.f32 %v5886_v38, %v5720_v42  ;;  %v6229_v22 = vmul.f32 %v14709_v17, %v14617_v55  ;;  %v5895_v39 = vadd.f32 %v5887_v1, %v5721_v5  ;;  %v15434_v1 = vld [vmem:[#allocation34_spill] sm:$0xff] }
 0xce3   : > { %v5893_v43 = vadd.f32 %v5885_v21, %v5719_v23  ;;  %v5896_v30 = vadd.f32 %v5888_v45, %v5722_v53  ;;  %v6065_v49 = vadd.f32 %v6057_v10, %v5891_v52  ;;  %v6063_v56 = vadd.f32 %v6055_v37, %v5889_v60  ;;  %v15432_v52 = vld [vmem:[#allocation32_spill] sm:$0xff]  ;;  %v15437_v60 = vld [vmem:[#allocation35_spill] sm:$0xff] }
 0xce4   : > { %v6064_v44 = vadd.f32 %v6056_v36, %v5890_v40  ;;  %v6403_v50 = vmul.f32 %v14713_v18, %v14637_v29  ;;  %v6068_v58 = vadd.f32 %v6060_v41, %v5894_v48  ;;  %v6061_v55 = vmul.f32 %v14706_v13, %v14619_v57  ;;  %v15435_v36 = vld [vmem:[#allocation51_spill] sm:$0xff] }
 0xce5   : > { %v14757_v16 = vpop.permute.xlu1 %6922  ;;  %v6230_v62 = vmul.f32 %v14709_v17, %v14621_v4  ;;  %v6239_v2 = vadd.f32 %v6231_v59, %v6065_v49  ;;  %v6066_v27 = vadd.f32 %v6058_v20, %v5892_v28  ;;  %v6237_v3 = vadd.f32 %v6229_v22, %v6063_v56 }
 0xce6   : > { %v14763_v54 = vpop.permute.xlu0 %7066  ;;  %v6577_v46 = vmul.f32 %v14716_v14, %v14655_v19  ;;  %v6067_v5 = vadd.f32 %v6059_v51, %v5893_v43  ;;  %v6062_v29 = vmul.f32 %v14706_v13, %v14627_v0  ;;  %v6234_v31 = vmul.f32 %v14709_v17, %v14629_v11  ;;  %v15431_v19 = vld [vmem:[#allocation57_spill] sm:$0xff]  ;;  %v15438_v59 = vld [vmem:[#allocation60_spill] sm:$0xff] }
 0xce7   : > { %v6232_v57 = vmul.f32 %v14709_v17, %v14631_v24  ;;  %v6235_v33 = vmul.f32 %v14709_v17, %v14635_v26  ;;  %v6411_v6 = vadd.f32 %v6403_v50, %v6237_v3  ;;  %v6751_v53 = vmul.f32 %v15431_v19, %v14671_v15  ;;  %v15433_v24 = vld [vmem:[#allocation33_spill] sm:$0xff]  ;;  %v15436_v26 = vld [vmem:[#allocation59_spill] sm:$0xff] }
 0xce8   : > { %v6069_v23 = vadd.f32 %v6061_v55, %v5895_v39  ;;  %v6238_v13 = vadd.f32 %v6230_v62, %v6064_v44  ;;  %v6241_v0 = vadd.f32 %v6233_v7, %v6067_v5  ;;  %v6236_v11 = vmul.f32 %v14709_v17, %v15432_v52  ;;  %v15439_v39 = vld [vmem:[#allocation36_spill] sm:$0xff]  ;;  %v15440_v44 = vld [vmem:[#allocation37_spill] sm:$0xff]  ;;  %v15445_v5 = vld [vmem:[#allocation42_spill] sm:$0xff] }
 0xce9   : > { %v14787_v63 = vpop.permute.xlu1 %6912  ;;  %v6404_v38 = vmul.f32 %v14713_v18, %v15433_v24  ;;  %v6406_v25 = vmul.f32 %v14713_v18, %v15434_v1  ;;  %v6585_v21 = vadd.f32 %v6577_v46, %v6411_v6  ;;  %v6925_v42 = vmul.f32 %v15436_v26, %v15435_v36  ;;  %v15444_v3 = vld [vmem:[#allocation41_spill] sm:$0xff]  ;;  %v15449_v1 = vld [vmem:[#allocation48_spill] sm:$0xff] }
 0xcea   : > { %v14783_v8 = vpop.permute.xlu0 %7081  ;;  %v6070_v10 = vadd.f32 %v6062_v29, %v5896_v30  ;;  %v6242_v15 = vadd.f32 %v6234_v31, %v6068_v58  ;;  %v6240_v37 = vadd.f32 %v6232_v57, %v6066_v27  ;;  %v6407_v40 = vmul.f32 %v14713_v18, %v15437_v60  ;;  %v15441_v30 = vld [vmem:[#allocation38_spill] sm:$0xff]  ;;  %v15442_v58 = vld [vmem:[#allocation40_spill] sm:$0xff]  ;;  %v15446_v57 = vld [vmem:[#allocation43_spill] sm:$0xff] }
 0xceb   : > { %v6413_v17 = vadd.f32 %v6405_v61, %v6239_v2  ;;  %v6243_v41 = vadd.f32 %v6235_v33, %v6069_v23  ;;  %v6759_v48 = vadd.f32 %v6751_v53, %v6585_v21  ;;  %v7099_v20 = vmul.f32 %v14747_v34, %v15438_v59  ;;  %v15443_v2 = vld [vmem:[#allocation39_spill] sm:$0xff]  ;;  %v15450_v21 = vld [vmem:[#allocation53_spill] sm:$0xff] }
 0xcec   : > { %v6244_v22 = vadd.f32 %v6236_v11, %v6070_v10  ;;  %v6409_v43 = vmul.f32 %v14713_v18, %v15439_v39  ;;  %v6410_v51 = vmul.f32 %v14713_v18, %v15440_v44  ;;  %v6579_v49 = vmul.f32 %v14716_v14, %v15441_v30  ;;  %v15447_v33 = vld [vmem:[#allocation47_spill] sm:$0xff]  ;;  %v15448_v11 = vld [vmem:[#allocation45_spill] sm:$0xff]  ;;  %v15453_v44 = vld [vmem:[#allocation46_spill] sm:$0xff] }
 0xced   : > { %v7072_v45 = vpop.permute.xlu1 %7071  ;;  %v6412_v56 = vadd.f32 %v6404_v38, %v6238_v13  ;;  %v6414_v50 = vadd.f32 %v6406_v25, %v6240_v37  ;;  %v6578_v55 = vmul.f32 %v14716_v14, %v15442_v58  ;;  %v6933_v62 = vadd.f32 %v6925_v42, %v6759_v48  ;;  %v15451_v60 = vld [vmem:[#allocation49_spill] sm:$0xff]  ;;  %v15452_v48 = vld [vmem:[#allocation56_spill] sm:$0xff] }
 0xcee   : > { %v14803_v4 = vpop.permute.xlu0 %7086  ;;  %v6415_v7 = vadd.f32 %v6407_v40, %v6241_v0  ;;  %v6408_v27 = vmul.f32 %v14713_v18, %v15443_v2  ;;  %v6580_v46 = vmul.f32 %v14716_v14, %v15444_v3  ;;  %v6581_v29 = vmul.f32 %v14716_v14, %v15445_v5 }
 0xcef   : > { %v6583_v61 = vmul.f32 %v14716_v14, %v15446_v57  ;;  %v6752_v6 = vmul.f32 %v15431_v19, %v15447_v33  ;;  %v7107_v53 = vadd.f32 %v7099_v20, %v6933_v62  ;;  %v6417_v0 = vadd.f32 %v6409_v43, %v6243_v41  ;;  %v15456_v62 = vld [vmem:[#allocation58_spill] sm:$0xff] }
 0xcf0   : > { %v6418_v52 = vadd.f32 %v6410_v51, %v6244_v22  ;;  %v6587_v18 = vadd.f32 %v6579_v49, %v6413_v17  ;;  %v6753_v24 = vmul.f32 %v15431_v19, %v15448_v11  ;;  %v6586_v38 = vadd.f32 %v6578_v55, %v6412_v56  ;;  %v15454_v51 = vld [vmem:[#allocation55_spill] sm:$0xff]  ;;  %v15455_v56 = vld [vmem:[#allocation44_spill] sm:$0xff]  ;;  %v15458_v33 = vld [vmem:[#allocation50_spill] sm:$0xff] }
 0xcf1   : > { %v7246_v23 = vpop.permute.xlu1 %7245  ;;  %v6754_v25 = vmul.f32 %v15431_v19, %v15449_v1  ;;  %v6926_v36 = vmul.f32 %v15436_v26, %v15450_v21  ;;  %v6416_v10 = vadd.f32 %v6408_v27, %v6242_v15  ;;  %v6588_v37 = vadd.f32 %v6580_v46, %v6414_v50  ;;  %v15457_v27 = vld [vmem:[#allocation54_spill] sm:$0xff] }
 0xcf2   : > { %v14821_v28 = vpop.permute.xlu0 %7096  ;;  %v6755_v40 = vmul.f32 %v15431_v19, %v15451_v60  ;;  %v6927_v41 = vmul.f32 %v15436_v26, %v15452_v48  ;;  %v6589_v59 = vadd.f32 %v6581_v29, %v6415_v7  ;;  %v6591_v20 = vadd.f32 %v6583_v61, %v6417_v0 }
 0xcf3   : > { %v6760_v22 = vadd.f32 %v6752_v6, %v6586_v38  ;;  %v7100_v39 = vmul.f32 %v14747_v34, %v14763_v54  ;;  %v6761_v43 = vadd.f32 %v6753_v24, %v6587_v18  ;;  %v6582_v15 = vmul.f32 %v14716_v14, %v15453_v44 }
 0xcf4   : > { %v6929_v30 = vmul.f32 %v15436_v26, %v15454_v51  ;;  %v7101_v49 = vmul.f32 %v14747_v34, %v7072_v45  ;;  %v6584_v50 = vmul.f32 %v14716_v14, %v15455_v56  ;;  %v6762_v58 = vadd.f32 %v6754_v25, %v6588_v37 }
 0xcf5   : > { %v6934_v55 = vadd.f32 %v6926_v36, %v6760_v22  ;;  %v6928_v7 = vmul.f32 %v15436_v26, %v15456_v62  ;;  %v7092_v54 = vpop.permute.xlu1 %7091  ;;  %v6763_v2 = vadd.f32 %v6755_v40, %v6589_v59  ;;  %v6756_v3 = vmul.f32 %v15431_v19, %v15457_v27 }
 0xcf6   : > { %v7236_v31 = vpop.permute.xlu0 %7235  ;;  %v6935_v46 = vadd.f32 %v6927_v41, %v6761_v43  ;;  %v7275_v5 = vmul.f32 %v14766_v47, %v7246_v23  ;;  %v7102_v45 = vmul.f32 %v14747_v34, %v14749_v35  ;;  %v7103_v14 = vmul.f32 %v14747_v34, %v14783_v8  ;;  %v15459_v35 = vld [vmem:[#allocation52_spill] sm:$0xff] }
 0xcf7   : > { %v7273_v13 = vmul.f32 %v14766_v47, %v7236_v31  ;;  %v7108_v31 = vadd.f32 %v7100_v39, %v6934_v55  ;;  %v6590_v61 = vadd.f32 %v6582_v15, %v6416_v10  ;;  %v6757_v6 = vmul.f32 %v15431_v19, %v15458_v33  ;;  %v12366_v55 = vld [vmem:[#allocation11 + $0x20] sm:$0xff]  }
 0xcf8   : > { %v6936_v0 = vadd.f32 %v6928_v7, %v6762_v58  ;;  %v6930_v23 = vmul.f32 %v15436_v26, %v14787_v63  ;;  %v6758_v24 = vmul.f32 %v15431_v19, %v15459_v35  ;;  %v6931_v8 = vmul.f32 %v15436_v26, %v14743_v32  ;;  %v12371_v35 = vld [vmem:[#allocation11 + $0x8] sm:$0xff]  }
 0xcf9   : > { %v7281_v42 = vadd.f32 %v7273_v13, %v7107_v53  ;;  %v6937_v53 = vadd.f32 %v6929_v30, %v6763_v2  ;;  %v7109_v13 = vadd.f32 %v7101_v49, %v6935_v46  ;;  %v6764_v38 = vadd.f32 %v6756_v3, %v6590_v61  ;;  %v7266_v10 = vpop.permute.xlu1 %7265  ;;  %v8042_v46 = vld [vmem:[%s15462_s4] sm:$0xff]  ;;  %v8049_v61 = vld [vmem:[%s15462_s4 + $0x38] sm:$0xff] }
 0xcfa   : > { %v7251_v17 = vpop.permute.xlu0 %7250  ;;  %v7110_v21 = vadd.f32 %v7102_v45, %v6936_v0  ;;  %v6592_v37 = vadd.f32 %v6584_v50, %v6418_v52  ;;  %v6765_v60 = vadd.f32 %v6757_v6, %v6591_v20  ;;  %v7105_v19 = vmul.f32 %v14747_v34, %v7092_v54  ;;  %v8046_v45 = vld [vmem:[%s15462_s4 + $0x20] sm:$0xff] }
 0xcfb   : > { %11479 = vmatprep.mubr.msk.f32.mxu0 %vm7299_vm7, %v7281_v42  ;;  %v7276_v18 = vmul.f32 %v14766_v47, %v7251_v17  ;;  %v7283_v1 = vadd.f32 %v7275_v5, %v7109_v13  ;;  %v7111_v36 = vadd.f32 %v7103_v14, %v6937_v53  ;;  %v7104_v42 = vmul.f32 %v14747_v34, %v14803_v4  ;;  %v8044_v5 = vld [vmem:[%s15462_s4 + $0x10] sm:$0xff]  ;;  %v12367_v0 = vld [vmem:[#allocation11 + $0x28] sm:$0xff]  }
 0xcfc   : > { %v6932_v32 = vmul.f32 %v15436_v26, %v14757_v16  ;;  %v6938_v40 = vadd.f32 %v6930_v23, %v6764_v38  ;;  %v6939_v17 = vadd.f32 %v6931_v8, %v6765_v60  ;;  %v7279_v4 = vmul.f32 %v14766_v47, %v7266_v10  ;;  %v8048_v14 = vld [vmem:[%s15462_s4 + $0x30] sm:$0xff]  ;;  %v12368_v23 = vld [vmem:[#allocation11 + $0x30] sm:$0xff]  }
 0xcfd   : > { %v7284_v48 = vadd.f32 %v7276_v18, %v7110_v21  ;;  %v6766_v22 = vadd.f32 %v6758_v24, %v6592_v37  ;;  %v7106_v52 = vmul.f32 %v14747_v34, %v14821_v28  ;;  %v12369_v18 = vld [vmem:[#allocation11 + $0x38] sm:$0xff]   ;;  %v12372_v38 = vld [vmem:[#allocation11 + $0x10] sm:$0xff]   ;;  %v12374_v21 = vld [vmem:[#allocation11 + $0x40] sm:$0xff]  }
 0xcfe   : > { %v7241_v29 = vpop.permute.xlu0 %7240  ;;  %v7112_v39 = vadd.f32 %v7104_v42, %v6938_v40  ;;  %v7113_v43 = vadd.f32 %v7105_v19, %v6939_v17  ;;  %v12375_v42 = vld [vmem:[#allocation11 + $0x48] sm:$0xff]   ;;  %v12377_v60 = vld [vmem:[#allocation11 + $0x58] sm:$0xff]   ;;  %v12380_v17 = vld [vmem:[#allocation11 + $0x70] sm:$0xff]  }
 0xcff   : > { %v7274_v57 = vmul.f32 %v14766_v47, %v7241_v29  ;;  %v6940_v16 = vadd.f32 %v6932_v32, %v6766_v22  ;;  %v8043_v29 = vld [vmem:[%s15462_s4 + $0x8] sm:$0xff]  ;;  %v12378_v32 = vld [vmem:[#allocation11 + $0x60] sm:$0xff]  }
 0xd00   : > { %v7287_v44 = vadd.f32 %v7279_v4, %v7113_v43  ;;  %v12384_v43 = vld [vmem:[#allocation11 + $0x90] sm:$0xff]  }
 0xd01   : > { %v7282_v11 = vadd.f32 %v7274_v57, %v7108_v31  ;;  %v7114_v51 = vadd.f32 %v7106_v52, %v6940_v16  ;;  %v8045_v31 = vld [vmem:[%s15462_s4 + $0x18] sm:$0xff]  ;;  %v8047_v57 = vld [vmem:[%s15462_s4 + $0x28] sm:$0xff] }
 0xd02   : > { %v7256_v25 = vpop.permute.xlu0 %7255  ;;  %v12385_v16 = vld [vmem:[#allocation11 + $0x98] sm:$0xff]  }
 0xd03   : > { %v7277_v63 = vmul.f32 %v14766_v47, %v7256_v25  ;;  %11480 = vmatmul.mubr.msk.f32.vlgmr.msra.gmra.mrb[112].mxu0 %vm7299_vm7, %v7282_v11  ;;  %v12370_v11 = vld [vmem:[#allocation11] sm:$0xff]  }
 0xd04   : > { %11482 = vmatprep.mubr.msk.f32.mxu0 %vm7299_vm7, %v7283_v1  ;;  %v12373_v1 = vld [vmem:[#allocation11 + $0x18] sm:$0xff]  }
 0xd05   : > { %v7285_v41 = vadd.f32 %v7277_v63, %v7111_v36  ;;  %v12376_v63 = vld [vmem:[#allocation11 + $0x50] sm:$0xff]  }
 0xd06   : > { %v7261_v59 = vpop.permute.xlu0 %7260 }
 0xd07   : > { %v7278_v20 = vmul.f32 %v14766_v47, %v7261_v59  ;;  %11483 = vmatmul.mubr.msk.f32.gmra.mrb[114].mxu0 %vm7299_vm7, %v7284_v48  ;;  %v12379_v48 = vld [vmem:[#allocation11 + $0x68] sm:$0xff]   ;;  %v12381_v59 = vld [vmem:[#allocation11 + $0x78] sm:$0xff]  }
 0xd08   : > { %11485 = vmatprep.mubr.msk.f32.mxu0 %vm7299_vm7, %v7285_v41 }
 0xd09   : > { %v7286_v26 = vadd.f32 %v7278_v20, %v7112_v39  ;;  %v12382_v39 = vld [vmem:[#allocation11 + $0x80] sm:$0xff]   ;;  %v12383_v20 = vld [vmem:[#allocation11 + $0x88] sm:$0xff]  }
 0xd0a   : > { %v7271_v15 = vpop.permute.xlu0 %7270 }
 0xd0b   : > { %v7280_v30 = vmul.f32 %v14766_v47, %v7271_v15  ;;  %11486 = vmatmul.mubr.msk.f32.gmra.mrb[116].mxu0 %vm7299_vm7, %v7286_v26  ;;  %v15463_v26 = vld [vmem:[#allocation31_spill] sm:$0xff]  ;;  %v15464_v15 = vld [vmem:[#allocation30_spill] sm:$0xff] }
 0xd0c   : > { %11488 = vmatprep.mubr.msk.f32.mxu0 %vm7299_vm7, %v7287_v44  ;;  %v8117_v44 = vadd.s32 8, %v15463_v26 }
 0xd0d   : > { %v7288_v49 = vadd.f32 %v7280_v30, %v7114_v51  ;;  %v8118_v51 = vadd.s32 8, %v15464_v15  ;;  %v15465_v30 = vld [vmem:[#allocation21_spill] sm:$0xff] }
 0xd0e   : > { %vm8122_vm12 = vcmp.eq.s32.totalorder %v13081_v9, %v8117_v44 }
 0xd0f   : > { %11489 = vmatmul.mubr.msk.f32.gmra.mrb[118].mxu0 %vm7299_vm7, %v7288_v49  ;;  %vm8123_vm5 = vcmp.eq.s32.totalorder %v13081_v9, %v8118_v51  ;;  %v8114_v49 = vmul.u32 2, %v15465_v30 }
 0xd10   : > { %11499 = vmatprep.mubr.msk.bf16.mxu0 %vm2280_vm6, %v12366_v55  ;;  %vm11715_vm8 = vmpackc.low %vm8123_vm5, %vm8122_vm12  ;;  %v15468_v55 = vld [vmem:[#allocation23_spill] sm:$0xff] }
 0xdd6   : > { %v11481_v34 = vpop.f32.mrb[112].mxu0 }
 0xdd7   : > { %v7394_v28 = vpop.f32.mrb[113].mxu0 }
 0xdd8   : > { %v7433_v56 = vpack.c.bf16 %v11481_v34, %v7394_v28  ;;  %v15466_v34 = vld [vmem:[#allocation22_spill] sm:$0xff] }
 0xdd9   : > { %v8115_v28 = vmul.u32 2, %v15466_v34 }
 0xdda   : > { %7478 = vrot.lane.b32.xlu1 %v7433_v56, %s15393_s13  ;;  %v11484_v50 = vpop.f32.mrb[114].mxu0 }
 0xddb   : > { %v7404_v58 = vpop.f32.mrb[115].mxu0 }
 0xddc   : > { %v7434_v62 = vpack.c.bf16 %v11484_v50, %v7404_v58  ;;  %v8119_v50 = vadd.s32 8, %v8114_v49  ;;  %v8120_v58 = vadd.s32 8, %v8115_v28 }
 0xdde   : > { %7480 = vrot.lane.b32.xlu0 %v7434_v62, %s15393_s13  ;;  %v11487_v47 = vpop.f32.mrb[116].mxu0  ;;  %vm8124_vm14 = vcmp.eq.s32.totalorder %v13081_v9, %v8119_v50  ;;  %vm8125_vm15 = vcmp.eq.s32.totalorder %v13081_v9, %v8120_v58 }
 0xddf   : > { %v7414_v7 = vpop.f32.mrb[117].mxu0  ;;  %vm11719_vm0 = vmpackc.low %vm8125_vm15, %vm8124_vm14 }
 0xde0   : > { %v7435_v54 = vpack.c.bf16 %v11487_v47, %v7414_v7 }
 0xde2   : > { %7482 = vrot.lane.b32.xlu1 %v7435_v54, %s15393_s13  ;;  %v11490_v2 = vpop.f32.mrb[118].mxu0 }
 0xde3   : > { %v7424_v27 = vpop.f32.mrb[119].mxu0 }
 0xde4   : > { %v7436_v3 = vpack.c.bf16 %v11490_v2, %v7424_v27 }
 0xde6   : > { %7693 = vrot.lane.b32.xlu1 %v7433_v56, %s15386_s29  ;;  %7484 = vrot.lane.b32.xlu0 %v7436_v3, %s15393_s13 }
 0xdea   : > { %7697 = vrot.lane.b32.xlu1 %v7435_v54, %s15386_s29  ;;  %7695 = vrot.lane.b32.xlu0 %v7434_v62, %s15386_s29 }
 0xdee   : > { %7819 = vrot.lane.b32.xlu1 %v7433_v56, %s15460_s12  ;;  %7699 = vrot.lane.b32.xlu0 %v7436_v3, %s15386_s29 }
 0xdf2   : > { %7823 = vrot.lane.b32.xlu1 %v7435_v54, %s15460_s12  ;;  %7821 = vrot.lane.b32.xlu0 %v7434_v62, %s15460_s12 }
 0xdf6   : > { %7945 = vrot.lane.b32.xlu1 %v7433_v56, %s15461_s14  ;;  %7825 = vrot.lane.b32.xlu0 %v7436_v3, %s15460_s12  ;;  %s15469_s12 = sld [smem:[#allocation73_spill]] }
 0xdfa   : > { %7949 = vrot.lane.b32.xlu1 %v7435_v54, %s15461_s14  ;;  %7947 = vrot.lane.b32.xlu0 %v7434_v62, %s15461_s14 }
 0xdfe   : > { %8052 = vperm.xlu1 %12183, %v8042_v46   ;;  %7951 = vrot.lane.b32.xlu0 %v7436_v3, %s15461_s14 }
 0xe02   : > { %8062 = vperm.xlu1 %12183, %v8044_v5   ;;  %8057 = vperm.xlu0 %12182, %v8043_v29  }
 0xe06   : > { %8072 = vperm.xlu1 %12183, %v8046_v45   ;;  %8067 = vperm.xlu0 %12182, %v8045_v31  }
 0xe0a   : > { %8082 = vperm.xlu1 %12183, %v8048_v14   ;;  %8077 = vperm.xlu0 %12182, %v8047_v57  }
 0xe0e   : > { %8087 = vperm.xlu0 %12182, %v8049_v61  }
 0xe4c   : > { %v7479_v33 = vpop.permute.xlu1 %7478 }
 0xe4d   : > { %11491 = vmatprep.subr.bf16.mxu0 %v7479_v33 }
 0xe4e   : > { %11492 = vmatpush3.bf16.msra.mxu0 %v7479_v33 }
 0xe50   : > { %v7481_v6 = vpop.permute.xlu0 %7480 }
 0xe51   : > { %11493 = vmatprep.subr.bf16.mxu0 %v7481_v6 }
 0xe52   : > { %11494 = vmatpush3.bf16.msra.mxu0 %v7481_v6 }
 0xe54   : > { %v7483_v53 = vpop.permute.xlu1 %7482 }
 0xe55   : > { %11495 = vmatprep.subr.bf16.mxu0 %v7483_v53 }
 0xe56   : > { %11496 = vmatpush3.bf16.msra.mxu0 %v7483_v53 }
 0xe58   : > { %v7485_v13 = vpop.permute.xlu0 %7484  ;;  %v7694_v24 = vpop.permute.xlu1 %7693 }
 0xe59   : > { %11497 = vmatprep.subr.bf16.mxu0 %v7485_v13 }
 0xe5a   : > { %11498 = vmatpush3.bf16.msra.mxu0 %v7485_v13 }
 0xe5b   : > { %11507 = vmatprep.subr.bf16.mxu0 %v7433_v56 }
 0xe5c   : > { %v7696_v8 = vpop.permute.xlu0 %7695  ;;  %v7698_v25 = vpop.permute.xlu1 %7697 }
 0xe5d   : > { %11500 = vmatmul.mubr.msk.bf16.vlgmr.msra.gmra.mrb[120].mxu0 %vm2280_vm6, %v12367_v0 }
 0xe5e   : > { %11508 = vmatpush3.bf16.msra.mxu0 %v7433_v56  ;;  %11503 = vmatprep.mubr.msk.bf16.mxu0 %vm2280_vm6, %v12368_v23  ;;  %v15467_v56 = vmov 1.0|1.0  }
 0xe5f   : > { %11509 = vmatprep.subr.bf16.mxu0 %v7434_v62 }
 0xe60   : > { %v7700_v36 = vpop.permute.xlu0 %7699  ;;  %v7820_v10 = vpop.permute.xlu1 %7819 }
 0xe62   : > { %11510 = vmatpush3.bf16.msra.mxu0 %v7434_v62  ;;  %v8116_v62 = vmul.u32 2, %v15468_v55 }
 0xe63   : > { %11511 = vmatprep.subr.bf16.mxu0 %v7435_v54 }
 0xe64   : > { %v7822_v37 = vpop.permute.xlu0 %7821  ;;  %v7824_v19 = vpop.permute.xlu1 %7823  ;;  %v8121_v47 = vadd.s32 8, %v8116_v62 }
 0xe65   : > { %11504 = vmatmul.mubr.msk.bf16.gmra.mrb[124].mxu0 %vm2280_vm6, %v12369_v18 }
 0xe66   : > { %11512 = vmatpush3.bf16.msra.mxu0 %v7435_v54  ;;  %11515 = vmatprep.mubr.msk.bf16.mxu0 %vm2280_vm6, %v12370_v11  ;;  %vm8126_vm3 = vcmp.eq.s32.totalorder %v13081_v9, %v8121_v47 }
 0xe67   : > { %11513 = vmatprep.subr.bf16.mxu0 %v7436_v3  ;;  %v10320_v7 = vsel %vm8126_vm3, 1.0, %v15426_v12 }
 0xe68   : > { %v7826_v40 = vpop.permute.xlu0 %7825  ;;  %v7946_v41 = vpop.permute.xlu1 %7945 }
 0xe6a   : > { %11514 = vmatpush3.bf16.msra.mxu0 %v7436_v3 }
 0xe6b   : > { %11523 = vmatprep.subr.bf16.mxu0 %v7694_v24 }
 0xe6c   : > { %v7948_v4 = vpop.permute.xlu0 %7947  ;;  %v7950_v22 = vpop.permute.xlu1 %7949 }
 0xe6d   : > { %11516 = vmatmul.mubr.msk.bf16.vlgmr.msra.gmra.mrb[120].mxu0 %vm2280_vm6, %v12371_v35 }
 0xe6e   : > { %11524 = vmatpush3.bf16.msra.mxu0 %v7694_v24  ;;  %11519 = vmatprep.mubr.msk.bf16.mxu0 %vm2280_vm6, %v12372_v38 }
 0xe6f   : > { %11525 = vmatprep.subr.bf16.mxu0 %v7696_v8 }
 0xe70   : > { %v7952_v52 = vpop.permute.xlu0 %7951 }
 0xe72   : > { %11526 = vmatpush3.bf16.msra.mxu0 %v7696_v8 }
 0xe73   : > { %11527 = vmatprep.subr.bf16.mxu0 %v7698_v25 }
 0xe75   : > { %11520 = vmatmul.mubr.msk.bf16.gmra.mrb[124].mxu0 %vm2280_vm6, %v12373_v1 }
 0xe76   : > { %11528 = vmatpush3.bf16.msra.mxu0 %v7698_v25  ;;  %11531 = vmatprep.mubr.msk.bf16.mxu0 %vm2280_vm6, %v12374_v21 }
 0xe77   : > { %11529 = vmatprep.subr.bf16.mxu0 %v7700_v36 }
 0xe7a   : > { %11530 = vmatpush3.bf16.msra.mxu0 %v7700_v36 }
 0xe7b   : > { %11539 = vmatprep.subr.bf16.mxu0 %v7820_v10 }
 0xe7d   : > { %11532 = vmatmul.mubr.msk.bf16.vlgmr.msra.gmra.mrb[120].mxu0 %vm2280_vm6, %v12375_v42  ;;  %v8053_v54 = vpop.permute.xlu1 %8052 }
 0xe7e   : > { %11540 = vmatpush3.bf16.msra.mxu0 %v7820_v10  ;;  %11535 = vmatprep.mubr.msk.bf16.mxu0 %vm2280_vm6, %v12376_v63 }
 0xe7f   : > { %11541 = vmatprep.subr.bf16.mxu0 %v7822_v37 }
 0xe81   : > { %v8058_v2 = vpop.permute.xlu0 %8057  ;;  %v8063_v27 = vpop.permute.xlu1 %8062 }
 0xe82   : > { %11542 = vmatpush3.bf16.msra.mxu0 %v7822_v37 }
 0xe83   : > { %11543 = vmatprep.subr.bf16.mxu0 %v7824_v19 }
 0xe85   : > { %11536 = vmatmul.mubr.msk.bf16.gmra.mrb[124].mxu0 %vm2280_vm6, %v12377_v60  ;;  %v8068_v3 = vpop.permute.xlu0 %8067  ;;  %v8073_v45 = vpop.permute.xlu1 %8072 }
 0xe86   : > { %11544 = vmatpush3.bf16.msra.mxu0 %v7824_v19  ;;  %11547 = vmatprep.mubr.msk.bf16.mxu0 %vm2280_vm6, %v12378_v32 }
 0xe87   : > { %11545 = vmatprep.subr.bf16.mxu0 %v7826_v40 }
 0xe89   : > { %v8078_v53 = vpop.permute.xlu0 %8077  ;;  %v8083_v18 = vpop.permute.xlu1 %8082 }
 0xe8a   : > { %11546 = vmatpush3.bf16.msra.mxu0 %v7826_v40 }
 0xe8b   : > { %11555 = vmatprep.subr.bf16.mxu0 %v7946_v41 }
 0xe8d   : > { %11548 = vmatmul.mubr.msk.bf16.vlgmr.msra.gmra.mrb[120].mxu0 %vm2280_vm6, %v12379_v48  ;;  %v8088_v36 = vpop.permute.xlu0 %8087 }
 0xe8e   : > { %11556 = vmatpush3.bf16.msra.mxu0 %v7946_v41  ;;  %11551 = vmatprep.mubr.msk.bf16.mxu0 %vm2280_vm6, %v12380_v17 }
 0xe8f   : > { %11557 = vmatprep.subr.bf16.mxu0 %v7948_v4 }
 0xe92   : > { %11558 = vmatpush3.bf16.msra.mxu0 %v7948_v4 }
 0xe93   : > { %11559 = vmatprep.subr.bf16.mxu0 %v7950_v22 }
 0xe95   : > { %11552 = vmatmul.mubr.msk.bf16.gmra.mrb[124].mxu0 %vm2280_vm6, %v12381_v59 }
 0xe96   : > { %11560 = vmatpush3.bf16.msra.mxu0 %v7950_v22  ;;  %11563 = vmatprep.mubr.msk.bf16.mxu0 %vm2280_vm6, %v12382_v39 }
 0xe97   : > { %11561 = vmatprep.subr.bf16.mxu0 %v7952_v52 }
 0xe9a   : > { %11562 = vmatpush3.bf16.msra.mxu0 %v7952_v52 }
 0xe9b   : > { %11716 = vmatprep.subr.msk.bf16.mxu0 %vm11715_vm8, %v15467_v56 }
 0xe9d   : > { %11564 = vmatmul.mubr.msk.bf16.vlgmr.msra.gmra.mrb[120].mxu0 %vm2280_vm6, %v12383_v20 }
 0xe9e   : > { %11567 = vmatprep.mubr.msk.bf16.mxu0 %vm2280_vm6, %v12384_v43  ;;  %11718 = vmatpush3.bf16.msk.msra.mxu0 %vm11715_vm8, %v15467_v56 }
 0xe9f   : > { %11720 = vmatprep.subr.msk.bf16.mxu0 %vm11719_vm0, %v15467_v56 }
 0xea2   : > { %11722 = vmatpush3.bf16.msk.msra.mxu0 %vm11719_vm0, %v15467_v56 }
 0xea3   : > { %11579 = vmatprep.subr.msk.mxu0 %vm2906_vm1, %v10320_v7 }
 0xea5   : > { %11568 = vmatmul.mubr.msk.bf16.gmra.mrb[124].mxu0 %vm2280_vm6, %v12385_v16  ;;  %v12386_v16 = vld [vmem:[%s15469_s12 + $0x10] sm:$0xff]  }
 0xea6   : > { %11580 = vmatpush3.msk.msra.mxu0 %vm2906_vm1, %v10320_v7 }
 0xf70   : > { %v11565_v46 = vpop.f32.mrb[120].mxu0 }
 0xf71   : > { %v8092_v5 = vadd.f32 %v11565_v46, %v8063_v27  ;;  %v8003_v29 = vpop.f32.mrb[121].mxu0  ;;  %v8688_v27 = vld [vmem:[%s15470_s20 + $0x8] sm:$0xff]  ;;  %v15049_v46 = vadd.s32 128, %v13081_v9 }
 0xf72   : > { %v8090_v31 = vadd.f32 %v8053_v54, %v8003_v29  ;;  %v11566_v14 = vpop.f32.mrb[122].mxu0  ;;  %v8687_v54 = vld [vmem:[%s15470_s20] sm:$0xff]  ;;  %v8731_v29 = vadd.s32 4, %v15464_v15  ;;  %v15473_v15 = vld [vmem:[#allocation26_spill] sm:$0xff] }
 0xf73   : > { %v8006_v57 = vpop.f32.mrb[123].mxu0  ;;  %v8093_v33 = vadd.f32 %v11566_v14, %v8068_v3  ;;  %v8100_v13 = vmul.f32 0.01, %v8092_v5  ;;  %v8690_v3 = vld [vmem:[%s15470_s20 + $0x18] sm:$0xff]  ;;  %v8726_v30 = vmul.u32 2, %v15473_v15 }
 0xf74   : > { %v8098_v61 = vmul.f32 0.01, %v8090_v31  ;;  %v8091_v6 = vadd.f32 %v8058_v2, %v8006_v57  ;;  %v8689_v2 = vld [vmem:[%s15470_s20 + $0x10] sm:$0xff]  ;;  %v15471_v14 = vld [vmem:[#allocation24_spill] sm:$0xff]  ;;  %vm8744_vm7 = vcmp.eq.s32.totalorder %v15049_v46, %v8731_v29  ;;  %vm8743_vm5 = vcmp.eq.s32.totalorder %v13081_v9, %v8731_v29 }
 0xf75   : > { %v8101_v11 = vmul.f32 0.01, %v8093_v33  ;;  %v8108_v38 = vmax.f32 %v8092_v5, %v8100_v13  ;;  %v8730_v5 = vadd.s32 4, %v15463_v26  ;;  %v8724_v57 = vmul.u32 2, %v15471_v14  ;;  %v12387_v13 = vld [vmem:[%s15469_s12 + $0x18] sm:$0xff]  }
 0xf76   : > { %v8106_v0 = vmax.f32 %v8090_v31, %v8098_v61  ;;  %v8099_v23 = vmul.f32 0.01, %v8091_v6  ;;  %v8733_v31 = vadd.s32 4, %v8115_v28  ;;  %v8734_v61 = vadd.s32 4, %v8116_v62 }
 0xf77   : > { %v8109_v10 = vmax.f32 %v8093_v33, %v8101_v11  ;;  %v15472_v33 = vld [vmem:[#allocation25_spill] sm:$0xff]  ;;  %vm8742_vm1 = vcmp.eq.s32.totalorder %v15049_v46, %v8730_v5  ;;  %vm8741_vm12 = vcmp.eq.s32.totalorder %v13081_v9, %v8730_v5  ;;  %v8735_v26 = vadd.s32 4, %v8724_v57 }
 0xf78   : > { %v8107_v35 = vmax.f32 %v8091_v6, %v8099_v23  ;;  %v11569_v24 = vpop.f32.mrb[124].mxu0  ;;  %11581 = vmatprep.mubr.msk.f32.mxu0 %vm8137_vm9, %v8106_v0  ;;  %v8725_v6 = vmul.u32 2, %v15472_v33  ;;  %vm11723_vm8 = vmpackc.low %vm8744_vm7, %vm8742_vm1  ;;  %vm8748_vm15 = vcmp.eq.s32.totalorder %v15049_v46, %v8733_v31  ;;  %vm8747_vm3 = vcmp.eq.s32.totalorder %v13081_v9, %v8733_v31  ;;  %v12388_v0 = vld [vmem:[%s15469_s12] sm:$0xff]   ;;  %v12389_v23 = vld [vmem:[%s15469_s12 + $0x8] sm:$0xff]  }
 0xf79   : > { %v8096_v8 = vadd.f32 %v11569_v24, %v8083_v18  ;;  %v8019_v1 = vpop.f32.mrb[125].mxu0  ;;  %11724 = vmatprep.subr.msk.bf16.mxu1 %vm11723_vm8, %v15467_v56  ;;  %vm8750_vm4 = vcmp.eq.s32.totalorder %v15049_v46, %v8734_v61  ;;  %vm8752_vm7 = vcmp.eq.s32.totalorder %v15049_v46, %v8735_v26  ;;  %v8737_v34 = vadd.s32 4, %v8726_v30  ;;  %v12390_v11 = vld [vmem:[%s15469_s12 + $0x20] sm:$0xff]  }
 0xf7a   : > { %v8094_v25 = vadd.f32 %v8073_v45, %v8019_v1  ;;  %v11570_v21 = vpop.f32.mrb[126].mxu0  ;;  %11582 = vmatmul.mubr.msk.f32.vlgmr.msra.gmra.mrb[128].mxu0 %vm8137_vm9, %v8107_v35  ;;  %v8732_v45 = vadd.s32 4, %v8114_v49  ;;  %v8736_v49 = vadd.s32 4, %v8725_v6  ;;  %vm11731_vm11 = vmpackc.low %vm8752_vm7, %vm8750_vm4  ;;  %vm8749_vm2 = vcmp.eq.s32.totalorder %v13081_v9, %v8734_v61 }
 0xf7b   : > { %v8022_v42 = vpop.f32.mrb[127].mxu0  ;;  %11584 = vmatprep.mubr.msk.f32.mxu0 %vm8137_vm9, %v8108_v38  ;;  %v8097_v37 = vadd.f32 %v11570_v21, %v8088_v36  ;;  %v8104_v19 = vmul.f32 0.01, %v8096_v8  ;;  %vm8756_vm8 = vcmp.eq.s32.totalorder %v15049_v46, %v8737_v34 }
 0xf7c   : > { %v8102_v63 = vmul.f32 0.01, %v8094_v25  ;;  %v8095_v60 = vadd.f32 %v8078_v53, %v8022_v42  ;;  %vm8746_vm14 = vcmp.eq.s32.totalorder %v15049_v46, %v8732_v45  ;;  %vm8745_vm0 = vcmp.eq.s32.totalorder %v13081_v9, %v8732_v45 }
 0xf7d   : > { %v8105_v48 = vmul.f32 0.01, %v8097_v37  ;;  %v8112_v17 = vmax.f32 %v8096_v8, %v8104_v19  ;;  %vm11727_vm13 = vmpackc.low %vm8748_vm15, %vm8746_vm14  ;;  %v12391_v8 = vld [vmem:[%s15469_s12 + $0x28] sm:$0xff]  }
 0xf7e   : > { %v8110_v32 = vmax.f32 %v8094_v25, %v8102_v63  ;;  %v8103_v40 = vmul.f32 0.01, %v8095_v60  ;;  %11585 = vmatmul.mubr.msk.f32.gmra.mrb[130].mxu0 %vm8137_vm9, %v8109_v10  ;;  %vm11729_vm1 = vmpackc.low %vm8747_vm3, %vm8745_vm0  ;;  %vm8755_vm0 = vcmp.eq.s32.totalorder %v13081_v9, %v8737_v34  ;;  %v12392_v25 = vld [vmem:[%s15469_s12 + $0x30] sm:$0xff]   ;;  %v12393_v10 = vld [vmem:[%s15469_s12 + $0x38] sm:$0xff]  }
 0xf7f   : > { %v8113_v4 = vmax.f32 %v8097_v37, %v8105_v48  ;;  %v12394_v37 = vld [vmem:[%s15469_s12 + $0x40] sm:$0xff]   ;;  %v15474_v48 = vmov 0  }
 0xf80   : > { %v8111_v41 = vmax.f32 %v8095_v60, %v8103_v40  ;;  %11587 = vmatprep.mubr.msk.f32.mxu0 %vm8137_vm9, %v8110_v32  ;;  %v12395_v40 = vld [vmem:[%s15469_s12 + $0x48] sm:$0xff]  }
 0xf82   : > { %11588 = vmatmul.mubr.msk.f32.gmra.mrb[132].mxu0 %vm8137_vm9, %v8111_v41  ;;  %v15475_v41 = vld [vmem:[#allocation27_spill] sm:$0xff] }
 0xf83   : > { %11590 = vmatprep.mubr.msk.f32.mxu0 %vm8137_vm9, %v8112_v17  ;;  %v8727_v17 = vmul.u32 2, %v15475_v41  ;;  %v9029_v41 = vld [vmem:[#allocation12 + $0x2] sm:$0x1] }
 0xf86   : > { %11591 = vmatmul.mubr.msk.f32.gmra.mrb[134].mxu0 %vm8137_vm9, %v8113_v4  ;;  %vm11725_vm9 = vmpackc.low %vm8743_vm5, %vm8741_vm12  ;;  %vm8751_vm12 = vcmp.eq.s32.totalorder %v13081_v9, %v8735_v26  ;;  %vm8754_vm5 = vcmp.eq.s32.totalorder %v15049_v46, %v8736_v49  ;;  %v15476_v4 = vld [vmem:[#allocation28_spill] sm:$0xff] }
 0xf87   : > { %11601 = vmatprep.mubr.msk.bf16.mxu0 %vm2280_vm6, %v12386_v16  ;;  %11726 = vmatpush1.bf16.msk.msra.mxu1 %vm11725_vm9, %v15467_v56  ;;  %vm11733_vm14 = vmpackc.low %vm8751_vm12, %vm8749_vm2 }
 0xf88   : > { %11728 = vmatprep.subr.msk.bf16.mxu1 %vm11727_vm13, %v15467_v56  ;;  %vm11735_vm15 = vmpackc.low %vm8756_vm8, %vm8754_vm5  ;;  %vm8753_vm13 = vcmp.eq.s32.totalorder %v13081_v9, %v8736_v49  ;;  %vm8807_vm5 = vcmask 670720  }
 0xf89   : > { %vm11737_vm4 = vmpackc.low %vm8755_vm0, %vm8753_vm13  ;;  %vm15482_vm13 = vcmask 1031168  }
 0xf8b   : > { %11730 = vmatpush1.bf16.msk.msra.mxu1 %vm11729_vm1, %v15467_v56 }
 0xf8c   : > { %11732 = vmatprep.subr.msk.bf16.mxu1 %vm11731_vm11, %v15467_v56 }
 0xf8f   : > { %11734 = vmatpush1.bf16.msk.msra.mxu1 %vm11733_vm14, %v15467_v56  ;;  %vm15480_vm14 = vcmask 261120  }
 0xf90   : > { %11736 = vmatprep.subr.msk.bf16.mxu1 %vm11735_vm15, %v15467_v56  ;;  %vm15481_vm15 = vcmask 1022976   ;;  %vm15483_vm0 = vmmov %vm15480_vm14 }
 0xf93   : > { %11738 = vmatpush1.bf16.msk.msra.mxu1 %vm11737_vm4, %v15467_v56  ;;  %vm15484_vm4 = vmmov %vm15482_vm13 }
0x104d   : > { %v11583_v59 = vpop.f32.mrb[128].mxu0 }
0x104e   : > { %v8231_v22 = vpop.f32.mrb[129].mxu0 }
0x104f   : > { %v14992_v39 = vpack.c.bf16 %v11583_v59, %v8231_v22  ;;  %v8728_v59 = vmul.u32 2, %v15476_v4  ;;  %v8738_v22 = vadd.s32 4, %v8727_v17 }
0x1051   : > { %8297 = vrot.lane.b32.xlu1 %v14992_v39, %s15391_s27  ;;  %v11586_v52 = vpop.f32.mrb[130].mxu0  ;;  %vm8758_vm2 = vcmp.eq.s32.totalorder %v15049_v46, %v8738_v22  ;;  %vm8757_vm9 = vcmp.eq.s32.totalorder %v13081_v9, %v8738_v22 }
0x1052   : > { %v8241_v20 = vpop.f32.mrb[131].mxu0 }
0x1053   : > { %v14996_v43 = vpack.c.bf16 %v11586_v52, %v8241_v20  ;;  %v15477_v52 = vld [vmem:[#allocation29_spill] sm:$0xff] }
0x1054   : > { %v8729_v20 = vmul.u32 2, %v15477_v52 }
0x1055   : > { %8299 = vrot.lane.b32.xlu0 %v14996_v43, %s15391_s27  ;;  %v11589_v44 = vpop.f32.mrb[132].mxu0 }
0x1056   : > { %v8251_v51 = vpop.f32.mrb[133].mxu0 }
0x1057   : > { %v15004_v50 = vpack.c.bf16 %v11589_v44, %v8251_v51 }
0x1059   : > { %8301 = vrot.lane.b32.xlu1 %v15004_v50, %s15391_s27  ;;  %v11592_v58 = vpop.f32.mrb[134].mxu0 }
0x105a   : > { %v8261_v47 = vpop.f32.mrb[135].mxu0 }
0x105b   : > { %v15008_v7 = vpack.c.bf16 %v11592_v58, %v8261_v47 }
0x105d   : > { %8444 = vrot.lane.b32.xlu1 %v14992_v39, %s15393_s13  ;;  %8303 = vrot.lane.b32.xlu0 %v15008_v7, %s15391_s27 }
0x1061   : > { %8448 = vrot.lane.b32.xlu1 %v15004_v50, %s15393_s13  ;;  %8446 = vrot.lane.b32.xlu0 %v14996_v43, %s15393_s13 }
0x1065   : > { %8530 = vrot.lane.b32.xlu1 %v14992_v39, %s15394_s0  ;;  %8450 = vrot.lane.b32.xlu0 %v15008_v7, %s15393_s13 }
0x1069   : > { %8534 = vrot.lane.b32.xlu1 %v15004_v50, %s15394_s0  ;;  %8532 = vrot.lane.b32.xlu0 %v14996_v43, %s15394_s0 }
0x106d   : > { %8616 = vrot.lane.b32.xlu1 %v14992_v39, %s15386_s29  ;;  %8536 = vrot.lane.b32.xlu0 %v15008_v7, %s15394_s0 }
0x1071   : > { %8620 = vrot.lane.b32.xlu1 %v15004_v50, %s15386_s29  ;;  %8618 = vrot.lane.b32.xlu0 %v14996_v43, %s15386_s29 }
0x1075   : > { %8693 = vperm.xlu1 %12183, %v8687_v54   ;;  %8622 = vrot.lane.b32.xlu0 %v15008_v7, %s15386_s29  ;;  %s15493_s29 = sld [smem:[#allocation76_spill]] }
0x1079   : > { %8703 = vperm.xlu1 %12183, %v8689_v2   ;;  %8698 = vperm.xlu0 %12182, %v8688_v27  }
0x107d   : > { %8708 = vperm.xlu0 %12182, %v8690_v3  }
0x10c3   : > { %v8298_v28 = vpop.permute.xlu1 %8297 }
0x10c4   : > { %11593 = vmatprep.subr.bf16.mxu0 %v8298_v28 }
0x10c5   : > { %11594 = vmatpush3.bf16.msra.mxu0 %v8298_v28 }
0x10c7   : > { %v8300_v55 = vpop.permute.xlu0 %8299 }
0x10c8   : > { %11595 = vmatprep.subr.bf16.mxu0 %v8300_v55 }
0x10c9   : > { %11596 = vmatpush3.bf16.msra.mxu0 %v8300_v55 }
0x10cb   : > { %v8302_v62 = vpop.permute.xlu1 %8301 }
0x10cc   : > { %11597 = vmatprep.subr.bf16.mxu0 %v8302_v62 }
0x10cd   : > { %11598 = vmatpush3.bf16.msra.mxu0 %v8302_v62 }
0x10cf   : > { %v8304_v53 = vpop.permute.xlu0 %8303  ;;  %v8445_v18 = vpop.permute.xlu1 %8444 }
0x10d0   : > { %11599 = vmatprep.subr.bf16.mxu0 %v8304_v53 }
0x10d1   : > { %11600 = vmatpush3.bf16.msra.mxu0 %v8304_v53 }
0x10d2   : > { %11605 = vmatprep.subr.bf16.mxu0 %v14992_v39 }
0x10d3   : > { %v8447_v35 = vpop.permute.xlu0 %8446  ;;  %v8449_v24 = vpop.permute.xlu1 %8448 }
0x10d4   : > { %11602 = vmatmul.mubr.msk.bf16.vlgmr.msra.gmra.mrb[136].mxu0 %vm2280_vm6, %v12387_v13 }
0x10d5   : > { %11606 = vmatpush3.bf16.msra.mxu0 %v14992_v39  ;;  %11613 = vmatprep.mubr.msk.bf16.mxu0 %vm2280_vm6, %v12388_v0  ;;  %v8739_v39 = vadd.s32 4, %v8728_v59  ;;  %v9214_v0 = vld [vmem:[#allocation2] sm:$0x1] }
0x10d6   : > { %11607 = vmatprep.subr.bf16.mxu0 %v14996_v43 }
0x10d7   : > { %v8451_v38 = vpop.permute.xlu0 %8450  ;;  %v8531_v1 = vpop.permute.xlu1 %8530  ;;  %vm8760_vm11 = vcmp.eq.s32.totalorder %v15049_v46, %v8739_v39  ;;  %vm8759_vm1 = vcmp.eq.s32.totalorder %v13081_v9, %v8739_v39  ;;  %v9091_v39 = vld [vmem:[#allocation12 + $0x3] sm:$0x1] }
0x10d8   : > { %vm11739_vm3 = vmpackc.low %vm8760_vm11, %vm8758_vm2  ;;  %vm15485_vm2 = vcmask 1014784  }
0x10d9   : > { %11608 = vmatpush3.bf16.msra.mxu0 %v14996_v43  ;;  %11740 = vmatprep.subr.msk.bf16.mxu1 %vm11739_vm3, %v15467_v56  ;;  %v8740_v43 = vadd.s32 4, %v8729_v20  ;;  %vm15486_vm11 = vmmov %vm15481_vm15 }
0x10da   : > { %11609 = vmatprep.subr.bf16.mxu0 %v15004_v50  ;;  %vm15487_vm3 = vmmov %vm15483_vm0 }
0x10db   : > { %v8533_v21 = vpop.permute.xlu0 %8532  ;;  %v8535_v36 = vpop.permute.xlu1 %8534  ;;  %vm8762_vm7 = vcmp.eq.s32.totalorder %v15049_v46, %v8740_v43  ;;  %vm8761_vm12 = vcmp.eq.s32.totalorder %v13081_v9, %v8740_v43 }
0x10dc   : > { %v10391_v16 = vsel %vm8762_vm7, 1.0, %v15426_v12  ;;  %v10390_v44 = vsel %vm8761_vm12, 1.0, %v15426_v12 }
0x10dd   : > { %11610 = vmatpush3.bf16.msra.mxu0 %v15004_v50 }
0x10de   : > { %11611 = vmatprep.subr.bf16.mxu0 %v15008_v7 }
0x10df   : > { %v8537_v42 = vpop.permute.xlu0 %8536  ;;  %v8617_v63 = vpop.permute.xlu1 %8616 }
0x10e1   : > { %11612 = vmatpush3.bf16.msra.mxu0 %v15008_v7 }
0x10e2   : > { %11617 = vmatprep.subr.bf16.mxu0 %v8445_v18 }
0x10e3   : > { %v8619_v60 = vpop.permute.xlu0 %8618  ;;  %v8621_v19 = vpop.permute.xlu1 %8620 }
0x10e4   : > { %11614 = vmatmul.mubr.msk.bf16.vlgmr.msra.gmra.mrb[136].mxu0 %vm2280_vm6, %v12389_v23 }
0x10e5   : > { %11618 = vmatpush3.bf16.msra.mxu0 %v8445_v18  ;;  %11625 = vmatprep.mubr.msk.bf16.mxu0 %vm2280_vm6, %v12390_v11 }
0x10e6   : > { %11619 = vmatprep.subr.bf16.mxu0 %v8447_v35 }
0x10e7   : > { %v8623_v32 = vpop.permute.xlu0 %8622 }
0x10e9   : > { %11620 = vmatpush3.bf16.msra.mxu0 %v8447_v35 }
0x10ea   : > { %11621 = vmatprep.subr.bf16.mxu0 %v8449_v24 }
0x10ed   : > { %11622 = vmatpush3.bf16.msra.mxu0 %v8449_v24 }
0x10ee   : > { %11623 = vmatprep.subr.bf16.mxu0 %v8451_v38 }
0x10f1   : > { %11624 = vmatpush3.bf16.msra.mxu0 %v8451_v38 }
0x10f2   : > { %11629 = vmatprep.subr.bf16.mxu0 %v8531_v1 }
0x10f4   : > { %11626 = vmatmul.mubr.msk.bf16.vlgmr.msra.gmra.mrb[136].mxu0 %vm2280_vm6, %v12391_v8  ;;  %v8694_v51 = vpop.permute.xlu1 %8693  ;;  %v8921_v8 = vld [vmem:[#allocation12 + $0x1] sm:$0x1] }
0x10f5   : > { %11630 = vmatpush3.bf16.msra.mxu0 %v8531_v1  ;;  %11637 = vmatprep.mubr.msk.bf16.mxu0 %vm2280_vm6, %v12392_v25 }
0x10f6   : > { %11631 = vmatprep.subr.bf16.mxu0 %v8533_v21 }
0x10f8   : > { %v8699_v54 = vpop.permute.xlu0 %8698  ;;  %v8704_v3 = vpop.permute.xlu1 %8703 }
0x10f9   : > { %11632 = vmatpush3.bf16.msra.mxu0 %v8533_v21 }
0x10fa   : > { %11633 = vmatprep.subr.bf16.mxu0 %v8535_v36 }
0x10fc   : > { %v8709_v29 = vpop.permute.xlu0 %8708 }
0x10fd   : > { %11634 = vmatpush3.bf16.msra.mxu0 %v8535_v36 }
0x10fe   : > { %11635 = vmatprep.subr.bf16.mxu0 %v8537_v42 }
0x1101   : > { %11636 = vmatpush3.bf16.msra.mxu0 %v8537_v42  ;;  %v8919_v42 = vld [vmem:[#allocation12] sm:$0x1] }
0x1102   : > { %11641 = vmatprep.subr.bf16.mxu0 %v8617_v63 }
0x1104   : > { %11638 = vmatmul.mubr.msk.bf16.vlgmr.msra.gmra.mrb[136].mxu0 %vm2280_vm6, %v12393_v10 }
0x1105   : > { %11642 = vmatpush3.bf16.msra.mxu0 %v8617_v63  ;;  %11649 = vmatprep.mubr.msk.bf16.mxu0 %vm2280_vm6, %v12394_v37 }
0x1106   : > { %11643 = vmatprep.subr.bf16.mxu0 %v8619_v60 }
0x1109   : > { %11644 = vmatpush3.bf16.msra.mxu0 %v8619_v60 }
0x110a   : > { %11645 = vmatprep.subr.bf16.mxu0 %v8621_v19 }
0x110d   : > { %11646 = vmatpush3.bf16.msra.mxu0 %v8621_v19 }
0x110e   : > { %11647 = vmatprep.subr.bf16.mxu0 %v8623_v32 }
0x1111   : > { %11648 = vmatpush3.bf16.msra.mxu0 %v8623_v32 }
0x1114   : > { %11650 = vmatmul.mubr.msk.bf16.vlgmr.msra.gmra.mrb[136].mxu0 %vm2280_vm6, %v12395_v40  ;;  %vm11741_vm6 = vmpackc.low %vm8759_vm1, %vm8757_vm9 }
0x1115   : > { %9141 = vmatprep.mubr.bf16.mxu0 %v15474_v48  ;;  %11742 = vmatpush1.bf16.msk.msra.mxu1 %vm11741_vm6, %v15467_v56  ;;  %vm15488_vm9 = vmmov %vm15485_vm2 }
0x1116   : > { %10412 = vmatprep.subr.msk.mxu1 %vm2098_vm10, %v10391_v16  ;;  %vm15489_vm1 = vmmov %vm15483_vm0  ;;  %v9153_v16 = vld [vmem:[#allocation12 + $0x4] sm:$0x1] }
0x1117   : > { %vm15490_vm6 = vmmov %vm15483_vm0 }
0x1119   : > { %10413 = vmatpush1.msk.msra.mxu1 %vm2098_vm10, %v10390_v44  ;;  %vm15478_vm10 = vcmask 1039360  }
0x111a   : > { %vm15479_vm8 = vmmov %vm15478_vm10 }
0x11e7   : > { %v11651_v50 = vpop.f32.mrb[136].mxu0 }
0x11e8   : > { %v8668_v58 = vpop.f32.mrb[137].mxu0  ;;  %v8713_v46 = vadd.f32 %v11651_v50, %v8704_v3 }
0x11e9   : > { %v8711_v47 = vadd.f32 %v8694_v51, %v8668_v58  ;;  %v11652_v7 = vpop.f32.mrb[138].mxu0 }
0x11ea   : > { %v8671_v2 = vpop.f32.mrb[139].mxu0  ;;  %v8717_v45 = vmul.f32 0.01, %v8713_v46  ;;  %v8714_v31 = vadd.f32 %v11652_v7, %v8709_v29 }
0x11eb   : > { %v8715_v56 = vmul.f32 0.01, %v8711_v47  ;;  %v8712_v27 = vadd.f32 %v8699_v54, %v8671_v2 }
0x11ec   : > { %v8721_v57 = vmax.f32 %v8713_v46, %v8717_v45  ;;  %v8718_v61 = vmul.f32 0.01, %v8714_v31 }
0x11ed   : > { %v8719_v5 = vmax.f32 %v8711_v47, %v8715_v56  ;;  %v8716_v9 = vmul.f32 0.01, %v8712_v27 }
0x11ee   : > { %v8722_v33 = vmax.f32 %v8714_v31, %v8718_v61  ;;  %v15491_v31 = vld [vmem:[#allocation20_spill] sm:$0xff] }
0x11ef   : > { %10414 = vmatmul.mubr.msk.f32.vlgmr.msra.gmra.mrb[40].mxu1 %vm8807_vm5, %v8719_v5  ;;  %v8720_v14 = vmax.f32 %v8712_v27, %v8716_v9 }
0x11f0   : > { %8896 = vmatprep.mubr.f32.mxu1 %v15426_v12 }
0x11f3   : > { %10415 = vmatmul.mubr.msk.f32.gmra.mrb[42].mxu1 %vm8807_vm5, %v8720_v14  ;;  %v9222_v14 = vsub.s32 0, %v15491_v31 }
0x11f4   : > { %8902 = vmatprep.mubr.f32.mxu1 %v15426_v12 }
0x11f7   : > { %10416 = vmatmul.mubr.msk.f32.gmra.mrb[44].mxu1 %vm8807_vm5, %v8721_v57 }
0x11f8   : > { %8908 = vmatprep.mubr.f32.mxu1 %v15426_v12 }
0x11fb   : > { %10417 = vmatmul.mubr.msk.f32.gmra.mrb[46].mxu1 %vm8807_vm5, %v8722_v33 }
0x11fc   : > { %8975 = vmatprep.mubr.bf16.mxu1 %v15474_v48 }
0x12c2   : > { %v8892_v6 = vpop.f32.mrb[40].mxu1 }
0x12c3   : > { %v8894_v26 = vpop.f32.mrb[41].mxu1 }
0x12c6   : > { %v8898_v15 = vpop.f32.mrb[42].mxu1 }
0x12c7   : > { %v8915_v30 = vpack.c.bf16 %v8898_v15, %v8892_v6  ;;  %v8900_v49 = vpop.f32.mrb[43].mxu1 }
0x12c8   : > { %v8916_v34 = vpack.c.bf16 %v8900_v49, %v8894_v26  ;;  %v12689_v49 = vmov 1966171168  }
0x12c9   : > { %8926 = vrot.lane.b32.xlu1 %v8915_v30, %s15390_s6 }
0x12ca   : > { %8928 = vrot.lane.b32.xlu0 %v8916_v34, %s15390_s6  ;;  %v8904_v28 = vpop.f32.mrb[44].mxu1 }
0x12cb   : > { %v8906_v55 = vpop.f32.mrb[45].mxu1 }
0x12ce   : > { %v8910_v62 = vpop.f32.mrb[46].mxu1 }
0x12cf   : > { %v8917_v53 = vpack.c.bf16 %v8910_v62, %v8904_v28  ;;  %v8912_v12 = vpop.f32.mrb[47].mxu1 }
0x12d0   : > { %v8918_v13 = vpack.c.bf16 %v8912_v12, %v8906_v55 }
0x12d1   : > { %8930 = vrot.lane.b32.xlu1 %v8917_v53, %s15390_s6 }
0x12d2   : > { %8932 = vrot.lane.b32.xlu0 %v8918_v13, %s15390_s6  ;;  %s9482_s6 = sshll.u32 %s13039_s19, 1 }
0x12d5   : > { %9030 = vrot.lane.b32.xlu1 %v8915_v30, %s15391_s27 }
0x12d6   : > { %9032 = vrot.lane.b32.xlu0 %v8916_v34, %s15391_s27 }
0x12d9   : > { %9034 = vrot.lane.b32.xlu1 %v8917_v53, %s15391_s27 }
0x12da   : > { %9094 = vrot.lane.b32.xlu0 %v8916_v34, %s15392_s11 }
0x12dd   : > { %9092 = vrot.lane.b32.xlu1 %v8915_v30, %s15392_s11 }
0x12de   : > { %9156 = vrot.lane.b32.xlu0 %v8916_v34, %s15393_s13 }
0x12e1   : > { %9154 = vrot.lane.b32.xlu1 %v8915_v30, %s15393_s13 }
0x12e2   : > { %9036 = vrot.lane.b32.xlu0 %v8918_v13, %s15391_s27  ;;  %s10432_s27 = sshll.u32 %s12820_s26, 5  ;;  %s12690_s26 = smov [#allocation14]  }
0x12e3   : > { %s15194_s30 = scalar_lea.hbm %s15493_s29, %s10432_s27  ;;  %s12586_s18 = sshll.u32 %s12690_s26, 4  ;;  %s12587_s18 = int_to_ptr.vmem [resolvable:$false] %s12586_s18 }
0x12e4   : > { %s12588_s3 = scalar_lea.vmem %s12587_s18, 64 }
0x12e5   : > { %9096 = vrot.lane.b32.xlu1 %v8917_v53, %s15392_s11 }
0x12e6   : > { %9098 = vrot.lane.b32.xlu0 %v8918_v13, %s15392_s11  ;;  %s736_s11 = scalar_lea.vmem [#allocation14], %s9482_s6 }
0x12e9   : > { %9158 = vrot.lane.b32.xlu1 %v8917_v53, %s15393_s13 }
0x12ea   : > { %9160 = vrot.lane.b32.xlu0 %v8918_v13, %s15393_s13  ;;  %s9278_s13 = sshll.u32 %s736_s11, 4  ;;  %s15196_s13 = int_to_ptr.vmem [resolvable:$true] %s9278_s13 }
0x12eb   : > { %s12582_s14 = scalar_lea.vmem %s15196_s13, 32  ;;  %p12589_p0 = scmp.lt.s32.totalorder %s15196_s13, %s12587_s18 }
0x12ec   : > { %p12583_p4 = scmp.ne.s32.totalorder %s15196_s13, %s12582_s14  ;;  %p12590_p2 = scmp.lt.s32.totalorder %s12588_s3, %s12582_s14 }
0x12ed   : > { %9217 = vperm.xlu1 %12183, %v9214_v0  }
0x12ee   : > { %p12584_p1 = pnand %p12583_p4, %p15494_p12  ;;  %p12591_p3 = por %p12590_p2, %p12589_p0 }
0x12f0   : > { %p12585_p13 = pneg %p12584_p1 }
0x12f2   : > { %p12592_p6 = pnand %p12591_p3, %p12585_p13 }
0x133b   : > { %v8927_v23 = vpop.permute.xlu1 %8926 }
0x133c   : > { %v8929_v18 = vpop.permute.xlu0 %8928 }
0x133d   : > { %v8934_v11 = vsel %vm15478_vm10, %v8927_v23, %v8929_v18  ;;  %8943 = vmatprep.subr.bf16.mxu1 %v8929_v18 }
0x133e   : > { %8944 = vmatpush1.bf16.msra.mxu1 %v8934_v11 }
0x1343   : > { %v8931_v35 = vpop.permute.xlu1 %8930 }
0x1344   : > { %v8933_v24 = vpop.permute.xlu0 %8932 }
0x1345   : > { %v8935_v38 = vsel %vm15479_vm8, %v8931_v35, %v8933_v24  ;;  %8945 = vmatprep.subr.bf16.mxu1 %v8933_v24 }
0x1346   : > { %8946 = vmatpush1.bf16.msra.mxu1 %v8935_v38 }
0x1347   : > { %8987 = vmatprep.subr.bf16.mxu1 %v8916_v34  ;;  %v9031_v1 = vpop.permute.xlu1 %9030  ;;  %v9234_v34 = vunpack.c.l.s4 %v12689_v49 }
0x1348   : > { %v9033_v25 = vpop.permute.xlu0 %9032 }
0x1349   : > { %10418 = vmatmul.mubr.msk.bf16.vlgmr.msra.gmra.mrb[48].mxu1 %vm15480_vm14, %v8921_v8  ;;  %v9038_v60 = vsel %vm15482_vm13, %v9031_v1, %v9033_v25  ;;  %v9235_v18 = vunpack.c.0.s8 %v9234_v34 }
0x134a   : > { %8988 = vmatpush1.bf16.msra.mxu1 %v8915_v30  ;;  %9019 = vmatprep.mubr.bf16.mxu1 %v15474_v48 }
0x134b   : > { %8989 = vmatprep.subr.bf16.mxu1 %v8918_v13  ;;  %v9035_v21 = vpop.permute.xlu1 %9034  ;;  %v9238_v8 = vsub.s32 %v9235_v18, %v15491_v31 }
0x134c   : > { %v9095_v36 = vpop.permute.xlu0 %9094 }
0x134d   : > { %9109 = vmatprep.subr.bf16.mxu0 %v9095_v36 }
0x134e   : > { %8990 = vmatpush1.bf16.msra.mxu1 %v8917_v53 }
0x134f   : > { %9047 = vmatprep.subr.bf16.mxu1 %v9033_v25  ;;  %v9093_v10 = vpop.permute.xlu1 %9092 }
0x1350   : > { %v9100_v63 = vsel %vm15481_vm15, %v9093_v10, %v9095_v36  ;;  %v9157_v37 = vpop.permute.xlu0 %9156 }
0x1351   : > { %10419 = vmatmul.mubr.msk.bf16.vlgmr.msra.gmra.mrb[52].mxu1 %vm15483_vm0, %v8919_v42  ;;  %9110 = vmatpush1.bf16.msra.mxu0 %v9100_v63 }
0x1352   : > { %9048 = vmatpush1.bf16.msra.mxu1 %v9038_v60  ;;  %9079 = vmatprep.mubr.bf16.mxu1 %v15474_v48 }
0x1353   : > { %v9155_v19 = vpop.permute.xlu1 %9154 }
0x1354   : > { %v9037_v32 = vpop.permute.xlu0 %9036  ;;  %v9162_v59 = vsel %vm15485_vm2, %v9155_v19, %v9157_v37 }
0x1355   : > { %v9039_v40 = vsel %vm15484_vm4, %v9035_v21, %v9037_v32  ;;  %9049 = vmatprep.subr.bf16.mxu1 %v9037_v32  ;;  %v15492_v21 = vlaneseq }
0x1356   : > { %9050 = vmatpush1.bf16.msra.mxu1 %v9039_v40 }
0x1357   : > { %9171 = vmatprep.subr.bf16.mxu1 %v9157_v37  ;;  %v9097_v17 = vpop.permute.xlu1 %9096  ;;  %vm9250_vm7 = vcmp.lt.s32.totalorder %v15492_v21, 168 }
0x1358   : > { %v9099_v4 = vpop.permute.xlu0 %9098 }
0x1359   : > { %v9101_v22 = vsel %vm15486_vm11, %v9097_v17, %v9099_v4  ;;  %10420 = vmatmul.mubr.msk.bf16.vlgmr.msra.gmra.mrb[56].mxu1 %vm15487_vm3, %v9029_v41  ;;  %9111 = vmatprep.subr.bf16.mxu0 %v9099_v4 }
0x135a   : > { %9112 = vmatpush1.bf16.msra.mxu0 %v9101_v22  ;;  %9172 = vmatpush1.bf16.msra.mxu1 %v9162_v59 }
0x135b   : > { %v9159_v52 = vpop.permute.xlu1 %9158  ;;  %9203 = vmatprep.mubr.bf16.mxu1 %v15474_v48 }
0x135c   : > { %v9161_v20 = vpop.permute.xlu0 %9160 }
0x135d   : > { %v9163_v43 = vsel %vm15488_vm9, %v9159_v52, %v9161_v20  ;;  %10421 = vmatmul.mubr.msk.bf16.vlgmr.msra.gmra.mrb[140].mxu0 %vm15489_vm1, %v9091_v39  ;;  %9173 = vmatprep.subr.bf16.mxu1 %v9161_v20 }
0x135e   : > { %9174 = vmatpush1.bf16.msra.mxu1 %v9163_v43 }
0x1361   : > { %10422 = vmatmul.mubr.msk.bf16.vlgmr.msra.gmra.mrb[60].mxu1 %vm15490_vm6, %v9153_v16 }
0x136c   : > { %v9218_v33 = vpop.permute.xlu1 %9217 }
0x136d   : > { %v9223_v28 = vrot.slane %v9218_v33, %v9222_v14 }
0x141c   : > { %v8977_v44 = vpop.f32.mrb[48].mxu1 }
0x141d   : > { %v8979_v51 = vpop.f32.mrb[49].mxu1 }
0x141e   : > { %v8981_v50 = vpop.f32.mrb[50].mxu1 }
0x141f   : > { %v8982_v58 = vpop.f32.mrb[51].mxu1 }
0x1424   : > { %v9021_v47 = vpop.f32.mrb[52].mxu1 }
0x1425   : > { %v9022_v7 = vadd.f32 %v9021_v47, %v8977_v44  ;;  %v9023_v54 = vpop.f32.mrb[53].mxu1 }
0x1426   : > { %v9024_v2 = vadd.f32 %v9023_v54, %v8979_v51  ;;  %v9025_v56 = vpop.f32.mrb[54].mxu1 }
0x1427   : > { %v9026_v48 = vpop.f32.mrb[55].mxu1 }
0x142c   : > { %v9081_v27 = vpop.f32.mrb[56].mxu1 }
0x142d   : > { %v9088_v3 = vadd.f32 %v9081_v27, %v9022_v7  ;;  %v9083_v46 = vpop.f32.mrb[57].mxu1 }
0x142e   : > { %v9089_v5 = vadd.f32 %v9083_v46, %v9024_v2  ;;  %v9085_v9 = vpop.f32.mrb[58].mxu1 }
0x142f   : > { %v9086_v29 = vpop.f32.mrb[59].mxu1 }
0x1430   : > { %v9143_v45 = vpop.f32.mrb[140].mxu0 }
0x1431   : > { %v9150_v57 = vadd.f32 %v9143_v45, %v9088_v3  ;;  %v9145_v61 = vpop.f32.mrb[141].mxu0 }
0x1432   : > { %v9151_v6 = vadd.f32 %v9145_v61, %v9089_v5  ;;  %v9147_v26 = vpop.f32.mrb[142].mxu0 }
0x1433   : > { %v9148_v15 = vpop.f32.mrb[143].mxu0 }
0x1434   : > { %v9205_v30 = vpop.f32.mrb[60].mxu1 }
0x1435   : > { %v9212_v55 = vadd.f32 %v9205_v30, %v9150_v57  ;;  %v9207_v62 = vpop.f32.mrb[61].mxu1 }
0x1436   : > { %v9213_v53 = vadd.f32 %v9207_v62, %v9151_v6  ;;  %v9209_v12 = vpop.f32.mrb[62].mxu1 }
0x1437   : > { %v9224_v13 = vadd.f32 %v9223_v28, %v9212_v55  ;;  %v9210_v0 = vpop.f32.mrb[63].mxu1 }
0x1438   : > { %v9225_v23 = vadd.f32 %v9223_v28, %v9213_v53 }
0x1439   : > { %v9226_v11 = vmul.f32 0.01, %v9224_v13 }
0x143a   : > { %v9227_v35 = vmul.f32 0.01, %v9225_v23 }
0x143b   : > { %v9228_v24 = vmax.f32 %v9224_v13, %v9226_v11 }
0x143c   : > { %v9229_v38 = vmax.f32 %v9225_v23, %v9227_v35 }
0x143e   : > { %v9232_v1 = vcombine.low %v9228_v24, %v9229_v38 }
0x1440   : > { %v9239_v25 = vrot.slane %v9232_v1, %v9238_v8 }
0x1442   : > { %v9246_v36 = vrot.slane %v9239_v25, %v9238_v8 }
0x1444   : > { %9252 = vst.msk [vmem:[%s736_s11] sm:$0x3] %vm9250_vm7, %v9246_v36 }
0x1445   : > { %12595 = shalt.err (!%p12592_p6)
}
0x1446   : > { %s12596_s19 = scalar_lea.hbm %s15194_s30, 32  ;;  %s12600_s6 = scalar_lea.hbm %s15493_s29, 64 }
0x1447   : > { %p12597_p10 = scmp.ne.s32.totalorder %s15194_s30, %s12596_s19  ;;  %p12601_p5 = scmp.lt.u32.totalorder %s15194_s30, %s15493_s29 }
0x1448   : > { %p12602_p9 = scmp.lt.u32.totalorder %s12600_s6, %s12596_s19  ;;  %p12604_p4 = scmp.lt.u32.totalorder %s12596_s19, %s15194_s30 }
0x1449   : > { %p12598_p11 = pnand %p12597_p10, %p15494_p12 }
0x144a   : > { %p12603_p7 = por %p12602_p9, %p12601_p5 }
0x144b   : > { %p12599_p8 = pneg %p12598_p11 }
0x144c   : > { %p12605_p1 = por %p12604_p4, %p12603_p7 }
0x144e   : > { %p12606_p13 = pnand %p12605_p1, %p12599_p8 }
0x1450   : > { %12609 = shalt.err (!%p12606_p13)
}
0x1451   : > { %12085 = dma.vmem_to_hbm [thread:$0]  (%p15494_p12), %s15196_s13, 32, %s15194_s30, %s9254_s7  }
0x1452 PF: > { %s9296_s8 = sand.u32 1, %s12648_s23   ;;  %p15495_p0 = scmp.ne.s32.totalorder %s15354_s15, 0 }
0x1453   : > { %p15496_p2 = scmp.ge.s32.totalorder %s12660_s25, 2  ;;  %s9297_s28 = scalar_lea.sflag [#allocation5], %s9296_s8 }
0x1455   : > { %p12108_p3 = pnand %p15496_p2, %p15495_p0 }
0x1457   : > { %12643 = dma.done.wait (!%p12108_p3), %s9297_s28, 32  }
0x1458   : > { %12645 = vsyncadd (!%p12108_p3), %s9297_s28, 4294967264  ;;  %p39_p6 = scmp.ge.s32.totalorder %s12969_s22, 4   ;;  %s15497_s23 = smov %s12652_s24 }
0x1459   : > { %s15498_s24 = smov %s12656_s2  ;;  %s15499_s2 = smov %s12981_s1 }
0x145a   : > { %s15500_s25 = smov %s12969_s22  ;;  %41 = sbr.rel (!%p39_p6) target bundleno = 27 (0x1b), region = 238 }
0x1461   :  { %9318 = vsyncpa [#allocation4], 1 }
0x1462   :  { %9320 = vsyncpa [#allocation4 + $0x1], 1 }
0x1463   :  { %9321 = vsyncpa [#allocation7], 1 }
0x1464   :  { %9322 = vsyncpa [#allocation10], 1 }
0x1465   :  { %9323 = vsyncpa [#allocation13], 1 }
0x1466   :  { %9324 = vsyncpa [#allocation5], 1 }
0x1467   :  { %9326 = vsyncpa [#allocation5 + $0x1], 1 }

</bundles_post_ra>
